<compile_context>
chip_gen: v6e
topology: v6e:2x2x1
jax: 0.10.0
libtpu: 0.0.40
codegen_flags: <defaults>
</compile_context>

<pallas_src>
import functools
import math

import jax
import jax.numpy as jnp
from jax.experimental import pallas as pl
from jax.experimental.pallas import tpu as pltpu


# ----------------------------- in-kernel helpers ----------------------------

def _layernorm(x, g, b, eps=1e-5):
    mu = jnp.mean(x, axis=-1, keepdims=True)
    xc = x - mu
    var = jnp.mean(xc * xc, axis=-1, keepdims=True)
    return xc * jax.lax.rsqrt(var + eps) * g + b


def _mha_single(q, k, v, mask, n_head):
    """Multi-head attention for one batch element, register-resident.

    q: (T, E) f32 (q-scale already folded into the projection), k/v: (S, E) f32.
    Returns (T, E) f32; per-head outputs are concatenated along lanes in vregs
    (no VMEM scratch, no masked narrow stores)."""
    T, E = q.shape
    Dh = E // n_head
    dn = (((1,), (1,)), ((), ()))                    # q @ k^T over head_dim
    heads = []
    for h in range(n_head):
        sl = slice(h * Dh, (h + 1) * Dh)
        qh = q[:, sl].astype(jnp.bfloat16)
        kh = k[:, sl].astype(jnp.bfloat16)
        vh = v[:, sl].astype(jnp.bfloat16)
        s = jax.lax.dot_general(qh, kh, dn,
                                preferred_element_type=jnp.float32)   # (T, S)
        if mask is not None:
            s = s + mask
        s = s - jnp.max(s, axis=-1, keepdims=True)
        p = jnp.exp(s)
        p = p * pl.reciprocal(jnp.sum(p, axis=-1, keepdims=True), approx=True)
        heads.append(jnp.dot(p.astype(jnp.bfloat16), vh,
                             preferred_element_type=jnp.float32))     # (T, Dh)
    return jnp.concatenate(heads, axis=-1)                            # (T, E)


# ----------------------------- Pallas kernels ------------------------------

def _encoder_stack_kernel(x_ref, wqkv_ref, bqkv_ref, wo_ref, bo_ref,
                          ln1g_ref, ln1b_ref, ffw1_ref, ffb1_ref,
                          ffw2_ref, ffb2_ref, ln2g_ref, ln2b_ref,
                          fng_ref, fnb_ref, *rest, n_head, has_mask):
    if has_mask:
        mask_ref, o_ref, act_ref = rest
        mask = mask_ref[...]
    else:
        o_ref, act_ref = rest
        mask = None

    l = pl.program_id(1)

    @pl.when(l == 0)
    def _():
        act_ref[...] = x_ref[...].astype(jnp.float32)

    x = act_ref[...]                                            # (S, E) f32
    E = x.shape[-1]

    # self-attention (fused QKV projection; bf16 MXU operands, f32 accumulate)
    qkv = (jnp.dot(x.astype(jnp.bfloat16), wqkv_ref[...],
                   preferred_element_type=jnp.float32) + bqkv_ref[...])
    attn = _mha_single(qkv[:, :E], qkv[:, E:2 * E], qkv[:, 2 * E:], mask, n_head)
    attn = (jnp.dot(attn.astype(jnp.bfloat16), wo_ref[...],
                    preferred_element_type=jnp.float32) + bo_ref[...])
    x = _layernorm(x + attn, ln1g_ref[...], ln1b_ref[...])      # post-norm

    # fused feed-forward; hidden (S, dim_ff) never leaves VMEM/vregs
    h = jnp.maximum(
        jnp.dot(x.astype(jnp.bfloat16), ffw1_ref[...],
                preferred_element_type=jnp.float32) + ffb1_ref[...], 0.0)
    h = (jnp.dot(h.astype(jnp.bfloat16), ffw2_ref[...],
                 preferred_element_type=jnp.float32) + ffb2_ref[...])
    x = _layernorm(x + h, ln2g_ref[...], ln2b_ref[...])
    act_ref[...] = x

    # final encoder LayerNorm folded into the last layer step
    @pl.when(l == pl.num_programs(1) - 1)
    def _():
        o_ref[...] = _layernorm(x, fng_ref[...], fnb_ref[...]).astype(o_ref.dtype)


def _decoder_stack_kernel(x_ref, mem_ref,
                          wqkv_ref, bqkv_ref, wo1_ref, bo1_ref, ln1g_ref, ln1b_ref,
                          wq_ref, bq_ref, wkv_ref, bkv_ref, wo2_ref, bo2_ref,
                          ln2g_ref, ln2b_ref,
                          ffw1_ref, ffb1_ref, ffw2_ref, ffb2_ref, ln3g_ref, ln3b_ref,
                          fng_ref, fnb_ref, decw_ref, decb_ref, *rest,
                          n_head, has_tgt_mask, has_mem_mask):
    rest = list(rest)
    tgt_mask = rest.pop(0)[...] if has_tgt_mask else None
    mem_mask = rest.pop(0)[...] if has_mem_mask else None
    o_ref, act_ref = rest

    l = pl.program_id(1)

    @pl.when(l == 0)
    def _():
        act_ref[...] = x_ref[...].astype(jnp.float32)

    x = act_ref[...]                                            # (T, E) f32
    mem = mem_ref[...].astype(jnp.bfloat16)                     # (S, E) bf16
    E = x.shape[-1]

    # masked self-attention (fused QKV)
    qkv = (jnp.dot(x.astype(jnp.bfloat16), wqkv_ref[...],
                   preferred_element_type=jnp.float32) + bqkv_ref[...])
    sa = _mha_single(qkv[:, :E], qkv[:, E:2 * E], qkv[:, 2 * E:], tgt_mask, n_head)
    sa = (jnp.dot(sa.astype(jnp.bfloat16), wo1_ref[...],
                  preferred_element_type=jnp.float32) + bo1_ref[...])
    x = _layernorm(x + sa, ln1g_ref[...], ln1b_ref[...])

    # cross-attention (fused K/V projection of memory)
    q = (jnp.dot(x.astype(jnp.bfloat16), wq_ref[...],
                 preferred_element_type=jnp.float32) + bq_ref[...])
    kv = (jnp.dot(mem, wkv_ref[...],
                  preferred_element_type=jnp.float32) + bkv_ref[...])
    ca = _mha_single(q, kv[:, :E], kv[:, E:], mem_mask, n_head)
    ca = (jnp.dot(ca.astype(jnp.bfloat16), wo2_ref[...],
                  preferred_element_type=jnp.float32) + bo2_ref[...])
    x = _layernorm(x + ca, ln2g_ref[...], ln2b_ref[...])

    # fused feed-forward
    h = jnp.maximum(
        jnp.dot(x.astype(jnp.bfloat16), ffw1_ref[...],
                preferred_element_type=jnp.float32) + ffb1_ref[...], 0.0)
    h = (jnp.dot(h.astype(jnp.bfloat16), ffw2_ref[...],
                 preferred_element_type=jnp.float32) + ffb2_ref[...])
    x = _layernorm(x + h, ln3g_ref[...], ln3b_ref[...])
    act_ref[...] = x

    # final LN + decode linear + softmax fused into the last layer step.
    # padded bias columns are -1e9 -> exp underflows to exactly 0, so the
    # probabilities of the real columns match the unpadded softmax.
    @pl.when(l == pl.num_programs(1) - 1)
    def _():
        y = _layernorm(x, fng_ref[...], fnb_ref[...])
        logits = (jnp.dot(y.astype(jnp.bfloat16), decw_ref[...],
                          preferred_element_type=jnp.float32) + decb_ref[...])
        logits = logits - jnp.max(logits, axis=-1, keepdims=True)
        e = jnp.exp(logits)
        # exact divide: user-visible probabilities must sum to 1
        o_ref[...] = (e / jnp.sum(e, axis=-1, keepdims=True)).astype(o_ref.dtype)


# ----------------------------- kernel wrappers ------------------------------

def _layer_spec(arr):
    # stacked per-layer weight: leading layer dim squeezed out, streamed by grid
    return pl.BlockSpec((None,) + arr.shape[1:], lambda b, l: (l, 0, 0))


def encoder_stack(x, p, src_mask, n_head):
    """x: (N, S, E) f32 -> encoder memory (N, S, E) f32 (final norm applied)."""
    N, S, E = x.shape
    L = p["wqkv"].shape[0]
    has_mask = src_mask is not None

    in_specs = [
        pl.BlockSpec((None, S, E), lambda b, l: (b, 0, 0)),    # x
        _layer_spec(p["wqkv"]), _layer_spec(p["bqkv"]),
        _layer_spec(p["wo"]), _layer_spec(p["bo"]),
        _layer_spec(p["ln1_g"]), _layer_spec(p["ln1_b"]),
        _layer_spec(p["ff_w1"]), _layer_spec(p["ff_b1"]),
        _layer_spec(p["ff_w2"]), _layer_spec(p["ff_b2"]),
        _layer_spec(p["ln2_g"]), _layer_spec(p["ln2_b"]),
        pl.BlockSpec((1, E), lambda b, l: (0, 0)),             # final norm g
        pl.BlockSpec((1, E), lambda b, l: (0, 0)),             # final norm b
    ]
    args = [x, p["wqkv"], p["bqkv"], p["wo"], p["bo"],
            p["ln1_g"], p["ln1_b"], p["ff_w1"], p["ff_b1"],
            p["ff_w2"], p["ff_b2"], p["ln2_g"], p["ln2_b"],
            p["norm_g"], p["norm_b"]]
    if has_mask:
        in_specs.append(pl.BlockSpec((S, S), lambda b, l: (0, 0)))
        args.append(src_mask)

    kern = functools.partial(_encoder_stack_kernel, n_head=n_head,
                             has_mask=has_mask)
    return pl.pallas_call(
        kern,
        out_shape=jax.ShapeDtypeStruct((N, S, E), jnp.float32),
        grid_spec=pltpu.PrefetchScalarGridSpec(
            num_scalar_prefetch=0,
            grid=(N, L),
            in_specs=in_specs,
            out_specs=pl.BlockSpec((None, S, E), lambda b, l: (b, 0, 0)),
            scratch_shapes=[pltpu.VMEM((S, E), jnp.float32)],
        ),
        compiler_params=pltpu.CompilerParams(
            dimension_semantics=("parallel", "arbitrary")),
    )(*args)


def decoder_stack(x, memory, p, dec_w, dec_b, tgt_mask, mem_mask, n_head):
    """x: (N, T, E), memory: (N, S, E) -> softmax probs (N, T, Vpad)."""
    N, T, E = x.shape
    S = memory.shape[1]
    L = p["wqkv"].shape[0]
    Vpad = dec_w.shape[1]
    has_tgt = tgt_mask is not None
    has_mem = mem_mask is not None

    in_specs = [
        pl.BlockSpec((None, T, E), lambda b, l: (b, 0, 0)),    # tgt activation
        pl.BlockSpec((None, S, E), lambda b, l: (b, 0, 0)),    # encoder memory
        _layer_spec(p["wqkv"]), _layer_spec(p["bqkv"]),
        _layer_spec(p["wo1"]), _layer_spec(p["bo1"]),
        _layer_spec(p["ln1_g"]), _layer_spec(p["ln1_b"]),
        _layer_spec(p["wq"]), _layer_spec(p["bq"]),
        _layer_spec(p["wkv"]), _layer_spec(p["bkv"]),
        _layer_spec(p["wo2"]), _layer_spec(p["bo2"]),
        _layer_spec(p["ln2_g"]), _layer_spec(p["ln2_b"]),
        _layer_spec(p["ff_w1"]), _layer_spec(p["ff_b1"]),
        _layer_spec(p["ff_w2"]), _layer_spec(p["ff_b2"]),
        _layer_spec(p["ln3_g"]), _layer_spec(p["ln3_b"]),
        pl.BlockSpec((1, E), lambda b, l: (0, 0)),             # final norm g
        pl.BlockSpec((1, E), lambda b, l: (0, 0)),             # final norm b
        pl.BlockSpec((E, Vpad), lambda b, l: (0, 0)),          # decode weight
        pl.BlockSpec((1, Vpad), lambda b, l: (0, 0)),          # decode bias
    ]
    args = [x, memory, p["wqkv"], p["bqkv"], p["wo1"], p["bo1"],
            p["ln1_g"], p["ln1_b"], p["wq"], p["bq"], p["wkv"], p["bkv"],
            p["wo2"], p["bo2"], p["ln2_g"], p["ln2_b"],
            p["ff_w1"], p["ff_b1"], p["ff_w2"], p["ff_b2"],
            p["ln3_g"], p["ln3_b"], p["norm_g"], p["norm_b"], dec_w, dec_b]
    if has_tgt:
        in_specs.append(pl.BlockSpec((T, T), lambda b, l: (0, 0)))
        args.append(tgt_mask)
    if has_mem:
        in_specs.append(pl.BlockSpec((T, S), lambda b, l: (0, 0)))
        args.append(mem_mask)

    kern = functools.partial(_decoder_stack_kernel, n_head=n_head,
                             has_tgt_mask=has_tgt, has_mem_mask=has_mem)
    return pl.pallas_call(
        kern,
        out_shape=jax.ShapeDtypeStruct((N, T, Vpad), jnp.float32),
        grid_spec=pltpu.PrefetchScalarGridSpec(
            num_scalar_prefetch=0,
            grid=(N, L),
            in_specs=in_specs,
            out_specs=pl.BlockSpec((None, T, Vpad), lambda b, l: (b, 0, 0)),
            scratch_shapes=[pltpu.VMEM((T, E), jnp.float32)],
        ),
        compiler_params=pltpu.CompilerParams(
            dimension_semantics=("parallel", "arbitrary")),
    )(*args)


# ----------------------------- forward pass ---------------------------------

def base_lgm_forward(params, src, tgt, src_mask=None, tgt_mask=None, n_head=4):
    """src: (S, N) int32, tgt: (T, N) int32 -> (T, N, vocab) f32 softmax probs."""
    assert src.shape[1] == tgt.shape[1]
    emb = params["embedding"]
    V = emb.shape[0]

    # TODO(synk): embedding gather stays as an XLA gather; could be folded into
    # the first grid step via PrefetchScalarGridSpec + pl.Element row indexing.
    src_x = jnp.take(emb, src.T, axis=0)          # (N, S, E)
    tgt_x = jnp.take(emb, tgt.T, axis=0)          # (N, T, E)

    memory = encoder_stack(src_x, params["enc"], src_mask, n_head)   # (N, S, E)
    probs_pad = decoder_stack(tgt_x, memory, params["dec"],
                              params["decode_w_pad"], params["decode_b_pad"],
                              tgt_mask, None, n_head)                # (N, T, Vpad)
    return probs_pad[:, :, :V].transpose(1, 0, 2)                    # (T, N, V)


# ----------------------------- parameter init -------------------------------

def init_params(key, vocab, d_model, n_head, dim_ff, n_enc, n_dec):
    keys = iter(jax.random.split(key, 64))
    q_scale = 1.0 / math.sqrt(d_model // n_head)

    def w(shape, std=0.02, dtype=jnp.float32):
        return (std * jax.random.normal(next(keys), shape, jnp.float32)).astype(dtype)

    def ones(*shape):
        return jnp.ones(shape, jnp.float32)

    def zeros(*shape):
        return jnp.zeros(shape, jnp.float32)

    # ---- encoder stack (per-layer weights stacked along leading layer axis)
    e_wqkv = w((n_enc, d_model, 3 * d_model))
    e_bqkv = w((n_enc, 1, 3 * d_model))
    # fold 1/sqrt(Dh) q-scale into the Q projection weight + bias
    e_wqkv = e_wqkv.at[:, :, :d_model].multiply(q_scale)
    e_bqkv = e_bqkv.at[:, :, :d_model].multiply(q_scale)
    enc = {
        "wqkv": e_wqkv.astype(jnp.bfloat16), "bqkv": e_bqkv,
        "wo": w((n_enc, d_model, d_model), dtype=jnp.bfloat16),
        "bo": w((n_enc, 1, d_model)),
        "ln1_g": ones(n_enc, 1, d_model), "ln1_b": zeros(n_enc, 1, d_model),
        "ff_w1": w((n_enc, d_model, dim_ff), dtype=jnp.bfloat16),
        "ff_b1": w((n_enc, 1, dim_ff)),
        "ff_w2": w((n_enc, dim_ff, d_model), dtype=jnp.bfloat16),
        "ff_b2": w((n_enc, 1, d_model)),
        "ln2_g": ones(n_enc, 1, d_model), "ln2_b": zeros(n_enc, 1, d_model),
        "norm_g": ones(1, d_model), "norm_b": zeros(1, d_model),
    }

    # ---- decoder stack
    d_wqkv = w((n_dec, d_model, 3 * d_model))
    d_bqkv = w((n_dec, 1, 3 * d_model))
    d_wqkv = d_wqkv.at[:, :, :d_model].multiply(q_scale)
    d_bqkv = d_bqkv.at[:, :, :d_model].multiply(q_scale)
    d_wq = w((n_dec, d_model, d_model)) * q_scale
    d_bq = w((n_dec, 1, d_model)) * q_scale
    dec = {
        "wqkv": d_wqkv.astype(jnp.bfloat16), "bqkv": d_bqkv,
        "wo1": w((n_dec, d_model, d_model), dtype=jnp.bfloat16),
        "bo1": w((n_dec, 1, d_model)),
        "ln1_g": ones(n_dec, 1, d_model), "ln1_b": zeros(n_dec, 1, d_model),
        "wq": d_wq.astype(jnp.bfloat16), "bq": d_bq,
        "wkv": w((n_dec, d_model, 2 * d_model), dtype=jnp.bfloat16),
        "bkv": w((n_dec, 1, 2 * d_model)),
        "wo2": w((n_dec, d_model, d_model), dtype=jnp.bfloat16),
        "bo2": w((n_dec, 1, d_model)),
        "ln2_g": ones(n_dec, 1, d_model), "ln2_b": zeros(n_dec, 1, d_model),
        "ff_w1": w((n_dec, d_model, dim_ff), dtype=jnp.bfloat16),
        "ff_b1": w((n_dec, 1, dim_ff)),
        "ff_w2": w((n_dec, dim_ff, d_model), dtype=jnp.bfloat16),
        "ff_b2": w((n_dec, 1, d_model)),
        "ln3_g": ones(n_dec, 1, d_model), "ln3_b": zeros(n_dec, 1, d_model),
        "norm_g": ones(1, d_model), "norm_b": zeros(1, d_model),
    }

    # ---- decode head padded to a lane-dense 128-wide slab; padded bias = -1e9
    # so those columns softmax to exactly zero. Bias stays f32 (pre-softmax add).
    vpad = ((vocab + 127) // 128) * 128
    dw = w((d_model, vocab))
    db = w((vocab,))
    dw_pad = (jnp.zeros((d_model, vpad), jnp.float32)
              .at[:, :vocab].set(dw).astype(jnp.bfloat16))
    db_pad = jnp.full((1, vpad), -1e9, jnp.float32).at[0, :vocab].set(db)

    return {
        "embedding": w((vocab, d_model), std=1.0),
        "enc": enc, "dec": dec,
        "decode_w_pad": dw_pad, "decode_b_pad": db_pad,
    }


# ------------------------------------ main -----------------------------------

if __name__ == "__main__":
    VOCAB = 50
    D_MODEL = 32
    N_HEAD = 4
    DIM_FF = 64
    N_ENC = 2
    N_DEC = 2
    S = 8      # source sequence length
    T = 8      # target sequence length
    B = 2      # batch

    root = jax.random.PRNGKey(0)
    kp, ks, kt = jax.random.split(root, 3)

    params = init_params(kp, VOCAB, D_MODEL, N_HEAD, DIM_FF, N_ENC, N_DEC)

    src = jax.random.randint(ks, (S, B), 0, VOCAB, dtype=jnp.int32)  # (seq, batch)
    tgt = jax.random.randint(kt, (T, B), 0, VOCAB, dtype=jnp.int32)

    # causal mask like nn.Transformer.generate_square_subsequent_mask
    # (large negative instead of -inf; identical softmax result)
    tgt_mask = jnp.where(
        jnp.triu(jnp.ones((T, T), jnp.bool_), k=1), -1e9, 0.0
    ).astype(jnp.float32)

    fwd = jax.jit(functools.partial(base_lgm_forward, n_head=N_HEAD))
    probs = fwd(params, src, tgt, None, tgt_mask)
    jax.block_until_ready(probs)

    assert probs.shape == (T, B, VOCAB)
    assert bool(jnp.all(jnp.isfinite(probs)))
    # rows of the final softmax sum to 1
    assert bool(jnp.allclose(jnp.sum(probs, axis=-1), 1.0, atol=1e-4))

    # TODO(synk): generate()/rlhf_generate() autoregressive loops and vocab
    # lookup are host-side logic, not translated to Pallas.
    print("KERNEL_OK")
</pallas_src>

<mosaic_0001>
module attributes {stable_mosaic.version = 11 : i64} {
  func.func @_encoder_stack_kernel(%arg0: i32, %arg1: i32, %arg2: memref<1x8x32xf32, #tpu.memory_space<vmem>>, %arg3: memref<1x32x96xbf16, #tpu.memory_space<vmem>>, %arg4: memref<1x1x96xf32, #tpu.memory_space<vmem>>, %arg5: memref<1x32x32xbf16, #tpu.memory_space<vmem>>, %arg6: memref<1x1x32xf32, #tpu.memory_space<vmem>>, %arg7: memref<1x1x32xf32, #tpu.memory_space<vmem>>, %arg8: memref<1x1x32xf32, #tpu.memory_space<vmem>>, %arg9: memref<1x32x64xbf16, #tpu.memory_space<vmem>>, %arg10: memref<1x1x64xf32, #tpu.memory_space<vmem>>, %arg11: memref<1x64x32xbf16, #tpu.memory_space<vmem>>, %arg12: memref<1x1x32xf32, #tpu.memory_space<vmem>>, %arg13: memref<1x1x32xf32, #tpu.memory_space<vmem>>, %arg14: memref<1x1x32xf32, #tpu.memory_space<vmem>>, %arg15: memref<1x32xf32, #tpu.memory_space<vmem>>, %arg16: memref<1x32xf32, #tpu.memory_space<vmem>>, %arg17: memref<1x8x32xf32, #tpu.memory_space<vmem>>, %arg18: memref<8x32xf32, #tpu.memory_space<vmem>>) attributes {dimension_semantics = [#tpu.dimension_semantics<parallel>, #tpu.dimension_semantics<arbitrary>], iteration_bounds = array<i64: 2, 2>, scalar_prefetch = 0 : i64, scratch_operands = 1 : i64, tpu.core_type = #tpu.core_type<tc>, window_params = [{transform_indices = @transform_0, window_bounds = array<i64: 1, 8, 32>}, {transform_indices = @transform_1, window_bounds = array<i64: 1, 32, 96>}, {transform_indices = @transform_2, window_bounds = array<i64: 1, 1, 96>}, {transform_indices = @transform_3, window_bounds = array<i64: 1, 32, 32>}, {transform_indices = @transform_4, window_bounds = array<i64: 1, 1, 32>}, {transform_indices = @transform_5, window_bounds = array<i64: 1, 1, 32>}, {transform_indices = @transform_6, window_bounds = array<i64: 1, 1, 32>}, {transform_indices = @transform_7, window_bounds = array<i64: 1, 32, 64>}, {transform_indices = @transform_8, window_bounds = array<i64: 1, 1, 64>}, {transform_indices = @transform_9, window_bounds = array<i64: 1, 64, 32>}, {transform_indices = @transform_10, window_bounds = array<i64: 1, 1, 32>}, {transform_indices = @transform_11, window_bounds = array<i64: 1, 1, 32>}, {transform_indices = @transform_12, window_bounds = array<i64: 1, 1, 32>}, {pipeline_mode = #tpu.pipeline_mode<synchronous>, transform_indices = @transform_13, window_bounds = array<i64: 1, 32>}, {pipeline_mode = #tpu.pipeline_mode<synchronous>, transform_indices = @transform_14, window_bounds = array<i64: 1, 32>}, {transform_indices = @transform_15, window_bounds = array<i64: 1, 8, 32>}]} {
    %c0_i32 = arith.constant 0 : i32
    %0 = arith.cmpi eq, %arg1, %c0_i32 : i32
    %1 = arith.extui %0 : i1 to i32
    %c0_i32_0 = arith.constant 0 : i32
    %2 = arith.cmpi ne, %1, %c0_i32_0 : i32
    scf.if %2 {
      %c0_71 = arith.constant 0 : index
      %c0_72 = arith.constant 0 : index
      %c0_73 = arith.constant 0 : index
      %172 = vector.load %arg2[%c0_71, %c0_72, %c0_73] : memref<1x8x32xf32, #tpu.memory_space<vmem>>, vector<1x8x32xf32>
      %173 = vector.shape_cast %172 : vector<1x8x32xf32> to vector<8x32xf32>
      %c0_74 = arith.constant 0 : index
      %c0_75 = arith.constant 0 : index
      %174 = vector.load %arg18[%c0_74, %c0_75] : memref<8x32xf32, #tpu.memory_space<vmem>>, vector<8x32xf32>
      tpu.vector_store %arg18[%c0_74, %c0_75], %173 {strides = array<i32>} : memref<8x32xf32, #tpu.memory_space<vmem>>, vector<8x32xf32>,
    } else {
    }
    %c0 = arith.constant 0 : index
    %c0_1 = arith.constant 0 : index
    %3 = vector.load %arg18[%c0, %c0_1] : memref<8x32xf32, #tpu.memory_space<vmem>>, vector<8x32xf32>
    %4 = arith.truncf %3 : vector<8x32xf32> to vector<8x32xbf16>
    %c0_2 = arith.constant 0 : index
    %c0_3 = arith.constant 0 : index
    %c0_4 = arith.constant 0 : index
    %5 = vector.load %arg3[%c0_2, %c0_3, %c0_4] : memref<1x32x96xbf16, #tpu.memory_space<vmem>>, vector<1x32x96xbf16>
    %6 = vector.shape_cast %5 : vector<1x32x96xbf16> to vector<32x96xbf16>
    %cst = arith.constant dense<0.000000e+00> : vector<8x96xf32>
    %7 = tpu.matmul %4, %6, %cst {dimension_numbers = #tpu.dot_dimension_numbers<[1], [0], [0], [1], [0, 0, 1, 1], [], []>} : vector<8x32xbf16>, vector<32x96xbf16>, vector<8x96xf32> -> vector<8x96xf32>
    %c0_5 = arith.constant 0 : index
    %c0_6 = arith.constant 0 : index
    %c0_7 = arith.constant 0 : index
    %8 = vector.load %arg4[%c0_5, %c0_6, %c0_7] : memref<1x1x96xf32, #tpu.memory_space<vmem>>, vector<1x1x96xf32>
    %9 = vector.shape_cast %8 : vector<1x1x96xf32> to vector<1x96xf32>
    %10 = vector.broadcast %9 : vector<1x96xf32> to vector<8x96xf32>
    %11 = arith.addf %7, %10 : vector<8x96xf32>
    %12 = vector.extract_strided_slice %11 {offsets = [0, 0], sizes = [8, 32], strides = [1, 1]} : vector<8x96xf32> to vector<8x32xf32>
    %13 = vector.extract_strided_slice %11 {offsets = [0, 32], sizes = [8, 32], strides = [1, 1]} : vector<8x96xf32> to vector<8x32xf32>
    %14 = vector.extract_strided_slice %11 {offsets = [0, 64], sizes = [8, 32], strides = [1, 1]} : vector<8x96xf32> to vector<8x32xf32>
    %15 = vector.extract_strided_slice %12 {offsets = [0, 0], sizes = [8, 8], strides = [1, 1]} : vector<8x32xf32> to vector<8x8xf32>
    %16 = arith.truncf %15 : vector<8x8xf32> to vector<8x8xbf16>
    %17 = vector.extract_strided_slice %13 {offsets = [0, 0], sizes = [8, 8], strides = [1, 1]} : vector<8x32xf32> to vector<8x8xf32>
    %18 = arith.truncf %17 : vector<8x8xf32> to vector<8x8xbf16>
    %19 = vector.extract_strided_slice %14 {offsets = [0, 0], sizes = [8, 8], strides = [1, 1]} : vector<8x32xf32> to vector<8x8xf32>
    %20 = arith.truncf %19 : vector<8x8xf32> to vector<8x8xbf16>
    %cst_8 = arith.constant dense<0.000000e+00> : vector<8x8xf32>
    %21 = tpu.matmul %16, %18, %cst_8 {dimension_numbers = #tpu.dot_dimension_numbers<[1], [1], [0], [0], [0, 0, 1, 0], [], []>} : vector<8x8xbf16>, vector<8x8xbf16>, vector<8x8xf32> -> vector<8x8xf32>
    %cst_9 = arith.constant dense<0xFF800000> : vector<8xf32>
    %22 = vector.multi_reduction <maximumf>, %21, %cst_9 [1] : vector<8x8xf32> to vector<8xf32>
    %23 = vector.shape_cast %22 : vector<8xf32> to vector<8x1xf32>
    %24 = vector.broadcast %23 : vector<8x1xf32> to vector<8x8xf32>
    %25 = arith.subf %21, %24 : vector<8x8xf32>
    %26 = math.exp %25 : vector<8x8xf32>
    %cst_10 = arith.constant dense<0.000000e+00> : vector<8xf32>
    %27 = vector.multi_reduction <add>, %26, %cst_10 [1] : vector<8x8xf32> to vector<8xf32>
    %28 = vector.shape_cast %27 : vector<8xf32> to vector<8x1xf32>
    %29 = tpu.reciprocal %28 {approx = true} : vector<8x1xf32> -> vector<8x1xf32>
    %30 = vector.broadcast %29 : vector<8x1xf32> to vector<8x8xf32>
    %31 = arith.mulf %26, %30 : vector<8x8xf32>
    %32 = arith.truncf %31 : vector<8x8xf32> to vector<8x8xbf16>
    %cst_11 = arith.constant dense<0.000000e+00> : vector<8x8xf32>
    %33 = tpu.matmul %32, %20, %cst_11 {dimension_numbers = #tpu.dot_dimension_numbers<[1], [0], [0], [1], [0, 0, 1, 1], [], []>} : vector<8x8xbf16>, vector<8x8xbf16>, vector<8x8xf32> -> vector<8x8xf32>
    %34 = vector.extract_strided_slice %12 {offsets = [0, 8], sizes = [8, 8], strides = [1, 1]} : vector<8x32xf32> to vector<8x8xf32>
    %35 = arith.truncf %34 : vector<8x8xf32> to vector<8x8xbf16>
    %36 = vector.extract_strided_slice %13 {offsets = [0, 8], sizes = [8, 8], strides = [1, 1]} : vector<8x32xf32> to vector<8x8xf32>
    %37 = arith.truncf %36 : vector<8x8xf32> to vector<8x8xbf16>
    %38 = vector.extract_strided_slice %14 {offsets = [0, 8], sizes = [8, 8], strides = [1, 1]} : vector<8x32xf32> to vector<8x8xf32>
    %39 = arith.truncf %38 : vector<8x8xf32> to vector<8x8xbf16>
    %cst_12 = arith.constant dense<0.000000e+00> : vector<8x8xf32>
    %40 = tpu.matmul %35, %37, %cst_12 {dimension_numbers = #tpu.dot_dimension_numbers<[1], [1], [0], [0], [0, 0, 1, 0], [], []>} : vector<8x8xbf16>, vector<8x8xbf16>, vector<8x8xf32> -> vector<8x8xf32>
    %cst_13 = arith.constant dense<0xFF800000> : vector<8xf32>
    %41 = vector.multi_reduction <maximumf>, %40, %cst_13 [1] : vector<8x8xf32> to vector<8xf32>
    %42 = vector.shape_cast %41 : vector<8xf32> to vector<8x1xf32>
    %43 = vector.broadcast %42 : vector<8x1xf32> to vector<8x8xf32>
    %44 = arith.subf %40, %43 : vector<8x8xf32>
    %45 = math.exp %44 : vector<8x8xf32>
    %cst_14 = arith.constant dense<0.000000e+00> : vector<8xf32>
    %46 = vector.multi_reduction <add>, %45, %cst_14 [1] : vector<8x8xf32> to vector<8xf32>
    %47 = vector.shape_cast %46 : vector<8xf32> to vector<8x1xf32>
    %48 = tpu.reciprocal %47 {approx = true} : vector<8x1xf32> -> vector<8x1xf32>
    %49 = vector.broadcast %48 : vector<8x1xf32> to vector<8x8xf32>
    %50 = arith.mulf %45, %49 : vector<8x8xf32>
    %51 = arith.truncf %50 : vector<8x8xf32> to vector<8x8xbf16>
    %cst_15 = arith.constant dense<0.000000e+00> : vector<8x8xf32>
    %52 = tpu.matmul %51, %39, %cst_15 {dimension_numbers = #tpu.dot_dimension_numbers<[1], [0], [0], [1], [0, 0, 1, 1], [], []>} : vector<8x8xbf16>, vector<8x8xbf16>, vector<8x8xf32> -> vector<8x8xf32>
    %53 = vector.extract_strided_slice %12 {offsets = [0, 16], sizes = [8, 8], strides = [1, 1]} : vector<8x32xf32> to vector<8x8xf32>
    %54 = arith.truncf %53 : vector<8x8xf32> to vector<8x8xbf16>
    %55 = vector.extract_strided_slice %13 {offsets = [0, 16], sizes = [8, 8], strides = [1, 1]} : vector<8x32xf32> to vector<8x8xf32>
    %56 = arith.truncf %55 : vector<8x8xf32> to vector<8x8xbf16>
    %57 = vector.extract_strided_slice %14 {offsets = [0, 16], sizes = [8, 8], strides = [1, 1]} : vector<8x32xf32> to vector<8x8xf32>
    %58 = arith.truncf %57 : vector<8x8xf32> to vector<8x8xbf16>
    %cst_16 = arith.constant dense<0.000000e+00> : vector<8x8xf32>
    %59 = tpu.matmul %54, %56, %cst_16 {dimension_numbers = #tpu.dot_dimension_numbers<[1], [1], [0], [0], [0, 0, 1, 0], [], []>} : vector<8x8xbf16>, vector<8x8xbf16>, vector<8x8xf32> -> vector<8x8xf32>
    %cst_17 = arith.constant dense<0xFF800000> : vector<8xf32>
    %60 = vector.multi_reduction <maximumf>, %59, %cst_17 [1] : vector<8x8xf32> to vector<8xf32>
    %61 = vector.shape_cast %60 : vector<8xf32> to vector<8x1xf32>
    %62 = vector.broadcast %61 : vector<8x1xf32> to vector<8x8xf32>
    %63 = arith.subf %59, %62 : vector<8x8xf32>
    %64 = math.exp %63 : vector<8x8xf32>
    %cst_18 = arith.constant dense<0.000000e+00> : vector<8xf32>
    %65 = vector.multi_reduction <add>, %64, %cst_18 [1] : vector<8x8xf32> to vector<8xf32>
    %66 = vector.shape_cast %65 : vector<8xf32> to vector<8x1xf32>
    %67 = tpu.reciprocal %66 {approx = true} : vector<8x1xf32> -> vector<8x1xf32>
    %68 = vector.broadcast %67 : vector<8x1xf32> to vector<8x8xf32>
    %69 = arith.mulf %64, %68 : vector<8x8xf32>
    %70 = arith.truncf %69 : vector<8x8xf32> to vector<8x8xbf16>
    %cst_19 = arith.constant dense<0.000000e+00> : vector<8x8xf32>
    %71 = tpu.matmul %70, %58, %cst_19 {dimension_numbers = #tpu.dot_dimension_numbers<[1], [0], [0], [1], [0, 0, 1, 1], [], []>} : vector<8x8xbf16>, vector<8x8xbf16>, vector<8x8xf32> -> vector<8x8xf32>
    %72 = vector.extract_strided_slice %12 {offsets = [0, 24], sizes = [8, 8], strides = [1, 1]} : vector<8x32xf32> to vector<8x8xf32>
    %73 = arith.truncf %72 : vector<8x8xf32> to vector<8x8xbf16>
    %74 = vector.extract_strided_slice %13 {offsets = [0, 24], sizes = [8, 8], strides = [1, 1]} : vector<8x32xf32> to vector<8x8xf32>
    %75 = arith.truncf %74 : vector<8x8xf32> to vector<8x8xbf16>
    %76 = vector.extract_strided_slice %14 {offsets = [0, 24], sizes = [8, 8], strides = [1, 1]} : vector<8x32xf32> to vector<8x8xf32>
    %77 = arith.truncf %76 : vector<8x8xf32> to vector<8x8xbf16>
    %cst_20 = arith.constant dense<0.000000e+00> : vector<8x8xf32>
    %78 = tpu.matmul %73, %75, %cst_20 {dimension_numbers = #tpu.dot_dimension_numbers<[1], [1], [0], [0], [0, 0, 1, 0], [], []>} : vector<8x8xbf16>, vector<8x8xbf16>, vector<8x8xf32> -> vector<8x8xf32>
    %cst_21 = arith.constant dense<0xFF800000> : vector<8xf32>
    %79 = vector.multi_reduction <maximumf>, %78, %cst_21 [1] : vector<8x8xf32> to vector<8xf32>
    %80 = vector.shape_cast %79 : vector<8xf32> to vector<8x1xf32>
    %81 = vector.broadcast %80 : vector<8x1xf32> to vector<8x8xf32>
    %82 = arith.subf %78, %81 : vector<8x8xf32>
    %83 = math.exp %82 : vector<8x8xf32>
    %cst_22 = arith.constant dense<0.000000e+00> : vector<8xf32>
    %84 = vector.multi_reduction <add>, %83, %cst_22 [1] : vector<8x8xf32> to vector<8xf32>
    %85 = vector.shape_cast %84 : vector<8xf32> to vector<8x1xf32>
    %86 = tpu.reciprocal %85 {approx = true} : vector<8x1xf32> -> vector<8x1xf32>
    %87 = vector.broadcast %86 : vector<8x1xf32> to vector<8x8xf32>
    %88 = arith.mulf %83, %87 : vector<8x8xf32>
    %89 = arith.truncf %88 : vector<8x8xf32> to vector<8x8xbf16>
    %cst_23 = arith.constant dense<0.000000e+00> : vector<8x8xf32>
    %90 = tpu.matmul %89, %77, %cst_23 {dimension_numbers = #tpu.dot_dimension_numbers<[1], [0], [0], [1], [0, 0, 1, 1], [], []>} : vector<8x8xbf16>, vector<8x8xbf16>, vector<8x8xf32> -> vector<8x8xf32>
    %91 = tpu.concatenate %33, %52, %71, %90 in 1 : vector<8x8xf32>, vector<8x8xf32>, vector<8x8xf32>, vector<8x8xf32> -> vector<8x32xf32>
    %92 = arith.truncf %91 : vector<8x32xf32> to vector<8x32xbf16>
    %c0_24 = arith.constant 0 : index
    %c0_25 = arith.constant 0 : index
    %c0_26 = arith.constant 0 : index
    %93 = vector.load %arg5[%c0_24, %c0_25, %c0_26] : memref<1x32x32xbf16, #tpu.memory_space<vmem>>, vector<1x32x32xbf16>
    %94 = vector.shape_cast %93 : vector<1x32x32xbf16> to vector<32x32xbf16>
    %cst_27 = arith.constant dense<0.000000e+00> : vector<8x32xf32>
    %95 = tpu.matmul %92, %94, %cst_27 {dimension_numbers = #tpu.dot_dimension_numbers<[1], [0], [0], [1], [0, 0, 1, 1], [], []>} : vector<8x32xbf16>, vector<32x32xbf16>, vector<8x32xf32> -> vector<8x32xf32>
    %c0_28 = arith.constant 0 : index
    %c0_29 = arith.constant 0 : index
    %c0_30 = arith.constant 0 : index
    %96 = vector.load %arg6[%c0_28, %c0_29, %c0_30] : memref<1x1x32xf32, #tpu.memory_space<vmem>>, vector<1x1x32xf32>
    %97 = vector.shape_cast %96 : vector<1x1x32xf32> to vector<1x32xf32>
    %98 = vector.broadcast %97 : vector<1x32xf32> to vector<8x32xf32>
    %99 = arith.addf %95, %98 : vector<8x32xf32>
    %100 = arith.addf %3, %99 : vector<8x32xf32>
    %c0_31 = arith.constant 0 : index
    %c0_32 = arith.constant 0 : index
    %c0_33 = arith.constant 0 : index
    %101 = vector.load %arg7[%c0_31, %c0_32, %c0_33] : memref<1x1x32xf32, #tpu.memory_space<vmem>>, vector<1x1x32xf32>
    %102 = vector.shape_cast %101 : vector<1x1x32xf32> to vector<1x32xf32>
    %c0_34 = arith.constant 0 : index
    %c0_35 = arith.constant 0 : index
    %c0_36 = arith.constant 0 : index
    %103 = vector.load %arg8[%c0_34, %c0_35, %c0_36] : memref<1x1x32xf32, #tpu.memory_space<vmem>>, vector<1x1x32xf32>
    %104 = vector.shape_cast %103 : vector<1x1x32xf32> to vector<1x32xf32>
    %cst_37 = arith.constant dense<0.000000e+00> : vector<8xf32>
    %105 = vector.multi_reduction <add>, %100, %cst_37 [1] : vector<8x32xf32> to vector<8xf32>
    %106 = vector.shape_cast %105 : vector<8xf32> to vector<8x1xf32>
    %cst_38 = arith.constant 3.200000e+01 : f32
    %107 = vector.broadcast %cst_38 : f32 to vector<8x1xf32>
    %108 = arith.divf %106, %107 : vector<8x1xf32>
    %109 = vector.broadcast %108 : vector<8x1xf32> to vector<8x32xf32>
    %110 = arith.subf %100, %109 : vector<8x32xf32>
    %111 = arith.mulf %110, %110 : vector<8x32xf32>
    %cst_39 = arith.constant dense<0.000000e+00> : vector<8xf32>
    %112 = vector.multi_reduction <add>, %111, %cst_39 [1] : vector<8x32xf32> to vector<8xf32>
    %113 = vector.shape_cast %112 : vector<8xf32> to vector<8x1xf32>
    %cst_40 = arith.constant 3.200000e+01 : f32
    %114 = vector.broadcast %cst_40 : f32 to vector<8x1xf32>
    %115 = arith.divf %113, %114 : vector<8x1xf32>
    %cst_41 = arith.constant 9.99999974E-6 : f32
    %116 = vector.broadcast %cst_41 : f32 to vector<8x1xf32>
    %117 = arith.addf %115, %116 : vector<8x1xf32>
    %118 = math.rsqrt %117 : vector<8x1xf32>
    %119 = vector.broadcast %118 : vector<8x1xf32> to vector<8x32xf32>
    %120 = arith.mulf %110, %119 : vector<8x32xf32>
    %121 = vector.broadcast %102 : vector<1x32xf32> to vector<8x32xf32>
    %122 = arith.mulf %120, %121 : vector<8x32xf32>
    %123 = vector.broadcast %104 : vector<1x32xf32> to vector<8x32xf32>
    %124 = arith.addf %122, %123 : vector<8x32xf32>
    %125 = arith.truncf %124 : vector<8x32xf32> to vector<8x32xbf16>
    %c0_42 = arith.constant 0 : index
    %c0_43 = arith.constant 0 : index
    %c0_44 = arith.constant 0 : index
    %126 = vector.load %arg9[%c0_42, %c0_43, %c0_44] : memref<1x32x64xbf16, #tpu.memory_space<vmem>>, vector<1x32x64xbf16>
    %127 = vector.shape_cast %126 : vector<1x32x64xbf16> to vector<32x64xbf16>
    %cst_45 = arith.constant dense<0.000000e+00> : vector<8x64xf32>
    %128 = tpu.matmul %125, %127, %cst_45 {dimension_numbers = #tpu.dot_dimension_numbers<[1], [0], [0], [1], [0, 0, 1, 1], [], []>} : vector<8x32xbf16>, vector<32x64xbf16>, vector<8x64xf32> -> vector<8x64xf32>
    %c0_46 = arith.constant 0 : index
    %c0_47 = arith.constant 0 : index
    %c0_48 = arith.constant 0 : index
    %129 = vector.load %arg10[%c0_46, %c0_47, %c0_48] : memref<1x1x64xf32, #tpu.memory_space<vmem>>, vector<1x1x64xf32>
    %130 = vector.shape_cast %129 : vector<1x1x64xf32> to vector<1x64xf32>
    %131 = vector.broadcast %130 : vector<1x64xf32> to vector<8x64xf32>
    %132 = arith.addf %128, %131 : vector<8x64xf32>
    %cst_49 = arith.constant 0.000000e+00 : f32
    %133 = vector.broadcast %cst_49 : f32 to vector<8x64xf32>
    %134 = arith.maximumf %132, %133 : vector<8x64xf32>
    %135 = arith.truncf %134 : vector<8x64xf32> to vector<8x64xbf16>
    %c0_50 = arith.constant 0 : index
    %c0_51 = arith.constant 0 : index
    %c0_52 = arith.constant 0 : index
    %136 = vector.load %arg11[%c0_50, %c0_51, %c0_52] : memref<1x64x32xbf16, #tpu.memory_space<vmem>>, vector<1x64x32xbf16>
    %137 = vector.shape_cast %136 : vector<1x64x32xbf16> to vector<64x32xbf16>
    %cst_53 = arith.constant dense<0.000000e+00> : vector<8x32xf32>
    %138 = tpu.matmul %135, %137, %cst_53 {dimension_numbers = #tpu.dot_dimension_numbers<[1], [0], [0], [1], [0, 0, 1, 1], [], []>} : vector<8x64xbf16>, vector<64x32xbf16>, vector<8x32xf32> -> vector<8x32xf32>
    %c0_54 = arith.constant 0 : index
    %c0_55 = arith.constant 0 : index
    %c0_56 = arith.constant 0 : index
    %139 = vector.load %arg12[%c0_54, %c0_55, %c0_56] : memref<1x1x32xf32, #tpu.memory_space<vmem>>, vector<1x1x32xf32>
    %140 = vector.shape_cast %139 : vector<1x1x32xf32> to vector<1x32xf32>
    %141 = vector.broadcast %140 : vector<1x32xf32> to vector<8x32xf32>
    %142 = arith.addf %138, %141 : vector<8x32xf32>
    %143 = arith.addf %124, %142 : vector<8x32xf32>
    %c0_57 = arith.constant 0 : index
    %c0_58 = arith.constant 0 : index
    %c0_59 = arith.constant 0 : index
    %144 = vector.load %arg13[%c0_57, %c0_58, %c0_59] : memref<1x1x32xf32, #tpu.memory_space<vmem>>, vector<1x1x32xf32>
    %145 = vector.shape_cast %144 : vector<1x1x32xf32> to vector<1x32xf32>
    %c0_60 = arith.constant 0 : index
    %c0_61 = arith.constant 0 : index
    %c0_62 = arith.constant 0 : index
    %146 = vector.load %arg14[%c0_60, %c0_61, %c0_62] : memref<1x1x32xf32, #tpu.memory_space<vmem>>, vector<1x1x32xf32>
    %147 = vector.shape_cast %146 : vector<1x1x32xf32> to vector<1x32xf32>
    %cst_63 = arith.constant dense<0.000000e+00> : vector<8xf32>
    %148 = vector.multi_reduction <add>, %143, %cst_63 [1] : vector<8x32xf32> to vector<8xf32>
    %149 = vector.shape_cast %148 : vector<8xf32> to vector<8x1xf32>
    %cst_64 = arith.constant 3.200000e+01 : f32
    %150 = vector.broadcast %cst_64 : f32 to vector<8x1xf32>
    %151 = arith.divf %149, %150 : vector<8x1xf32>
    %152 = vector.broadcast %151 : vector<8x1xf32> to vector<8x32xf32>
    %153 = arith.subf %143, %152 : vector<8x32xf32>
    %154 = arith.mulf %153, %153 : vector<8x32xf32>
    %cst_65 = arith.constant dense<0.000000e+00> : vector<8xf32>
    %155 = vector.multi_reduction <add>, %154, %cst_65 [1] : vector<8x32xf32> to vector<8xf32>
    %156 = vector.shape_cast %155 : vector<8xf32> to vector<8x1xf32>
    %cst_66 = arith.constant 3.200000e+01 : f32
    %157 = vector.broadcast %cst_66 : f32 to vector<8x1xf32>
    %158 = arith.divf %156, %157 : vector<8x1xf32>
    %cst_67 = arith.constant 9.99999974E-6 : f32
    %159 = vector.broadcast %cst_67 : f32 to vector<8x1xf32>
    %160 = arith.addf %158, %159 : vector<8x1xf32>
    %161 = math.rsqrt %160 : vector<8x1xf32>
    %162 = vector.broadcast %161 : vector<8x1xf32> to vector<8x32xf32>
    %163 = arith.mulf %153, %162 : vector<8x32xf32>
    %164 = vector.broadcast %145 : vector<1x32xf32> to vector<8x32xf32>
    %165 = arith.mulf %163, %164 : vector<8x32xf32>
    %166 = vector.broadcast %147 : vector<1x32xf32> to vector<8x32xf32>
    %167 = arith.addf %165, %166 : vector<8x32xf32>
    %c0_68 = arith.constant 0 : index
    %c0_69 = arith.constant 0 : index
    %168 = vector.load %arg18[%c0_68, %c0_69] : memref<8x32xf32, #tpu.memory_space<vmem>>, vector<8x32xf32>
    tpu.vector_store %arg18[%c0_68, %c0_69], %167 {strides = array<i32>} : memref<8x32xf32, #tpu.memory_space<vmem>>, vector<8x32xf32>,
    %c1_i32 = arith.constant 1 : i32
    %169 = arith.cmpi eq, %arg1, %c1_i32 : i32
    %170 = arith.extui %169 : i1 to i32
    %c0_i32_70 = arith.constant 0 : i32
    %171 = arith.cmpi ne, %170, %c0_i32_70 : i32
    scf.if %171 {
      %c0_71 = arith.constant 0 : index
      %c0_72 = arith.constant 0 : index
      %172 = vector.load %arg15[%c0_71, %c0_72] : memref<1x32xf32, #tpu.memory_space<vmem>>, vector<1x32xf32>
      %c0_73 = arith.constant 0 : index
      %c0_74 = arith.constant 0 : index
      %173 = vector.load %arg16[%c0_73, %c0_74] : memref<1x32xf32, #tpu.memory_space<vmem>>, vector<1x32xf32>
      %cst_75 = arith.constant dense<0.000000e+00> : vector<8xf32>
      %174 = vector.multi_reduction <add>, %167, %cst_75 [1] : vector<8x32xf32> to vector<8xf32>
      %175 = vector.shape_cast %174 : vector<8xf32> to vector<8x1xf32>
      %cst_76 = arith.constant 3.200000e+01 : f32
      %176 = vector.broadcast %cst_76 : f32 to vector<8x1xf32>
      %177 = arith.divf %175, %176 : vector<8x1xf32>
      %178 = vector.broadcast %177 : vector<8x1xf32> to vector<8x32xf32>
      %179 = arith.subf %167, %178 : vector<8x32xf32>
      %180 = arith.mulf %179, %179 : vector<8x32xf32>
      %cst_77 = arith.constant dense<0.000000e+00> : vector<8xf32>
      %181 = vector.multi_reduction <add>, %180, %cst_77 [1] : vector<8x32xf32> to vector<8xf32>
      %182 = vector.shape_cast %181 : vector<8xf32> to vector<8x1xf32>
      %cst_78 = arith.constant 3.200000e+01 : f32
      %183 = vector.broadcast %cst_78 : f32 to vector<8x1xf32>
      %184 = arith.divf %182, %183 : vector<8x1xf32>
      %cst_79 = arith.constant 9.99999974E-6 : f32
      %185 = vector.broadcast %cst_79 : f32 to vector<8x1xf32>
      %186 = arith.addf %184, %185 : vector<8x1xf32>
      %187 = math.rsqrt %186 : vector<8x1xf32>
      %188 = vector.broadcast %187 : vector<8x1xf32> to vector<8x32xf32>
      %189 = arith.mulf %179, %188 : vector<8x32xf32>
      %190 = vector.broadcast %172 : vector<1x32xf32> to vector<8x32xf32>
      %191 = arith.mulf %189, %190 : vector<8x32xf32>
      %192 = vector.broadcast %173 : vector<1x32xf32> to vector<8x32xf32>
      %193 = arith.addf %191, %192 : vector<8x32xf32>
      %c0_80 = arith.constant 0 : index
      %c0_81 = arith.constant 0 : index
      %c0_82 = arith.constant 0 : index
      %194 = vector.load %arg17[%c0_80, %c0_81, %c0_82] : memref<1x8x32xf32, #tpu.memory_space<vmem>>, vector<1x8x32xf32>
      %195 = vector.shape_cast %194 : vector<1x8x32xf32> to vector<8x32xf32>
      %196 = vector.shape_cast %193 : vector<8x32xf32> to vector<1x8x32xf32>
      tpu.vector_store %arg17[%c0_80, %c0_81, %c0_82], %196 {strides = array<i32>} : memref<1x8x32xf32, #tpu.memory_space<vmem>>, vector<1x8x32xf32>,
    } else {
    }
    return
  }
  func.func @transform_0(%arg0: i32, %arg1: i32) -> (i32, i32, i32) {
    %c0_i32 = arith.constant 0 : i32
    %c0_i32_0 = arith.constant 0 : i32
    %c0_i32_1 = arith.constant 0 : i32
    return %arg0, %c0_i32, %c0_i32_0 : i32, i32, i32
  }
  func.func @transform_1(%arg0: i32, %arg1: i32) -> (i32, i32, i32) {
    %c0_i32 = arith.constant 0 : i32
    %c0_i32_0 = arith.constant 0 : i32
    %c0_i32_1 = arith.constant 0 : i32
    return %arg1, %c0_i32, %c0_i32_0 : i32, i32, i32
  }
  func.func @transform_2(%arg0: i32, %arg1: i32) -> (i32, i32, i32) {
    %c0_i32 = arith.constant 0 : i32
    %c0_i32_0 = arith.constant 0 : i32
    %c0_i32_1 = arith.constant 0 : i32
    return %arg1, %c0_i32, %c0_i32_0 : i32, i32, i32
  }
  func.func @transform_3(%arg0: i32, %arg1: i32) -> (i32, i32, i32) {
    %c0_i32 = arith.constant 0 : i32
    %c0_i32_0 = arith.constant 0 : i32
    %c0_i32_1 = arith.constant 0 : i32
    return %arg1, %c0_i32, %c0_i32_0 : i32, i32, i32
  }
  func.func @transform_4(%arg0: i32, %arg1: i32) -> (i32, i32, i32) {
    %c0_i32 = arith.constant 0 : i32
    %c0_i32_0 = arith.constant 0 : i32
    %c0_i32_1 = arith.constant 0 : i32
    return %arg1, %c0_i32, %c0_i32_0 : i32, i32, i32
  }
  func.func @transform_5(%arg0: i32, %arg1: i32) -> (i32, i32, i32) {
    %c0_i32 = arith.constant 0 : i32
    %c0_i32_0 = arith.constant 0 : i32
    %c0_i32_1 = arith.constant 0 : i32
    return %arg1, %c0_i32, %c0_i32_0 : i32, i32, i32
  }
  func.func @transform_6(%arg0: i32, %arg1: i32) -> (i32, i32, i32) {
    %c0_i32 = arith.constant 0 : i32
    %c0_i32_0 = arith.constant 0 : i32
    %c0_i32_1 = arith.constant 0 : i32
    return %arg1, %c0_i32, %c0_i32_0 : i32, i32, i32
  }
  func.func @transform_7(%arg0: i32, %arg1: i32) -> (i32, i32, i32) {
    %c0_i32 = arith.constant 0 : i32
    %c0_i32_0 = arith.constant 0 : i32
    %c0_i32_1 = arith.constant 0 : i32
    return %arg1, %c0_i32, %c0_i32_0 : i32, i32, i32
  }
  func.func @transform_8(%arg0: i32, %arg1: i32) -> (i32, i32, i32) {
    %c0_i32 = arith.constant 0 : i32
    %c0_i32_0 = arith.constant 0 : i32
    %c0_i32_1 = arith.constant 0 : i32
    return %arg1, %c0_i32, %c0_i32_0 : i32, i32, i32
  }
  func.func @transform_9(%arg0: i32, %arg1: i32) -> (i32, i32, i32) {
    %c0_i32 = arith.constant 0 : i32
    %c0_i32_0 = arith.constant 0 : i32
    %c0_i32_1 = arith.constant 0 : i32
    return %arg1, %c0_i32, %c0_i32_0 : i32, i32, i32
  }
  func.func @transform_10(%arg0: i32, %arg1: i32) -> (i32, i32, i32) {
    %c0_i32 = arith.constant 0 : i32
    %c0_i32_0 = arith.constant 0 : i32
    %c0_i32_1 = arith.constant 0 : i32
    return %arg1, %c0_i32, %c0_i32_0 : i32, i32, i32
  }
  func.func @transform_11(%arg0: i32, %arg1: i32) -> (i32, i32, i32) {
    %c0_i32 = arith.constant 0 : i32
    %c0_i32_0 = arith.constant 0 : i32
    %c0_i32_1 = arith.constant 0 : i32
    return %arg1, %c0_i32, %c0_i32_0 : i32, i32, i32
  }
  func.func @transform_12(%arg0: i32, %arg1: i32) -> (i32, i32, i32) {
    %c0_i32 = arith.constant 0 : i32
    %c0_i32_0 = arith.constant 0 : i32
    %c0_i32_1 = arith.constant 0 : i32
    return %arg1, %c0_i32, %c0_i32_0 : i32, i32, i32
  }
  func.func @transform_13(%arg0: i32, %arg1: i32) -> (i32, i32) {
    %c0_i32 = arith.constant 0 : i32
    %c0_i32_0 = arith.constant 0 : i32
    %c0_i32_1 = arith.constant 0 : i32
    return %c0_i32, %c0_i32_0 : i32, i32
  }
  func.func @transform_14(%arg0: i32, %arg1: i32) -> (i32, i32) {
    %c0_i32 = arith.constant 0 : i32
    %c0_i32_0 = arith.constant 0 : i32
    %c0_i32_1 = arith.constant 0 : i32
    return %c0_i32, %c0_i32_0 : i32, i32
  }
  func.func @transform_15(%arg0: i32, %arg1: i32) -> (i32, i32, i32) {
    %c0_i32 = arith.constant 0 : i32
    %c0_i32_0 = arith.constant 0 : i32
    %c0_i32_1 = arith.constant 0 : i32
    return %arg0, %c0_i32, %c0_i32_0 : i32, i32, i32
  }
}

module attributes {stable_mosaic.version = 11 : i64} {
  func.func @_decoder_stack_kernel(%arg0: i32, %arg1: i32, %arg2: memref<1x8x32xf32, #tpu.memory_space<vmem>>, %arg3: memref<1x8x32xf32, #tpu.memory_space<vmem>>, %arg4: memref<1x32x96xbf16, #tpu.memory_space<vmem>>, %arg5: memref<1x1x96xf32, #tpu.memory_space<vmem>>, %arg6: memref<1x32x32xbf16, #tpu.memory_space<vmem>>, %arg7: memref<1x1x32xf32, #tpu.memory_space<vmem>>, %arg8: memref<1x1x32xf32, #tpu.memory_space<vmem>>, %arg9: memref<1x1x32xf32, #tpu.memory_space<vmem>>, %arg10: memref<1x32x32xbf16, #tpu.memory_space<vmem>>, %arg11: memref<1x1x32xf32, #tpu.memory_space<vmem>>, %arg12: memref<1x32x64xbf16, #tpu.memory_space<vmem>>, %arg13: memref<1x1x64xf32, #tpu.memory_space<vmem>>, %arg14: memref<1x32x32xbf16, #tpu.memory_space<vmem>>, %arg15: memref<1x1x32xf32, #tpu.memory_space<vmem>>, %arg16: memref<1x1x32xf32, #tpu.memory_space<vmem>>, %arg17: memref<1x1x32xf32, #tpu.memory_space<vmem>>, %arg18: memref<1x32x64xbf16, #tpu.memory_space<vmem>>, %arg19: memref<1x1x64xf32, #tpu.memory_space<vmem>>, %arg20: memref<1x64x32xbf16, #tpu.memory_space<vmem>>, %arg21: memref<1x1x32xf32, #tpu.memory_space<vmem>>, %arg22: memref<1x1x32xf32, #tpu.memory_space<vmem>>, %arg23: memref<1x1x32xf32, #tpu.memory_space<vmem>>, %arg24: memref<1x32xf32, #tpu.memory_space<vmem>>, %arg25: memref<1x32xf32, #tpu.memory_space<vmem>>, %arg26: memref<32x128xbf16, #tpu.memory_space<vmem>>, %arg27: memref<1x128xf32, #tpu.memory_space<vmem>>, %arg28: memref<8x8xf32, #tpu.memory_space<vmem>>, %arg29: memref<1x8x128xf32, #tpu.memory_space<vmem>>, %arg30: memref<8x32xf32, #tpu.memory_space<vmem>>) attributes {dimension_semantics = [#tpu.dimension_semantics<parallel>, #tpu.dimension_semantics<arbitrary>], iteration_bounds = array<i64: 2, 2>, scalar_prefetch = 0 : i64, scratch_operands = 1 : i64, tpu.core_type = #tpu.core_type<tc>, window_params = [{transform_indices = @transform_0, window_bounds = array<i64: 1, 8, 32>}, {transform_indices = @transform_1, window_bounds = array<i64: 1, 8, 32>}, {transform_indices = @transform_2, window_bounds = array<i64: 1, 32, 96>}, {transform_indices = @transform_3, window_bounds = array<i64: 1, 1, 96>}, {transform_indices = @transform_4, window_bounds = array<i64: 1, 32, 32>}, {transform_indices = @transform_5, window_bounds = array<i64: 1, 1, 32>}, {transform_indices = @transform_6, window_bounds = array<i64: 1, 1, 32>}, {transform_indices = @transform_7, window_bounds = array<i64: 1, 1, 32>}, {transform_indices = @transform_8, window_bounds = array<i64: 1, 32, 32>}, {transform_indices = @transform_9, window_bounds = array<i64: 1, 1, 32>}, {transform_indices = @transform_10, window_bounds = array<i64: 1, 32, 64>}, {transform_indices = @transform_11, window_bounds = array<i64: 1, 1, 64>}, {transform_indices = @transform_12, window_bounds = array<i64: 1, 32, 32>}, {transform_indices = @transform_13, window_bounds = array<i64: 1, 1, 32>}, {transform_indices = @transform_14, window_bounds = array<i64: 1, 1, 32>}, {transform_indices = @transform_15, window_bounds = array<i64: 1, 1, 32>}, {transform_indices = @transform_16, window_bounds = array<i64: 1, 32, 64>}, {transform_indices = @transform_17, window_bounds = array<i64: 1, 1, 64>}, {transform_indices = @transform_18, window_bounds = array<i64: 1, 64, 32>}, {transform_indices = @transform_19, window_bounds = array<i64: 1, 1, 32>}, {transform_indices = @transform_20, window_bounds = array<i64: 1, 1, 32>}, {transform_indices = @transform_21, window_bounds = array<i64: 1, 1, 32>}, {pipeline_mode = #tpu.pipeline_mode<synchronous>, transform_indices = @transform_22, window_bounds = array<i64: 1, 32>}, {pipeline_mode = #tpu.pipeline_mode<synchronous>, transform_indices = @transform_23, window_bounds = array<i64: 1, 32>}, {pipeline_mode = #tpu.pipeline_mode<synchronous>, transform_indices = @transform_24, window_bounds = array<i64: 32, 128>}, {pipeline_mode = #tpu.pipeline_mode<synchronous>, transform_indices = @transform_25, window_bounds = array<i64: 1, 128>}, {pipeline_mode = #tpu.pipeline_mode<synchronous>, transform_indices = @transform_26, window_bounds = array<i64: 8, 8>}, {transform_indices = @transform_27, window_bounds = array<i64: 1, 8, 128>}]} {
    %c0 = arith.constant 0 : index
    %c0_0 = arith.constant 0 : index
    %0 = vector.load %arg28[%c0, %c0_0] : memref<8x8xf32, #tpu.memory_space<vmem>>, vector<8x8xf32>
    %c0_i32 = arith.constant 0 : i32
    %1 = arith.cmpi eq, %arg1, %c0_i32 : i32
    %2 = arith.extui %1 : i1 to i32
    %c0_i32_1 = arith.constant 0 : i32
    %3 = arith.cmpi ne, %2, %c0_i32_1 : i32
    scf.if %3 {
      %c0_124 = arith.constant 0 : index
      %c0_125 = arith.constant 0 : index
      %c0_126 = arith.constant 0 : index
      %307 = vector.load %arg2[%c0_124, %c0_125, %c0_126] : memref<1x8x32xf32, #tpu.memory_space<vmem>>, vector<1x8x32xf32>
      %308 = vector.shape_cast %307 : vector<1x8x32xf32> to vector<8x32xf32>
      %c0_127 = arith.constant 0 : index
      %c0_128 = arith.constant 0 : index
      %309 = vector.load %arg30[%c0_127, %c0_128] : memref<8x32xf32, #tpu.memory_space<vmem>>, vector<8x32xf32>
      tpu.vector_store %arg30[%c0_127, %c0_128], %308 {strides = array<i32>} : memref<8x32xf32, #tpu.memory_space<vmem>>, vector<8x32xf32>,
    } else {
    }
    %c0_2 = arith.constant 0 : index
    %c0_3 = arith.constant 0 : index
    %4 = vector.load %arg30[%c0_2, %c0_3] : memref<8x32xf32, #tpu.memory_space<vmem>>, vector<8x32xf32>
    %c0_4 = arith.constant 0 : index
    %c0_5 = arith.constant 0 : index
    %c0_6 = arith.constant 0 : index
    %5 = vector.load %arg3[%c0_4, %c0_5, %c0_6] : memref<1x8x32xf32, #tpu.memory_space<vmem>>, vector<1x8x32xf32>
    %6 = vector.shape_cast %5 : vector<1x8x32xf32> to vector<8x32xf32>
    %7 = arith.truncf %6 : vector<8x32xf32> to vector<8x32xbf16>
    %8 = arith.truncf %4 : vector<8x32xf32> to vector<8x32xbf16>
    %c0_7 = arith.constant 0 : index
    %c0_8 = arith.constant 0 : index
    %c0_9 = arith.constant 0 : index
    %9 = vector.load %arg4[%c0_7, %c0_8, %c0_9] : memref<1x32x96xbf16, #tpu.memory_space<vmem>>, vector<1x32x96xbf16>
    %10 = vector.shape_cast %9 : vector<1x32x96xbf16> to vector<32x96xbf16>
    %cst = arith.constant dense<0.000000e+00> : vector<8x96xf32>
    %11 = tpu.matmul %8, %10, %cst {dimension_numbers = #tpu.dot_dimension_numbers<[1], [0], [0], [1], [0, 0, 1, 1], [], []>} : vector<8x32xbf16>, vector<32x96xbf16>, vector<8x96xf32> -> vector<8x96xf32>
    %c0_10 = arith.constant 0 : index
    %c0_11 = arith.constant 0 : index
    %c0_12 = arith.constant 0 : index
    %12 = vector.load %arg5[%c0_10, %c0_11, %c0_12] : memref<1x1x96xf32, #tpu.memory_space<vmem>>, vector<1x1x96xf32>
    %13 = vector.shape_cast %12 : vector<1x1x96xf32> to vector<1x96xf32>
    %14 = vector.broadcast %13 : vector<1x96xf32> to vector<8x96xf32>
    %15 = arith.addf %11, %14 : vector<8x96xf32>
    %16 = vector.extract_strided_slice %15 {offsets = [0, 0], sizes = [8, 32], strides = [1, 1]} : vector<8x96xf32> to vector<8x32xf32>
    %17 = vector.extract_strided_slice %15 {offsets = [0, 32], sizes = [8, 32], strides = [1, 1]} : vector<8x96xf32> to vector<8x32xf32>
    %18 = vector.extract_strided_slice %15 {offsets = [0, 64], sizes = [8, 32], strides = [1, 1]} : vector<8x96xf32> to vector<8x32xf32>
    %19 = vector.extract_strided_slice %16 {offsets = [0, 0], sizes = [8, 8], strides = [1, 1]} : vector<8x32xf32> to vector<8x8xf32>
    %20 = arith.truncf %19 : vector<8x8xf32> to vector<8x8xbf16>
    %21 = vector.extract_strided_slice %17 {offsets = [0, 0], sizes = [8, 8], strides = [1, 1]} : vector<8x32xf32> to vector<8x8xf32>
    %22 = arith.truncf %21 : vector<8x8xf32> to vector<8x8xbf16>
    %23 = vector.extract_strided_slice %18 {offsets = [0, 0], sizes = [8, 8], strides = [1, 1]} : vector<8x32xf32> to vector<8x8xf32>
    %24 = arith.truncf %23 : vector<8x8xf32> to vector<8x8xbf16>
    %cst_13 = arith.constant dense<0.000000e+00> : vector<8x8xf32>
    %25 = tpu.matmul %20, %22, %cst_13 {dimension_numbers = #tpu.dot_dimension_numbers<[1], [1], [0], [0], [0, 0, 1, 0], [], []>} : vector<8x8xbf16>, vector<8x8xbf16>, vector<8x8xf32> -> vector<8x8xf32>
    %26 = arith.addf %25, %0 : vector<8x8xf32>
    %cst_14 = arith.constant dense<0xFF800000> : vector<8xf32>
    %27 = vector.multi_reduction <maximumf>, %26, %cst_14 [1] : vector<8x8xf32> to vector<8xf32>
    %28 = vector.shape_cast %27 : vector<8xf32> to vector<8x1xf32>
    %29 = vector.broadcast %28 : vector<8x1xf32> to vector<8x8xf32>
    %30 = arith.subf %26, %29 : vector<8x8xf32>
    %31 = math.exp %30 : vector<8x8xf32>
    %cst_15 = arith.constant dense<0.000000e+00> : vector<8xf32>
    %32 = vector.multi_reduction <add>, %31, %cst_15 [1] : vector<8x8xf32> to vector<8xf32>
    %33 = vector.shape_cast %32 : vector<8xf32> to vector<8x1xf32>
    %34 = tpu.reciprocal %33 {approx = true} : vector<8x1xf32> -> vector<8x1xf32>
    %35 = vector.broadcast %34 : vector<8x1xf32> to vector<8x8xf32>
    %36 = arith.mulf %31, %35 : vector<8x8xf32>
    %37 = arith.truncf %36 : vector<8x8xf32> to vector<8x8xbf16>
    %cst_16 = arith.constant dense<0.000000e+00> : vector<8x8xf32>
    %38 = tpu.matmul %37, %24, %cst_16 {dimension_numbers = #tpu.dot_dimension_numbers<[1], [0], [0], [1], [0, 0, 1, 1], [], []>} : vector<8x8xbf16>, vector<8x8xbf16>, vector<8x8xf32> -> vector<8x8xf32>
    %39 = vector.extract_strided_slice %16 {offsets = [0, 8], sizes = [8, 8], strides = [1, 1]} : vector<8x32xf32> to vector<8x8xf32>
    %40 = arith.truncf %39 : vector<8x8xf32> to vector<8x8xbf16>
    %41 = vector.extract_strided_slice %17 {offsets = [0, 8], sizes = [8, 8], strides = [1, 1]} : vector<8x32xf32> to vector<8x8xf32>
    %42 = arith.truncf %41 : vector<8x8xf32> to vector<8x8xbf16>
    %43 = vector.extract_strided_slice %18 {offsets = [0, 8], sizes = [8, 8], strides = [1, 1]} : vector<8x32xf32> to vector<8x8xf32>
    %44 = arith.truncf %43 : vector<8x8xf32> to vector<8x8xbf16>
    %cst_17 = arith.constant dense<0.000000e+00> : vector<8x8xf32>
    %45 = tpu.matmul %40, %42, %cst_17 {dimension_numbers = #tpu.dot_dimension_numbers<[1], [1], [0], [0], [0, 0, 1, 0], [], []>} : vector<8x8xbf16>, vector<8x8xbf16>, vector<8x8xf32> -> vector<8x8xf32>
    %46 = arith.addf %45, %0 : vector<8x8xf32>
    %cst_18 = arith.constant dense<0xFF800000> : vector<8xf32>
    %47 = vector.multi_reduction <maximumf>, %46, %cst_18 [1] : vector<8x8xf32> to vector<8xf32>
    %48 = vector.shape_cast %47 : vector<8xf32> to vector<8x1xf32>
    %49 = vector.broadcast %48 : vector<8x1xf32> to vector<8x8xf32>
    %50 = arith.subf %46, %49 : vector<8x8xf32>
    %51 = math.exp %50 : vector<8x8xf32>
    %cst_19 = arith.constant dense<0.000000e+00> : vector<8xf32>
    %52 = vector.multi_reduction <add>, %51, %cst_19 [1] : vector<8x8xf32> to vector<8xf32>
    %53 = vector.shape_cast %52 : vector<8xf32> to vector<8x1xf32>
    %54 = tpu.reciprocal %53 {approx = true} : vector<8x1xf32> -> vector<8x1xf32>
    %55 = vector.broadcast %54 : vector<8x1xf32> to vector<8x8xf32>
    %56 = arith.mulf %51, %55 : vector<8x8xf32>
    %57 = arith.truncf %56 : vector<8x8xf32> to vector<8x8xbf16>
    %cst_20 = arith.constant dense<0.000000e+00> : vector<8x8xf32>
    %58 = tpu.matmul %57, %44, %cst_20 {dimension_numbers = #tpu.dot_dimension_numbers<[1], [0], [0], [1], [0, 0, 1, 1], [], []>} : vector<8x8xbf16>, vector<8x8xbf16>, vector<8x8xf32> -> vector<8x8xf32>
    %59 = vector.extract_strided_slice %16 {offsets = [0, 16], sizes = [8, 8], strides = [1, 1]} : vector<8x32xf32> to vector<8x8xf32>
    %60 = arith.truncf %59 : vector<8x8xf32> to vector<8x8xbf16>
    %61 = vector.extract_strided_slice %17 {offsets = [0, 16], sizes = [8, 8], strides = [1, 1]} : vector<8x32xf32> to vector<8x8xf32>
    %62 = arith.truncf %61 : vector<8x8xf32> to vector<8x8xbf16>
    %63 = vector.extract_strided_slice %18 {offsets = [0, 16], sizes = [8, 8], strides = [1, 1]} : vector<8x32xf32> to vector<8x8xf32>
    %64 = arith.truncf %63 : vector<8x8xf32> to vector<8x8xbf16>
    %cst_21 = arith.constant dense<0.000000e+00> : vector<8x8xf32>
    %65 = tpu.matmul %60, %62, %cst_21 {dimension_numbers = #tpu.dot_dimension_numbers<[1], [1], [0], [0], [0, 0, 1, 0], [], []>} : vector<8x8xbf16>, vector<8x8xbf16>, vector<8x8xf32> -> vector<8x8xf32>
    %66 = arith.addf %65, %0 : vector<8x8xf32>
    %cst_22 = arith.constant dense<0xFF800000> : vector<8xf32>
    %67 = vector.multi_reduction <maximumf>, %66, %cst_22 [1] : vector<8x8xf32> to vector<8xf32>
    %68 = vector.shape_cast %67 : vector<8xf32> to vector<8x1xf32>
    %69 = vector.broadcast %68 : vector<8x1xf32> to vector<8x8xf32>
    %70 = arith.subf %66, %69 : vector<8x8xf32>
    %71 = math.exp %70 : vector<8x8xf32>
    %cst_23 = arith.constant dense<0.000000e+00> : vector<8xf32>
    %72 = vector.multi_reduction <add>, %71, %cst_23 [1] : vector<8x8xf32> to vector<8xf32>
    %73 = vector.shape_cast %72 : vector<8xf32> to vector<8x1xf32>
    %74 = tpu.reciprocal %73 {approx = true} : vector<8x1xf32> -> vector<8x1xf32>
    %75 = vector.broadcast %74 : vector<8x1xf32> to vector<8x8xf32>
    %76 = arith.mulf %71, %75 : vector<8x8xf32>
    %77 = arith.truncf %76 : vector<8x8xf32> to vector<8x8xbf16>
    %cst_24 = arith.constant dense<0.000000e+00> : vector<8x8xf32>
    %78 = tpu.matmul %77, %64, %cst_24 {dimension_numbers = #tpu.dot_dimension_numbers<[1], [0], [0], [1], [0, 0, 1, 1], [], []>} : vector<8x8xbf16>, vector<8x8xbf16>, vector<8x8xf32> -> vector<8x8xf32>
    %79 = vector.extract_strided_slice %16 {offsets = [0, 24], sizes = [8, 8], strides = [1, 1]} : vector<8x32xf32> to vector<8x8xf32>
    %80 = arith.truncf %79 : vector<8x8xf32> to vector<8x8xbf16>
    %81 = vector.extract_strided_slice %17 {offsets = [0, 24], sizes = [8, 8], strides = [1, 1]} : vector<8x32xf32> to vector<8x8xf32>
    %82 = arith.truncf %81 : vector<8x8xf32> to vector<8x8xbf16>
    %83 = vector.extract_strided_slice %18 {offsets = [0, 24], sizes = [8, 8], strides = [1, 1]} : vector<8x32xf32> to vector<8x8xf32>
    %84 = arith.truncf %83 : vector<8x8xf32> to vector<8x8xbf16>
    %cst_25 = arith.constant dense<0.000000e+00> : vector<8x8xf32>
    %85 = tpu.matmul %80, %82, %cst_25 {dimension_numbers = #tpu.dot_dimension_numbers<[1], [1], [0], [0], [0, 0, 1, 0], [], []>} : vector<8x8xbf16>, vector<8x8xbf16>, vector<8x8xf32> -> vector<8x8xf32>
    %86 = arith.addf %85, %0 : vector<8x8xf32>
    %cst_26 = arith.constant dense<0xFF800000> : vector<8xf32>
    %87 = vector.multi_reduction <maximumf>, %86, %cst_26 [1] : vector<8x8xf32> to vector<8xf32>
    %88 = vector.shape_cast %87 : vector<8xf32> to vector<8x1xf32>
    %89 = vector.broadcast %88 : vector<8x1xf32> to vector<8x8xf32>
    %90 = arith.subf %86, %89 : vector<8x8xf32>
    %91 = math.exp %90 : vector<8x8xf32>
    %cst_27 = arith.constant dense<0.000000e+00> : vector<8xf32>
    %92 = vector.multi_reduction <add>, %91, %cst_27 [1] : vector<8x8xf32> to vector<8xf32>
    %93 = vector.shape_cast %92 : vector<8xf32> to vector<8x1xf32>
    %94 = tpu.reciprocal %93 {approx = true} : vector<8x1xf32> -> vector<8x1xf32>
    %95 = vector.broadcast %94 : vector<8x1xf32> to vector<8x8xf32>
    %96 = arith.mulf %91, %95 : vector<8x8xf32>
    %97 = arith.truncf %96 : vector<8x8xf32> to vector<8x8xbf16>
    %cst_28 = arith.constant dense<0.000000e+00> : vector<8x8xf32>
    %98 = tpu.matmul %97, %84, %cst_28 {dimension_numbers = #tpu.dot_dimension_numbers<[1], [0], [0], [1], [0, 0, 1, 1], [], []>} : vector<8x8xbf16>, vector<8x8xbf16>, vector<8x8xf32> -> vector<8x8xf32>
    %99 = tpu.concatenate %38, %58, %78, %98 in 1 : vector<8x8xf32>, vector<8x8xf32>, vector<8x8xf32>, vector<8x8xf32> -> vector<8x32xf32>
    %100 = arith.truncf %99 : vector<8x32xf32> to vector<8x32xbf16>
    %c0_29 = arith.constant 0 : index
    %c0_30 = arith.constant 0 : index
    %c0_31 = arith.constant 0 : index
    %101 = vector.load %arg6[%c0_29, %c0_30, %c0_31] : memref<1x32x32xbf16, #tpu.memory_space<vmem>>, vector<1x32x32xbf16>
    %102 = vector.shape_cast %101 : vector<1x32x32xbf16> to vector<32x32xbf16>
    %cst_32 = arith.constant dense<0.000000e+00> : vector<8x32xf32>
    %103 = tpu.matmul %100, %102, %cst_32 {dimension_numbers = #tpu.dot_dimension_numbers<[1], [0], [0], [1], [0, 0, 1, 1], [], []>} : vector<8x32xbf16>, vector<32x32xbf16>, vector<8x32xf32> -> vector<8x32xf32>
    %c0_33 = arith.constant 0 : index
    %c0_34 = arith.constant 0 : index
    %c0_35 = arith.constant 0 : index
    %104 = vector.load %arg7[%c0_33, %c0_34, %c0_35] : memref<1x1x32xf32, #tpu.memory_space<vmem>>, vector<1x1x32xf32>
    %105 = vector.shape_cast %104 : vector<1x1x32xf32> to vector<1x32xf32>
    %106 = vector.broadcast %105 : vector<1x32xf32> to vector<8x32xf32>
    %107 = arith.addf %103, %106 : vector<8x32xf32>
    %108 = arith.addf %4, %107 : vector<8x32xf32>
    %c0_36 = arith.constant 0 : index
    %c0_37 = arith.constant 0 : index
    %c0_38 = arith.constant 0 : index
    %109 = vector.load %arg8[%c0_36, %c0_37, %c0_38] : memref<1x1x32xf32, #tpu.memory_space<vmem>>, vector<1x1x32xf32>
    %110 = vector.shape_cast %109 : vector<1x1x32xf32> to vector<1x32xf32>
    %c0_39 = arith.constant 0 : index
    %c0_40 = arith.constant 0 : index
    %c0_41 = arith.constant 0 : index
    %111 = vector.load %arg9[%c0_39, %c0_40, %c0_41] : memref<1x1x32xf32, #tpu.memory_space<vmem>>, vector<1x1x32xf32>
    %112 = vector.shape_cast %111 : vector<1x1x32xf32> to vector<1x32xf32>
    %cst_42 = arith.constant dense<0.000000e+00> : vector<8xf32>
    %113 = vector.multi_reduction <add>, %108, %cst_42 [1] : vector<8x32xf32> to vector<8xf32>
    %114 = vector.shape_cast %113 : vector<8xf32> to vector<8x1xf32>
    %cst_43 = arith.constant 3.200000e+01 : f32
    %115 = vector.broadcast %cst_43 : f32 to vector<8x1xf32>
    %116 = arith.divf %114, %115 : vector<8x1xf32>
    %117 = vector.broadcast %116 : vector<8x1xf32> to vector<8x32xf32>
    %118 = arith.subf %108, %117 : vector<8x32xf32>
    %119 = arith.mulf %118, %118 : vector<8x32xf32>
    %cst_44 = arith.constant dense<0.000000e+00> : vector<8xf32>
    %120 = vector.multi_reduction <add>, %119, %cst_44 [1] : vector<8x32xf32> to vector<8xf32>
    %121 = vector.shape_cast %120 : vector<8xf32> to vector<8x1xf32>
    %cst_45 = arith.constant 3.200000e+01 : f32
    %122 = vector.broadcast %cst_45 : f32 to vector<8x1xf32>
    %123 = arith.divf %121, %122 : vector<8x1xf32>
    %cst_46 = arith.constant 9.99999974E-6 : f32
    %124 = vector.broadcast %cst_46 : f32 to vector<8x1xf32>
    %125 = arith.addf %123, %124 : vector<8x1xf32>
    %126 = math.rsqrt %125 : vector<8x1xf32>
    %127 = vector.broadcast %126 : vector<8x1xf32> to vector<8x32xf32>
    %128 = arith.mulf %118, %127 : vector<8x32xf32>
    %129 = vector.broadcast %110 : vector<1x32xf32> to vector<8x32xf32>
    %130 = arith.mulf %128, %129 : vector<8x32xf32>
    %131 = vector.broadcast %112 : vector<1x32xf32> to vector<8x32xf32>
    %132 = arith.addf %130, %131 : vector<8x32xf32>
    %133 = arith.truncf %132 : vector<8x32xf32> to vector<8x32xbf16>
    %c0_47 = arith.constant 0 : index
    %c0_48 = arith.constant 0 : index
    %c0_49 = arith.constant 0 : index
    %134 = vector.load %arg10[%c0_47, %c0_48, %c0_49] : memref<1x32x32xbf16, #tpu.memory_space<vmem>>, vector<1x32x32xbf16>
    %135 = vector.shape_cast %134 : vector<1x32x32xbf16> to vector<32x32xbf16>
    %cst_50 = arith.constant dense<0.000000e+00> : vector<8x32xf32>
    %136 = tpu.matmul %133, %135, %cst_50 {dimension_numbers = #tpu.dot_dimension_numbers<[1], [0], [0], [1], [0, 0, 1, 1], [], []>} : vector<8x32xbf16>, vector<32x32xbf16>, vector<8x32xf32> -> vector<8x32xf32>
    %c0_51 = arith.constant 0 : index
    %c0_52 = arith.constant 0 : index
    %c0_53 = arith.constant 0 : index
    %137 = vector.load %arg11[%c0_51, %c0_52, %c0_53] : memref<1x1x32xf32, #tpu.memory_space<vmem>>, vector<1x1x32xf32>
    %138 = vector.shape_cast %137 : vector<1x1x32xf32> to vector<1x32xf32>
    %139 = vector.broadcast %138 : vector<1x32xf32> to vector<8x32xf32>
    %140 = arith.addf %136, %139 : vector<8x32xf32>
    %c0_54 = arith.constant 0 : index
    %c0_55 = arith.constant 0 : index
    %c0_56 = arith.constant 0 : index
    %141 = vector.load %arg12[%c0_54, %c0_55, %c0_56] : memref<1x32x64xbf16, #tpu.memory_space<vmem>>, vector<1x32x64xbf16>
    %142 = vector.shape_cast %141 : vector<1x32x64xbf16> to vector<32x64xbf16>
    %cst_57 = arith.constant dense<0.000000e+00> : vector<8x64xf32>
    %143 = tpu.matmul %7, %142, %cst_57 {dimension_numbers = #tpu.dot_dimension_numbers<[1], [0], [0], [1], [0, 0, 1, 1], [], []>} : vector<8x32xbf16>, vector<32x64xbf16>, vector<8x64xf32> -> vector<8x64xf32>
    %c0_58 = arith.constant 0 : index
    %c0_59 = arith.constant 0 : index
    %c0_60 = arith.constant 0 : index
    %144 = vector.load %arg13[%c0_58, %c0_59, %c0_60] : memref<1x1x64xf32, #tpu.memory_space<vmem>>, vector<1x1x64xf32>
    %145 = vector.shape_cast %144 : vector<1x1x64xf32> to vector<1x64xf32>
    %146 = vector.broadcast %145 : vector<1x64xf32> to vector<8x64xf32>
    %147 = arith.addf %143, %146 : vector<8x64xf32>
    %148 = vector.extract_strided_slice %147 {offsets = [0, 0], sizes = [8, 32], strides = [1, 1]} : vector<8x64xf32> to vector<8x32xf32>
    %149 = vector.extract_strided_slice %147 {offsets = [0, 32], sizes = [8, 32], strides = [1, 1]} : vector<8x64xf32> to vector<8x32xf32>
    %150 = vector.extract_strided_slice %140 {offsets = [0, 0], sizes = [8, 8], strides = [1, 1]} : vector<8x32xf32> to vector<8x8xf32>
    %151 = arith.truncf %150 : vector<8x8xf32> to vector<8x8xbf16>
    %152 = vector.extract_strided_slice %148 {offsets = [0, 0], sizes = [8, 8], strides = [1, 1]} : vector<8x32xf32> to vector<8x8xf32>
    %153 = arith.truncf %152 : vector<8x8xf32> to vector<8x8xbf16>
    %154 = vector.extract_strided_slice %149 {offsets = [0, 0], sizes = [8, 8], strides = [1, 1]} : vector<8x32xf32> to vector<8x8xf32>
    %155 = arith.truncf %154 : vector<8x8xf32> to vector<8x8xbf16>
    %cst_61 = arith.constant dense<0.000000e+00> : vector<8x8xf32>
    %156 = tpu.matmul %151, %153, %cst_61 {dimension_numbers = #tpu.dot_dimension_numbers<[1], [1], [0], [0], [0, 0, 1, 0], [], []>} : vector<8x8xbf16>, vector<8x8xbf16>, vector<8x8xf32> -> vector<8x8xf32>
    %cst_62 = arith.constant dense<0xFF800000> : vector<8xf32>
    %157 = vector.multi_reduction <maximumf>, %156, %cst_62 [1] : vector<8x8xf32> to vector<8xf32>
    %158 = vector.shape_cast %157 : vector<8xf32> to vector<8x1xf32>
    %159 = vector.broadcast %158 : vector<8x1xf32> to vector<8x8xf32>
    %160 = arith.subf %156, %159 : vector<8x8xf32>
    %161 = math.exp %160 : vector<8x8xf32>
    %cst_63 = arith.constant dense<0.000000e+00> : vector<8xf32>
    %162 = vector.multi_reduction <add>, %161, %cst_63 [1] : vector<8x8xf32> to vector<8xf32>
    %163 = vector.shape_cast %162 : vector<8xf32> to vector<8x1xf32>
    %164 = tpu.reciprocal %163 {approx = true} : vector<8x1xf32> -> vector<8x1xf32>
    %165 = vector.broadcast %164 : vector<8x1xf32> to vector<8x8xf32>
    %166 = arith.mulf %161, %165 : vector<8x8xf32>
    %167 = arith.truncf %166 : vector<8x8xf32> to vector<8x8xbf16>
    %cst_64 = arith.constant dense<0.000000e+00> : vector<8x8xf32>
    %168 = tpu.matmul %167, %155, %cst_64 {dimension_numbers = #tpu.dot_dimension_numbers<[1], [0], [0], [1], [0, 0, 1, 1], [], []>} : vector<8x8xbf16>, vector<8x8xbf16>, vector<8x8xf32> -> vector<8x8xf32>
    %169 = vector.extract_strided_slice %140 {offsets = [0, 8], sizes = [8, 8], strides = [1, 1]} : vector<8x32xf32> to vector<8x8xf32>
    %170 = arith.truncf %169 : vector<8x8xf32> to vector<8x8xbf16>
    %171 = vector.extract_strided_slice %148 {offsets = [0, 8], sizes = [8, 8], strides = [1, 1]} : vector<8x32xf32> to vector<8x8xf32>
    %172 = arith.truncf %171 : vector<8x8xf32> to vector<8x8xbf16>
    %173 = vector.extract_strided_slice %149 {offsets = [0, 8], sizes = [8, 8], strides = [1, 1]} : vector<8x32xf32> to vector<8x8xf32>
    %174 = arith.truncf %173 : vector<8x8xf32> to vector<8x8xbf16>
    %cst_65 = arith.constant dense<0.000000e+00> : vector<8x8xf32>
    %175 = tpu.matmul %170, %172, %cst_65 {dimension_numbers = #tpu.dot_dimension_numbers<[1], [1], [0], [0], [0, 0, 1, 0], [], []>} : vector<8x8xbf16>, vector<8x8xbf16>, vector<8x8xf32> -> vector<8x8xf32>
    %cst_66 = arith.constant dense<0xFF800000> : vector<8xf32>
    %176 = vector.multi_reduction <maximumf>, %175, %cst_66 [1] : vector<8x8xf32> to vector<8xf32>
    %177 = vector.shape_cast %176 : vector<8xf32> to vector<8x1xf32>
    %178 = vector.broadcast %177 : vector<8x1xf32> to vector<8x8xf32>
    %179 = arith.subf %175, %178 : vector<8x8xf32>
    %180 = math.exp %179 : vector<8x8xf32>
    %cst_67 = arith.constant dense<0.000000e+00> : vector<8xf32>
    %181 = vector.multi_reduction <add>, %180, %cst_67 [1] : vector<8x8xf32> to vector<8xf32>
    %182 = vector.shape_cast %181 : vector<8xf32> to vector<8x1xf32>
    %183 = tpu.reciprocal %182 {approx = true} : vector<8x1xf32> -> vector<8x1xf32>
    %184 = vector.broadcast %183 : vector<8x1xf32> to vector<8x8xf32>
    %185 = arith.mulf %180, %184 : vector<8x8xf32>
    %186 = arith.truncf %185 : vector<8x8xf32> to vector<8x8xbf16>
    %cst_68 = arith.constant dense<0.000000e+00> : vector<8x8xf32>
    %187 = tpu.matmul %186, %174, %cst_68 {dimension_numbers = #tpu.dot_dimension_numbers<[1], [0], [0], [1], [0, 0, 1, 1], [], []>} : vector<8x8xbf16>, vector<8x8xbf16>, vector<8x8xf32> -> vector<8x8xf32>
    %188 = vector.extract_strided_slice %140 {offsets = [0, 16], sizes = [8, 8], strides = [1, 1]} : vector<8x32xf32> to vector<8x8xf32>
    %189 = arith.truncf %188 : vector<8x8xf32> to vector<8x8xbf16>
    %190 = vector.extract_strided_slice %148 {offsets = [0, 16], sizes = [8, 8], strides = [1, 1]} : vector<8x32xf32> to vector<8x8xf32>
    %191 = arith.truncf %190 : vector<8x8xf32> to vector<8x8xbf16>
    %192 = vector.extract_strided_slice %149 {offsets = [0, 16], sizes = [8, 8], strides = [1, 1]} : vector<8x32xf32> to vector<8x8xf32>
    %193 = arith.truncf %192 : vector<8x8xf32> to vector<8x8xbf16>
    %cst_69 = arith.constant dense<0.000000e+00> : vector<8x8xf32>
    %194 = tpu.matmul %189, %191, %cst_69 {dimension_numbers = #tpu.dot_dimension_numbers<[1], [1], [0], [0], [0, 0, 1, 0], [], []>} : vector<8x8xbf16>, vector<8x8xbf16>, vector<8x8xf32> -> vector<8x8xf32>
    %cst_70 = arith.constant dense<0xFF800000> : vector<8xf32>
    %195 = vector.multi_reduction <maximumf>, %194, %cst_70 [1] : vector<8x8xf32> to vector<8xf32>
    %196 = vector.shape_cast %195 : vector<8xf32> to vector<8x1xf32>
    %197 = vector.broadcast %196 : vector<8x1xf32> to vector<8x8xf32>
    %198 = arith.subf %194, %197 : vector<8x8xf32>
    %199 = math.exp %198 : vector<8x8xf32>
    %cst_71 = arith.constant dense<0.000000e+00> : vector<8xf32>
    %200 = vector.multi_reduction <add>, %199, %cst_71 [1] : vector<8x8xf32> to vector<8xf32>
    %201 = vector.shape_cast %200 : vector<8xf32> to vector<8x1xf32>
    %202 = tpu.reciprocal %201 {approx = true} : vector<8x1xf32> -> vector<8x1xf32>
    %203 = vector.broadcast %202 : vector<8x1xf32> to vector<8x8xf32>
    %204 = arith.mulf %199, %203 : vector<8x8xf32>
    %205 = arith.truncf %204 : vector<8x8xf32> to vector<8x8xbf16>
    %cst_72 = arith.constant dense<0.000000e+00> : vector<8x8xf32>
    %206 = tpu.matmul %205, %193, %cst_72 {dimension_numbers = #tpu.dot_dimension_numbers<[1], [0], [0], [1], [0, 0, 1, 1], [], []>} : vector<8x8xbf16>, vector<8x8xbf16>, vector<8x8xf32> -> vector<8x8xf32>
    %207 = vector.extract_strided_slice %140 {offsets = [0, 24], sizes = [8, 8], strides = [1, 1]} : vector<8x32xf32> to vector<8x8xf32>
    %208 = arith.truncf %207 : vector<8x8xf32> to vector<8x8xbf16>
    %209 = vector.extract_strided_slice %148 {offsets = [0, 24], sizes = [8, 8], strides = [1, 1]} : vector<8x32xf32> to vector<8x8xf32>
    %210 = arith.truncf %209 : vector<8x8xf32> to vector<8x8xbf16>
    %211 = vector.extract_strided_slice %149 {offsets = [0, 24], sizes = [8, 8], strides = [1, 1]} : vector<8x32xf32> to vector<8x8xf32>
    %212 = arith.truncf %211 : vector<8x8xf32> to vector<8x8xbf16>
    %cst_73 = arith.constant dense<0.000000e+00> : vector<8x8xf32>
    %213 = tpu.matmul %208, %210, %cst_73 {dimension_numbers = #tpu.dot_dimension_numbers<[1], [1], [0], [0], [0, 0, 1, 0], [], []>} : vector<8x8xbf16>, vector<8x8xbf16>, vector<8x8xf32> -> vector<8x8xf32>
    %cst_74 = arith.constant dense<0xFF800000> : vector<8xf32>
    %214 = vector.multi_reduction <maximumf>, %213, %cst_74 [1] : vector<8x8xf32> to vector<8xf32>
    %215 = vector.shape_cast %214 : vector<8xf32> to vector<8x1xf32>
    %216 = vector.broadcast %215 : vector<8x1xf32> to vector<8x8xf32>
    %217 = arith.subf %213, %216 : vector<8x8xf32>
    %218 = math.exp %217 : vector<8x8xf32>
    %cst_75 = arith.constant dense<0.000000e+00> : vector<8xf32>
    %219 = vector.multi_reduction <add>, %218, %cst_75 [1] : vector<8x8xf32> to vector<8xf32>
    %220 = vector.shape_cast %219 : vector<8xf32> to vector<8x1xf32>
    %221 = tpu.reciprocal %220 {approx = true} : vector<8x1xf32> -> vector<8x1xf32>
    %222 = vector.broadcast %221 : vector<8x1xf32> to vector<8x8xf32>
    %223 = arith.mulf %218, %222 : vector<8x8xf32>
    %224 = arith.truncf %223 : vector<8x8xf32> to vector<8x8xbf16>
    %cst_76 = arith.constant dense<0.000000e+00> : vector<8x8xf32>
    %225 = tpu.matmul %224, %212, %cst_76 {dimension_numbers = #tpu.dot_dimension_numbers<[1], [0], [0], [1], [0, 0, 1, 1], [], []>} : vector<8x8xbf16>, vector<8x8xbf16>, vector<8x8xf32> -> vector<8x8xf32>
    %226 = tpu.concatenate %168, %187, %206, %225 in 1 : vector<8x8xf32>, vector<8x8xf32>, vector<8x8xf32>, vector<8x8xf32> -> vector<8x32xf32>
    %227 = arith.truncf %226 : vector<8x32xf32> to vector<8x32xbf16>
    %c0_77 = arith.constant 0 : index
    %c0_78 = arith.constant 0 : index
    %c0_79 = arith.constant 0 : index
    %228 = vector.load %arg14[%c0_77, %c0_78, %c0_79] : memref<1x32x32xbf16, #tpu.memory_space<vmem>>, vector<1x32x32xbf16>
    %229 = vector.shape_cast %228 : vector<1x32x32xbf16> to vector<32x32xbf16>
    %cst_80 = arith.constant dense<0.000000e+00> : vector<8x32xf32>
    %230 = tpu.matmul %227, %229, %cst_80 {dimension_numbers = #tpu.dot_dimension_numbers<[1], [0], [0], [1], [0, 0, 1, 1], [], []>} : vector<8x32xbf16>, vector<32x32xbf16>, vector<8x32xf32> -> vector<8x32xf32>
    %c0_81 = arith.constant 0 : index
    %c0_82 = arith.constant 0 : index
    %c0_83 = arith.constant 0 : index
    %231 = vector.load %arg15[%c0_81, %c0_82, %c0_83] : memref<1x1x32xf32, #tpu.memory_space<vmem>>, vector<1x1x32xf32>
    %232 = vector.shape_cast %231 : vector<1x1x32xf32> to vector<1x32xf32>
    %233 = vector.broadcast %232 : vector<1x32xf32> to vector<8x32xf32>
    %234 = arith.addf %230, %233 : vector<8x32xf32>
    %235 = arith.addf %132, %234 : vector<8x32xf32>
    %c0_84 = arith.constant 0 : index
    %c0_85 = arith.constant 0 : index
    %c0_86 = arith.constant 0 : index
    %236 = vector.load %arg16[%c0_84, %c0_85, %c0_86] : memref<1x1x32xf32, #tpu.memory_space<vmem>>, vector<1x1x32xf32>
    %237 = vector.shape_cast %236 : vector<1x1x32xf32> to vector<1x32xf32>
    %c0_87 = arith.constant 0 : index
    %c0_88 = arith.constant 0 : index
    %c0_89 = arith.constant 0 : index
    %238 = vector.load %arg17[%c0_87, %c0_88, %c0_89] : memref<1x1x32xf32, #tpu.memory_space<vmem>>, vector<1x1x32xf32>
    %239 = vector.shape_cast %238 : vector<1x1x32xf32> to vector<1x32xf32>
    %cst_90 = arith.constant dense<0.000000e+00> : vector<8xf32>
    %240 = vector.multi_reduction <add>, %235, %cst_90 [1] : vector<8x32xf32> to vector<8xf32>
    %241 = vector.shape_cast %240 : vector<8xf32> to vector<8x1xf32>
    %cst_91 = arith.constant 3.200000e+01 : f32
    %242 = vector.broadcast %cst_91 : f32 to vector<8x1xf32>
    %243 = arith.divf %241, %242 : vector<8x1xf32>
    %244 = vector.broadcast %243 : vector<8x1xf32> to vector<8x32xf32>
    %245 = arith.subf %235, %244 : vector<8x32xf32>
    %246 = arith.mulf %245, %245 : vector<8x32xf32>
    %cst_92 = arith.constant dense<0.000000e+00> : vector<8xf32>
    %247 = vector.multi_reduction <add>, %246, %cst_92 [1] : vector<8x32xf32> to vector<8xf32>
    %248 = vector.shape_cast %247 : vector<8xf32> to vector<8x1xf32>
    %cst_93 = arith.constant 3.200000e+01 : f32
    %249 = vector.broadcast %cst_93 : f32 to vector<8x1xf32>
    %250 = arith.divf %248, %249 : vector<8x1xf32>
    %cst_94 = arith.constant 9.99999974E-6 : f32
    %251 = vector.broadcast %cst_94 : f32 to vector<8x1xf32>
    %252 = arith.addf %250, %251 : vector<8x1xf32>
    %253 = math.rsqrt %252 : vector<8x1xf32>
    %254 = vector.broadcast %253 : vector<8x1xf32> to vector<8x32xf32>
    %255 = arith.mulf %245, %254 : vector<8x32xf32>
    %256 = vector.broadcast %237 : vector<1x32xf32> to vector<8x32xf32>
    %257 = arith.mulf %255, %256 : vector<8x32xf32>
    %258 = vector.broadcast %239 : vector<1x32xf32> to vector<8x32xf32>
    %259 = arith.addf %257, %258 : vector<8x32xf32>
    %260 = arith.truncf %259 : vector<8x32xf32> to vector<8x32xbf16>
    %c0_95 = arith.constant 0 : index
    %c0_96 = arith.constant 0 : index
    %c0_97 = arith.constant 0 : index
    %261 = vector.load %arg18[%c0_95, %c0_96, %c0_97] : memref<1x32x64xbf16, #tpu.memory_space<vmem>>, vector<1x32x64xbf16>
    %262 = vector.shape_cast %261 : vector<1x32x64xbf16> to vector<32x64xbf16>
    %cst_98 = arith.constant dense<0.000000e+00> : vector<8x64xf32>
    %263 = tpu.matmul %260, %262, %cst_98 {dimension_numbers = #tpu.dot_dimension_numbers<[1], [0], [0], [1], [0, 0, 1, 1], [], []>} : vector<8x32xbf16>, vector<32x64xbf16>, vector<8x64xf32> -> vector<8x64xf32>
    %c0_99 = arith.constant 0 : index
    %c0_100 = arith.constant 0 : index
    %c0_101 = arith.constant 0 : index
    %264 = vector.load %arg19[%c0_99, %c0_100, %c0_101] : memref<1x1x64xf32, #tpu.memory_space<vmem>>, vector<1x1x64xf32>
    %265 = vector.shape_cast %264 : vector<1x1x64xf32> to vector<1x64xf32>
    %266 = vector.broadcast %265 : vector<1x64xf32> to vector<8x64xf32>
    %267 = arith.addf %263, %266 : vector<8x64xf32>
    %cst_102 = arith.constant 0.000000e+00 : f32
    %268 = vector.broadcast %cst_102 : f32 to vector<8x64xf32>
    %269 = arith.maximumf %267, %268 : vector<8x64xf32>
    %270 = arith.truncf %269 : vector<8x64xf32> to vector<8x64xbf16>
    %c0_103 = arith.constant 0 : index
    %c0_104 = arith.constant 0 : index
    %c0_105 = arith.constant 0 : index
    %271 = vector.load %arg20[%c0_103, %c0_104, %c0_105] : memref<1x64x32xbf16, #tpu.memory_space<vmem>>, vector<1x64x32xbf16>
    %272 = vector.shape_cast %271 : vector<1x64x32xbf16> to vector<64x32xbf16>
    %cst_106 = arith.constant dense<0.000000e+00> : vector<8x32xf32>
    %273 = tpu.matmul %270, %272, %cst_106 {dimension_numbers = #tpu.dot_dimension_numbers<[1], [0], [0], [1], [0, 0, 1, 1], [], []>} : vector<8x64xbf16>, vector<64x32xbf16>, vector<8x32xf32> -> vector<8x32xf32>
    %c0_107 = arith.constant 0 : index
    %c0_108 = arith.constant 0 : index
    %c0_109 = arith.constant 0 : index
    %274 = vector.load %arg21[%c0_107, %c0_108, %c0_109] : memref<1x1x32xf32, #tpu.memory_space<vmem>>, vector<1x1x32xf32>
    %275 = vector.shape_cast %274 : vector<1x1x32xf32> to vector<1x32xf32>
    %276 = vector.broadcast %275 : vector<1x32xf32> to vector<8x32xf32>
    %277 = arith.addf %273, %276 : vector<8x32xf32>
    %278 = arith.addf %259, %277 : vector<8x32xf32>
    %c0_110 = arith.constant 0 : index
    %c0_111 = arith.constant 0 : index
    %c0_112 = arith.constant 0 : index
    %279 = vector.load %arg22[%c0_110, %c0_111, %c0_112] : memref<1x1x32xf32, #tpu.memory_space<vmem>>, vector<1x1x32xf32>
    %280 = vector.shape_cast %279 : vector<1x1x32xf32> to vector<1x32xf32>
    %c0_113 = arith.constant 0 : index
    %c0_114 = arith.constant 0 : index
    %c0_115 = arith.constant 0 : index
    %281 = vector.load %arg23[%c0_113, %c0_114, %c0_115] : memref<1x1x32xf32, #tpu.memory_space<vmem>>, vector<1x1x32xf32>
    %282 = vector.shape_cast %281 : vector<1x1x32xf32> to vector<1x32xf32>
    %cst_116 = arith.constant dense<0.000000e+00> : vector<8xf32>
    %283 = vector.multi_reduction <add>, %278, %cst_116 [1] : vector<8x32xf32> to vector<8xf32>
    %284 = vector.shape_cast %283 : vector<8xf32> to vector<8x1xf32>
    %cst_117 = arith.constant 3.200000e+01 : f32
    %285 = vector.broadcast %cst_117 : f32 to vector<8x1xf32>
    %286 = arith.divf %284, %285 : vector<8x1xf32>
    %287 = vector.broadcast %286 : vector<8x1xf32> to vector<8x32xf32>
    %288 = arith.subf %278, %287 : vector<8x32xf32>
    %289 = arith.mulf %288, %288 : vector<8x32xf32>
    %cst_118 = arith.constant dense<0.000000e+00> : vector<8xf32>
    %290 = vector.multi_reduction <add>, %289, %cst_118 [1] : vector<8x32xf32> to vector<8xf32>
    %291 = vector.shape_cast %290 : vector<8xf32> to vector<8x1xf32>
    %cst_119 = arith.constant 3.200000e+01 : f32
    %292 = vector.broadcast %cst_119 : f32 to vector<8x1xf32>
    %293 = arith.divf %291, %292 : vector<8x1xf32>
    %cst_120 = arith.constant 9.99999974E-6 : f32
    %294 = vector.broadcast %cst_120 : f32 to vector<8x1xf32>
    %295 = arith.addf %293, %294 : vector<8x1xf32>
    %296 = math.rsqrt %295 : vector<8x1xf32>
    %297 = vector.broadcast %296 : vector<8x1xf32> to vector<8x32xf32>
    %298 = arith.mulf %288, %297 : vector<8x32xf32>
    %299 = vector.broadcast %280 : vector<1x32xf32> to vector<8x32xf32>
    %300 = arith.mulf %298, %299 : vector<8x32xf32>
    %301 = vector.broadcast %282 : vector<1x32xf32> to vector<8x32xf32>
    %302 = arith.addf %300, %301 : vector<8x32xf32>
    %c0_121 = arith.constant 0 : index
    %c0_122 = arith.constant 0 : index
    %303 = vector.load %arg30[%c0_121, %c0_122] : memref<8x32xf32, #tpu.memory_space<vmem>>, vector<8x32xf32>
    tpu.vector_store %arg30[%c0_121, %c0_122], %302 {strides = array<i32>} : memref<8x32xf32, #tpu.memory_space<vmem>>, vector<8x32xf32>,
    %c1_i32 = arith.constant 1 : i32
    %304 = arith.cmpi eq, %arg1, %c1_i32 : i32
    %305 = arith.extui %304 : i1 to i32
    %c0_i32_123 = arith.constant 0 : i32
    %306 = arith.cmpi ne, %305, %c0_i32_123 : i32
    scf.if %306 {
      %c0_124 = arith.constant 0 : index
      %c0_125 = arith.constant 0 : index
      %307 = vector.load %arg24[%c0_124, %c0_125] : memref<1x32xf32, #tpu.memory_space<vmem>>, vector<1x32xf32>
      %c0_126 = arith.constant 0 : index
      %c0_127 = arith.constant 0 : index
      %308 = vector.load %arg25[%c0_126, %c0_127] : memref<1x32xf32, #tpu.memory_space<vmem>>, vector<1x32xf32>
      %cst_128 = arith.constant dense<0.000000e+00> : vector<8xf32>
      %309 = vector.multi_reduction <add>, %302, %cst_128 [1] : vector<8x32xf32> to vector<8xf32>
      %310 = vector.shape_cast %309 : vector<8xf32> to vector<8x1xf32>
      %cst_129 = arith.constant 3.200000e+01 : f32
      %311 = vector.broadcast %cst_129 : f32 to vector<8x1xf32>
      %312 = arith.divf %310, %311 : vector<8x1xf32>
      %313 = vector.broadcast %312 : vector<8x1xf32> to vector<8x32xf32>
      %314 = arith.subf %302, %313 : vector<8x32xf32>
      %315 = arith.mulf %314, %314 : vector<8x32xf32>
      %cst_130 = arith.constant dense<0.000000e+00> : vector<8xf32>
      %316 = vector.multi_reduction <add>, %315, %cst_130 [1] : vector<8x32xf32> to vector<8xf32>
      %317 = vector.shape_cast %316 : vector<8xf32> to vector<8x1xf32>
      %cst_131 = arith.constant 3.200000e+01 : f32
      %318 = vector.broadcast %cst_131 : f32 to vector<8x1xf32>
      %319 = arith.divf %317, %318 : vector<8x1xf32>
      %cst_132 = arith.constant 9.99999974E-6 : f32
      %320 = vector.broadcast %cst_132 : f32 to vector<8x1xf32>
      %321 = arith.addf %319, %320 : vector<8x1xf32>
      %322 = math.rsqrt %321 : vector<8x1xf32>
      %323 = vector.broadcast %322 : vector<8x1xf32> to vector<8x32xf32>
      %324 = arith.mulf %314, %323 : vector<8x32xf32>
      %325 = vector.broadcast %307 : vector<1x32xf32> to vector<8x32xf32>
      %326 = arith.mulf %324, %325 : vector<8x32xf32>
      %327 = vector.broadcast %308 : vector<1x32xf32> to vector<8x32xf32>
      %328 = arith.addf %326, %327 : vector<8x32xf32>
      %329 = arith.truncf %328 : vector<8x32xf32> to vector<8x32xbf16>
      %c0_133 = arith.constant 0 : index
      %c0_134 = arith.constant 0 : index
      %330 = vector.load %arg26[%c0_133, %c0_134] : memref<32x128xbf16, #tpu.memory_space<vmem>>, vector<32x128xbf16>
      %cst_135 = arith.constant dense<0.000000e+00> : vector<8x128xf32>
      %331 = tpu.matmul %329, %330, %cst_135 {dimension_numbers = #tpu.dot_dimension_numbers<[1], [0], [0], [1], [0, 0, 1, 1], [], []>} : vector<8x32xbf16>, vector<32x128xbf16>, vector<8x128xf32> -> vector<8x128xf32>
      %c0_136 = arith.constant 0 : index
      %c0_137 = arith.constant 0 : index
      %332 = vector.load %arg27[%c0_136, %c0_137] : memref<1x128xf32, #tpu.memory_space<vmem>>, vector<1x128xf32>
      %333 = vector.broadcast %332 : vector<1x128xf32> to vector<8x128xf32>
      %334 = arith.addf %331, %333 : vector<8x128xf32>
      %cst_138 = arith.constant dense<0xFF800000> : vector<8xf32>
      %335 = vector.multi_reduction <maximumf>, %334, %cst_138 [1] : vector<8x128xf32> to vector<8xf32>
      %336 = vector.shape_cast %335 : vector<8xf32> to vector<8x1xf32>
      %337 = vector.broadcast %336 : vector<8x1xf32> to vector<8x128xf32>
      %338 = arith.subf %334, %337 : vector<8x128xf32>
      %339 = math.exp %338 : vector<8x128xf32>
      %cst_139 = arith.constant dense<0.000000e+00> : vector<8xf32>
      %340 = vector.multi_reduction <add>, %339, %cst_139 [1] : vector<8x128xf32> to vector<8xf32>
      %341 = vector.shape_cast %340 : vector<8xf32> to vector<8x1xf32>
      %342 = vector.broadcast %341 : vector<8x1xf32> to vector<8x128xf32>
      %343 = arith.divf %339, %342 : vector<8x128xf32>
      %c0_140 = arith.constant 0 : index
      %c0_141 = arith.constant 0 : index
      %c0_142 = arith.constant 0 : index
      %344 = vector.load %arg29[%c0_140, %c0_141, %c0_142] : memref<1x8x128xf32, #tpu.memory_space<vmem>>, vector<1x8x128xf32>
      %345 = vector.shape_cast %344 : vector<1x8x128xf32> to vector<8x128xf32>
      %346 = vector.shape_cast %343 : vector<8x128xf32> to vector<1x8x128xf32>
      tpu.vector_store %arg29[%c0_140, %c0_141, %c0_142], %346 {strides = array<i32>} : memref<1x8x128xf32, #tpu.memory_space<vmem>>, vector<1x8x128xf32>,
    } else {
    }
    return
  }
  func.func @transform_0(%arg0: i32, %arg1: i32) -> (i32, i32, i32) {
    %c0_i32 = arith.constant 0 : i32
    %c0_i32_0 = arith.constant 0 : i32
    %c0_i32_1 = arith.constant 0 : i32
    return %arg0, %c0_i32, %c0_i32_0 : i32, i32, i32
  }
  func.func @transform_1(%arg0: i32, %arg1: i32) -> (i32, i32, i32) {
    %c0_i32 = arith.constant 0 : i32
    %c0_i32_0 = arith.constant 0 : i32
    %c0_i32_1 = arith.constant 0 : i32
    return %arg0, %c0_i32, %c0_i32_0 : i32, i32, i32
  }
  func.func @transform_2(%arg0: i32, %arg1: i32) -> (i32, i32, i32) {
    %c0_i32 = arith.constant 0 : i32
    %c0_i32_0 = arith.constant 0 : i32
    %c0_i32_1 = arith.constant 0 : i32
    return %arg1, %c0_i32, %c0_i32_0 : i32, i32, i32
  }
  func.func @transform_3(%arg0: i32, %arg1: i32) -> (i32, i32, i32) {
    %c0_i32 = arith.constant 0 : i32
    %c0_i32_0 = arith.constant 0 : i32
    %c0_i32_1 = arith.constant 0 : i32
    return %arg1, %c0_i32, %c0_i32_0 : i32, i32, i32
  }
  func.func @transform_4(%arg0: i32, %arg1: i32) -> (i32, i32, i32) {
    %c0_i32 = arith.constant 0 : i32
    %c0_i32_0 = arith.constant 0 : i32
    %c0_i32_1 = arith.constant 0 : i32
    return %arg1, %c0_i32, %c0_i32_0 : i32, i32, i32
  }
  func.func @transform_5(%arg0: i32, %arg1: i32) -> (i32, i32, i32) {
    %c0_i32 = arith.constant 0 : i32
    %c0_i32_0 = arith.constant 0 : i32
    %c0_i32_1 = arith.constant 0 : i32
    return %arg1, %c0_i32, %c0_i32_0 : i32, i32, i32
  }
  func.func @transform_6(%arg0: i32, %arg1: i32) -> (i32, i32, i32) {
    %c0_i32 = arith.constant 0 : i32
    %c0_i32_0 = arith.constant 0 : i32
    %c0_i32_1 = arith.constant 0 : i32
    return %arg1, %c0_i32, %c0_i32_0 : i32, i32, i32
  }
  func.func @transform_7(%arg0: i32, %arg1: i32) -> (i32, i32, i32) {
    %c0_i32 = arith.constant 0 : i32
    %c0_i32_0 = arith.constant 0 : i32
    %c0_i32_1 = arith.constant 0 : i32
    return %arg1, %c0_i32, %c0_i32_0 : i32, i32, i32
  }
  func.func @transform_8(%arg0: i32, %arg1: i32) -> (i32, i32, i32) {
    %c0_i32 = arith.constant 0 : i32
    %c0_i32_0 = arith.constant 0 : i32
    %c0_i32_1 = arith.constant 0 : i32
    return %arg1, %c0_i32, %c0_i32_0 : i32, i32, i32
  }
  func.func @transform_9(%arg0: i32, %arg1: i32) -> (i32, i32, i32) {
    %c0_i32 = arith.constant 0 : i32
    %c0_i32_0 = arith.constant 0 : i32
    %c0_i32_1 = arith.constant 0 : i32
    return %arg1, %c0_i32, %c0_i32_0 : i32, i32, i32
  }
  func.func @transform_10(%arg0: i32, %arg1: i32) -> (i32, i32, i32) {
    %c0_i32 = arith.constant 0 : i32
    %c0_i32_0 = arith.constant 0 : i32
    %c0_i32_1 = arith.constant 0 : i32
    return %arg1, %c0_i32, %c0_i32_0 : i32, i32, i32
  }
  func.func @transform_11(%arg0: i32, %arg1: i32) -> (i32, i32, i32) {
    %c0_i32 = arith.constant 0 : i32
    %c0_i32_0 = arith.constant 0 : i32
    %c0_i32_1 = arith.constant 0 : i32
    return %arg1, %c0_i32, %c0_i32_0 : i32, i32, i32
  }
  func.func @transform_12(%arg0: i32, %arg1: i32) -> (i32, i32, i32) {
    %c0_i32 = arith.constant 0 : i32
    %c0_i32_0 = arith.constant 0 : i32
    %c0_i32_1 = arith.constant 0 : i32
    return %arg1, %c0_i32, %c0_i32_0 : i32, i32, i32
  }
  func.func @transform_13(%arg0: i32, %arg1: i32) -> (i32, i32, i32) {
    %c0_i32 = arith.constant 0 : i32
    %c0_i32_0 = arith.constant 0 : i32
    %c0_i32_1 = arith.constant 0 : i32
    return %arg1, %c0_i32, %c0_i32_0 : i32, i32, i32
  }
  func.func @transform_14(%arg0: i32, %arg1: i32) -> (i32, i32, i32) {
    %c0_i32 = arith.constant 0 : i32
    %c0_i32_0 = arith.constant 0 : i32
    %c0_i32_1 = arith.constant 0 : i32
    return %arg1, %c0_i32, %c0_i32_0 : i32, i32, i32
  }
  func.func @transform_15(%arg0: i32, %arg1: i32) -> (i32, i32, i32) {
    %c0_i32 = arith.constant 0 : i32
    %c0_i32_0 = arith.constant 0 : i32
    %c0_i32_1 = arith.constant 0 : i32
    return %arg1, %c0_i32, %c0_i32_0 : i32, i32, i32
  }
  func.func @transform_16(%arg0: i32, %arg1: i32) -> (i32, i32, i32) {
    %c0_i32 = arith.constant 0 : i32
    %c0_i32_0 = arith.constant 0 : i32
    %c0_i32_1 = arith.constant 0 : i32
    return %arg1, %c0_i32, %c0_i32_0 : i32, i32, i32
  }
  func.func @transform_17(%arg0: i32, %arg1: i32) -> (i32, i32, i32) {
    %c0_i32 = arith.constant 0 : i32
    %c0_i32_0 = arith.constant 0 : i32
    %c0_i32_1 = arith.constant 0 : i32
    return %arg1, %c0_i32, %c0_i32_0 : i32, i32, i32
  }
  func.func @transform_18(%arg0: i32, %arg1: i32) -> (i32, i32, i32) {
    %c0_i32 = arith.constant 0 : i32
    %c0_i32_0 = arith.constant 0 : i32
    %c0_i32_1 = arith.constant 0 : i32
    return %arg1, %c0_i32, %c0_i32_0 : i32, i32, i32
  }
  func.func @transform_19(%arg0: i32, %arg1: i32) -> (i32, i32, i32) {
    %c0_i32 = arith.constant 0 : i32
    %c0_i32_0 = arith.constant 0 : i32
    %c0_i32_1 = arith.constant 0 : i32
    return %arg1, %c0_i32, %c0_i32_0 : i32, i32, i32
  }
  func.func @transform_20(%arg0: i32, %arg1: i32) -> (i32, i32, i32) {
    %c0_i32 = arith.constant 0 : i32
    %c0_i32_0 = arith.constant 0 : i32
    %c0_i32_1 = arith.constant 0 : i32
    return %arg1, %c0_i32, %c0_i32_0 : i32, i32, i32
  }
  func.func @transform_21(%arg0: i32, %arg1: i32) -> (i32, i32, i32) {
    %c0_i32 = arith.constant 0 : i32
    %c0_i32_0 = arith.constant 0 : i32
    %c0_i32_1 = arith.constant 0 : i32
    return %arg1, %c0_i32, %c0_i32_0 : i32, i32, i32
  }
  func.func @transform_22(%arg0: i32, %arg1: i32) -> (i32, i32) {
    %c0_i32 = arith.constant 0 : i32
    %c0_i32_0 = arith.constant 0 : i32
    %c0_i32_1 = arith.constant 0 : i32
    return %c0_i32, %c0_i32_0 : i32, i32
  }
  func.func @transform_23(%arg0: i32, %arg1: i32) -> (i32, i32) {
    %c0_i32 = arith.constant 0 : i32
    %c0_i32_0 = arith.constant 0 : i32
    %c0_i32_1 = arith.constant 0 : i32
    return %c0_i32, %c0_i32_0 : i32, i32
  }
  func.func @transform_24(%arg0: i32, %arg1: i32) -> (i32, i32) {
    %c0_i32 = arith.constant 0 : i32
    %c0_i32_0 = arith.constant 0 : i32
    %c0_i32_1 = arith.constant 0 : i32
    return %c0_i32, %c0_i32_0 : i32, i32
  }
  func.func @transform_25(%arg0: i32, %arg1: i32) -> (i32, i32) {
    %c0_i32 = arith.constant 0 : i32
    %c0_i32_0 = arith.constant 0 : i32
    %c0_i32_1 = arith.constant 0 : i32
    return %c0_i32, %c0_i32_0 : i32, i32
  }
  func.func @transform_26(%arg0: i32, %arg1: i32) -> (i32, i32) {
    %c0_i32 = arith.constant 0 : i32
    %c0_i32_0 = arith.constant 0 : i32
    %c0_i32_1 = arith.constant 0 : i32
    return %c0_i32, %c0_i32_0 : i32, i32
  }
  func.func @transform_27(%arg0: i32, %arg1: i32) -> (i32, i32, i32) {
    %c0_i32 = arith.constant 0 : i32
    %c0_i32_0 = arith.constant 0 : i32
    %c0_i32_1 = arith.constant 0 : i32
    return %arg0, %c0_i32, %c0_i32_0 : i32, i32, i32
  }
}

</mosaic_0001>

<bundles_post_ra>
// kernel: base_lgm_forward.2
= control target key start
LH: loop header
LB: loop body
LE: loop exit
PB: predicated region body
PF: predicated region fallthrough
CT: control target
= control target key end

     0   :  { %s2122_s18 = smov 0   ;;  %s2124_s19 = smov 0   ;;  %s2387_s0 = inlined_call_operand.vmem [shape: f32[2,8,32], index: 0, kind: input, shape index: {}]   ;;  %s2388_s1 = inlined_call_operand.vmem [shape: bf16[2,32,96], index: 1, kind: input, shape index: {}]   ;;  %s2389_s2 = inlined_call_operand.vmem [shape: f32[2,1,96], index: 2, kind: input, shape index: {}]   ;;  %s2390_s3 = inlined_call_operand.vmem [shape: bf16[2,32,32], index: 3, kind: input, shape index: {}]   ;;  %s2391_s4 = inlined_call_operand.vmem [shape: f32[2,1,32], index: 4, kind: input, shape index: {}]   ;;  %s2392_s5 = inlined_call_operand.vmem [shape: f32[2,1,32], index: 5, kind: input, shape index: {}]   ;;  %s2393_s6 = inlined_call_operand.vmem [shape: f32[2,1,32], index: 6, kind: input, shape index: {}]   ;;  %s2394_s7 = inlined_call_operand.vmem [shape: bf16[2,32,64], index: 7, kind: input, shape index: {}]   ;;  %s2395_s8 = inlined_call_operand.vmem [shape: f32[2,1,64], index: 8, kind: input, shape index: {}]   ;;  %s2396_s9 = inlined_call_operand.vmem [shape: bf16[2,64,32], index: 9, kind: input, shape index: {}]   ;;  %s2397_s10 = inlined_call_operand.vmem [shape: f32[2,1,32], index: 10, kind: input, shape index: {}]   ;;  %s2398_s11 = inlined_call_operand.vmem [shape: f32[2,1,32], index: 11, kind: input, shape index: {}]   ;;  %s2399_s12 = inlined_call_operand.vmem [shape: f32[2,1,32], index: 12, kind: input, shape index: {}]   ;;  %s2400_s13 = inlined_call_operand.vmem [shape: f32[1,32], index: 13, kind: input, shape index: {}]   ;;  %s2401_s14 = inlined_call_operand.vmem [shape: f32[1,32], index: 14, kind: input, shape index: {}]   ;;  %s2402_s15 = inlined_call_operand.vmem [shape: f32[2,8,32], index: 15, kind: output, shape index: {}]  }
   0x1   :  { %2407 = sst [smem:[#allocation9_spill]] %s2387_s0  ;;  %s2126_s20 = smov 0  }
   0x2   :  { %2408 = sst [smem:[#allocation10_spill]] %s2388_s1  ;;  %s2128_s21 = smov 0  }
   0x3   :  { %2409 = sst [smem:[#allocation11_spill]] %s2390_s3  ;;  %s2130_s22 = smov 0  }
   0x4   :  { %2410 = sst [smem:[#allocation12_spill]] %s2394_s7 }
   0x5   :  { %2411 = sst [smem:[#allocation13_spill]] %s2395_s8 }
   0x6   :  { %2412 = sst [smem:[#allocation14_spill]] %s2399_s12 }
   0x7   :  { %2413 = sst [smem:[#allocation15_spill]] %s2400_s13 }
   0x8   :  { %2414 = sst [smem:[#allocation16_spill]] %s2401_s14 }
   0x9   :  { %2415 = sst [smem:[#allocation17_spill]] %s2402_s15 }
   0xa LB: > { %2416 = sst [smem:[#allocation3_spill]] %s2008_s18  ;;  %s34_s23 = sadd.s32 1, %s2016_s20  ;;  %s2024_s22 = sphi %s2130_s22, %s25_s22   ;;  %s2020_s21 = sphi %s2128_s21, %s2444_s21   ;;  %s2016_s20 = sphi %s2126_s20, %s2443_s20   ;;  %s2012_s19 = sphi %s2124_s19, %s2442_s19   ;;  %s2008_s18 = sphi %s2122_s18, %s2441_s18  }
   0xb   : > { %2417 = sst [smem:[#allocation4_spill]] %s2016_s20  ;;  %s37_s24 = sadd.s32 1, %s2020_s21 }
   0xc   : > { %2418 = sst [smem:[#allocation5_spill]] %s2020_s21  ;;  %p35_p0 = scmp.ge.s32.totalorder %s34_s23, 2 }
   0xd   : > { %2419 = sst [smem:[#allocation6_spill]] %s2024_s22  ;;  %p1733_p1 = scmp.ge.s32.totalorder %s2024_s22, 1 }
   0xe   : > { %p552_p2 = scmp.lt.s32.totalorder %s2024_s22, 5  ;;  %s2446_s23 = smov (%p35_p0, %s34_s23), 0 }
   0xf   : > { %2420 = sst [smem:[#allocation7_spill]] %s2446_s23  ;;  %s2448_s24 = smov (!%p35_p0, %s37_s24), %s2020_s21 }
  0x10   : > { %p553_p3 = pnand %p1733_p1, %p552_p2  ;;  %p39_p4 = scmp.ge.s32.totalorder %s2448_s24, 2 }
  0x11   : > { %p642_p5 = scmp.lt.s32.totalorder (!%p553_p3), %s2012_s19, 1  ;;  %p646_p6 = scmp.lt.s32.totalorder (!%p553_p3), %s2008_s18, 1 }
  0x12   : > { %s2450_s24 = smov (%p39_p4, %s2448_s24), 0  ;;  %556 = sbr.rel (%p553_p3) target bundleno = 2775 (0xad7), region = 80 }
  0x13   : > { %2421 = sst [smem:[#allocation8_spill]] %s2450_s24 }
  0x14   : > { %s2422_s0 = sld [smem:[#allocation9_spill]] (!%p553_p3) }
  0x15   : > { %s2423_s1 = sld [smem:[#allocation10_spill]] (!%p553_p3) }
  0x16   : > { %s2424_s3 = sld [smem:[#allocation11_spill]] (!%p553_p3) }
  0x17   : > { %s2452_s19 = smov (!%p642_p5, %s2012_s19), 1  ;;  %s2425_s7 = sld [smem:[#allocation12_spill]] }
  0x18   : > { %s2156_s25 = scalar_select %p646_p6, %s2008_s18, 1 }
  0x19   : > { %s1734_s26 = sshll.u32 %s2452_s19, 3  ;;  %s2427_s17 = sld [smem:[#allocation14_spill]] }
  0x1a   : > { %s645_s29 = scalar_lea.vmem %s2422_s0, %s1734_s26  ;;  %s1780_s30 = sshll.u32 %s2156_s25, 4 }
  0x1b   : > { %s650_s24 = scalar_lea.vmem %s2423_s1, %s1780_s30  ;;  %s683_s15 = scalar_lea.vmem %s2397_s10, %s2156_s25 }
  0x1c   : > { %s2172_s13 = scalar_lea.vmem %s2424_s3, %s1780_s30  ;;  %s1783_s3 = sshll.u32 %s2156_s25, 5 }
  0x1d   : > { %s2189_s23 = scalar_lea.vmem %s2425_s7, %s1780_s30  ;;  %s2203_s0 = scalar_lea.vmem %s2396_s9, %s1783_s3 }
  0x1e   : > { %s686_s1 = scalar_lea.vmem %s2398_s11, %s2156_s25  ;;  %s2428_s20 = sld [smem:[#allocation17_spill]] }
  0x1f   : > { %s689_s7 = scalar_lea.vmem %s2427_s17, %s2156_s25  ;;  %s2429_s18 = sld [smem:[#allocation3_spill]] }
  0x24   : > { %s2216_s8 = scalar_lea.vmem %s2428_s20, %s1734_s26 }
  0x25   : > { %p1744_p7 = scmp.ne.s32.totalorder %s2429_s18, 0 }
  0x27   : > { %698 = sbr.rel (%p1744_p7) target bundleno = 46 (0x2e), region = 84 }
  0x2c   : > { %v699_v0 = vld [vmem:[%s645_s29] sm:$0xff]  ;;  %vm700_vm0 = vcmask 261120  }
  0x2d   : > { %701 = vst.msk [vmem:[#allocation2] sm:$0xff] %vm700_vm0, %v699_v0 }
  0x2e PF: > { %v1954_v1 = vld [vmem:[%s650_s24 + $0x8] sm:$0xff]   ;;  %v2026_v2 = vmov 0.0   ;;  %v1955_v3 = vld [vmem:[%s650_s24] sm:$0xff]   ;;  %vm2027_vm1 = vmmov 0   ;;  %vm727_vm2 = vcmask 261120   ;;  %s2430_s24 = scalar_lea.vmem %s2389_s2, %s2156_s25  ;;  %s2028_s26 = smov 120  }
  0x2f   : > { %1814 = vmatprep.subr.bf16.mxu0 %v2026_v2  ;;  %1822 = vmatprep.subr.bf16.mxu1 %v2026_v2  ;;  %v1745_v6 = vld [vmem:[%s2430_s24] ss:$0 sm:$0xff]  ;;  %s2029_s29 = smov 96   ;;  %s2030_s17 = smov 80   ;;  %vm775_vm3 = vcmask 64512   ;;  %vm839_vm4 = vcmask 1043456  }
  0x30   : > { %1815 = vmatpush3.bf16.msra.mxu0 %v1954_v1  ;;  %1818 = vmatprep.mubr.msk.bf16.mxu0 %vm2027_vm1, %v2026_v2  ;;  %s2031_s19 = smov 88   ;;  %s2032_s27 = smov 72   ;;  %vm1226_vm5 = vcmask 130048   ;;  %vm1228_vm6 = vcmask 195584   ;;  %vm1436_vm7 = vcmask 523264  }
  0x31   : > { %1816 = vmatprep.subr.bf16.mxu0 %v2026_v2  ;;  %1824 = vmatprep.mubr.msk.bf16.mxu1 %vm2027_vm1, %v2026_v2  ;;  %s2033_s28 = smov 112   ;;  %s2034_s12 = smov 104  }
  0x32   : > { %s2035_s16 = smov 56   ;;  %s2036_s30 = smov 64  }
  0x33   : > { %s2037_s21 = smov 40   ;;  %s2038_s14 = smov 48  }
  0x34   : > { %v2223_v4 = vld [vmem:[#allocation2] sm:$0xff]  ;;  %1817 = vmatpush3.bf16.msra.mxu0 %v1955_v3  ;;  %s2039_s22 = smov 8   ;;  %s2040_s18 = smov 16  }
  0x35   : > { %v703_v5 = vpack.c.bf16 %v2223_v4, %v2223_v4  ;;  %1828 = vmatprep.subr.bf16.mxu0 %v2026_v2  ;;  %s2041_s3 = smov 24   ;;  %s2431_s24 = scalar_lea.vmem %s2391_s4, %s2156_s25 }
  0x37   : > { %1819 = vmatmul.mubr.msk.bf16.vlgmr.msra.gmra.mxu0 %vm727_vm2, %v703_v5 }
  0x38   : > { %1830 = vmatprep.mubr.msk.bf16.mxu0 %vm2027_vm1, %v2026_v2 }
  0xf7   : > { %v765_v7 = vpop.f32.mrf.mxu0 }
  0xf8   : > { %v766_v8 = vadd.f32 %v1745_v6, %v765_v7 }
  0xf9   : > { %v1820_v9 = vpop.f32.mrf.mxu0 }
  0xfa   : > { %v2239_v10 = vpack.c.bf16 %v766_v8, %v766_v8 }
  0xfb   : > { %v768_v11 = vpop.f32.mrf.mxu0 }
  0xfc   : > { %883 = vrot.lane.b32.xlu1 %v2239_v10, %s2028_s26  ;;  %773 = vrot.lane.b32.xlu0 %v2239_v10, %s2029_s29  ;;  %s2432_s29 = scalar_lea.vmem %s2392_s5, %s2156_s25 }
  0xfd   : > { %v1821_v12 = vpop.f32.mrf.mxu0 }
 0x100   : > { %995 = vrot.lane.b32.xlu1 %v2239_v10, %s2030_s17  ;;  %885 = vrot.lane.b32.xlu0 %v2239_v10, %s2031_s19 }
 0x104   : > { %1105 = vrot.lane.b32.xlu1 %v2239_v10, %s2032_s27  ;;  %993 = vrot.lane.b32.xlu0 %v2239_v10, %s2033_s28  ;;  %s2433_s27 = scalar_lea.vmem %s2393_s6, %s2156_s25 }
 0x108   : > { %1103 = vrot.lane.b32.xlu0 %v2239_v10, %s2034_s12 }
 0x16e   : > { %v774_v13 = vpop.permute.xlu0 %773  ;;  %v884_v16 = vpop.permute.xlu1 %883 }
 0x16f   : > { %v780_v14 = vsel %vm775_vm3, %v774_v13, 0 }
 0x170   : > { %1823 = vmatpush3.bf16.xpose.msra.mxu1 %v780_v14 }
 0x171   : > { %1834 = vmatprep.subr.bf16.mxu1 %v2026_v2 }
 0x172   : > { %v886_v15 = vpop.permute.xlu0 %885  ;;  %v996_v18 = vpop.permute.xlu1 %995 }
 0x173   : > { %v891_v17 = vsel %vm775_vm3, %v886_v15, 0  ;;  %v1001_v19 = vsel %vm775_vm3, %v996_v18, 0 }
 0x176   : > { %v1106_v20 = vpop.permute.xlu1 %1105  ;;  %v994_v21 = vpop.permute.xlu0 %993 }
 0x177   : > { %1825 = vmatmul.mubr.msk.bf16.vlgmr.msra.gmra.mxu1 %vm775_vm3, %v2239_v10  ;;  %v1111_v22 = vsel %vm775_vm3, %v1106_v20, 0 }
 0x178   : > { %1835 = vmatpush3.bf16.xpose.msra.mxu1 %v891_v17  ;;  %1836 = vmatprep.mubr.msk.bf16.mxu1 %vm2027_vm1, %v2026_v2 }
 0x179   : > { %1846 = vmatprep.subr.bf16.mxu1 %v2026_v2 }
 0x17a   : > { %v1104_v23 = vpop.permute.xlu0 %1103 }
 0x17f   : > { %1837 = vmatmul.mubr.msk.bf16.vlgmr.msra.gmra.mxu1 %vm775_vm3, %v884_v16 }
 0x180   : > { %1847 = vmatpush3.bf16.xpose.msra.mxu1 %v1001_v19  ;;  %1848 = vmatprep.mubr.msk.bf16.mxu1 %vm2027_vm1, %v2026_v2 }
 0x181   : > { %1858 = vmatprep.subr.bf16.mxu1 %v2026_v2 }
 0x187   : > { %1849 = vmatmul.mubr.msk.bf16.vlgmr.msra.gmra.mxu1 %vm775_vm3, %v994_v21 }
 0x188   : > { %1859 = vmatpush3.bf16.xpose.msra.mxu1 %v1111_v22  ;;  %1860 = vmatprep.mubr.msk.bf16.mxu1 %vm2027_vm1, %v2026_v2 }
 0x189   : > { %1870 = vmatprep.subr.bf16.mxu1 %v2026_v2 }
 0x18f   : > { %1861 = vmatmul.mubr.msk.bf16.vlgmr.msra.gmra.mxu1 %vm775_vm3, %v1104_v23 }
 0x190   : > { %1874 = vmatprep.mubr.msk.bf16.mxu1 %vm2027_vm1, %v2026_v2 }
 0x237   : > { %v816_v24 = vpop.f32.mrf.mxu1 }
 0x238   : > { %v822_v25 = vsel %vm775_vm3, %v816_v24, -inf }
 0x239   : > { %823 = vmax.xlane.f32.xlu1 %v822_v25  ;;  %v1826_v26 = vpop.f32.mrf.mxu1 }
 0x23b   : > { %v819_v27 = vpop.f32.mrf.mxu1 }
 0x23d   : > { %v1827_v28 = vpop.f32.mrf.mxu1 }
 0x23f   : > { %v927_v29 = vpop.f32.mrf.mxu1 }
 0x240   : > { %v933_v30 = vsel %vm775_vm3, %v927_v29, -inf }
 0x241   : > { %934 = vmax.xlane.f32.xlu0 %v933_v30  ;;  %v1838_v31 = vpop.f32.mrf.mxu1 }
 0x243   : > { %v930_v32 = vpop.f32.mrf.mxu1 }
 0x245   : > { %v1839_v33 = vpop.f32.mrf.mxu1 }
 0x247   : > { %v1037_v34 = vpop.f32.mrf.mxu1 }
 0x248   : > { %v1043_v35 = vsel %vm775_vm3, %v1037_v34, -inf }
 0x249   : > { %1044 = vmax.xlane.f32.xlu0 %v1043_v35  ;;  %v1850_v36 = vpop.f32.mrf.mxu1  ;;  %v1957_v35 = vld [vmem:[%s2172_s13] sm:$0xff]  }
 0x24b   : > { %v1040_v37 = vpop.f32.mrf.mxu1 }
 0x24d   : > { %v1851_v38 = vpop.f32.mrf.mxu1 }
 0x24f   : > { %v1147_v39 = vpop.f32.mrf.mxu1 }
 0x250   : > { %v1153_v40 = vsel %vm775_vm3, %v1147_v39, -inf }
 0x251   : > { %1154 = vmax.xlane.f32.xlu1 %v1153_v40  ;;  %v1862_v41 = vpop.f32.mrf.mxu1 }
 0x253   : > { %v1150_v42 = vpop.f32.mrf.mxu1 }
 0x255   : > { %v1863_v43 = vpop.f32.mrf.mxu1 }
 0x2c2   : > { %v824_v44 = vpop.xlane.xlu1 %823 }
 0x2c3   : > { %v825_v45 = vsub.f32 %v816_v24, %v824_v44 }
 0x2c5   : > { %v826_v46 = vmul.f32 1.442695, %v825_v45 }
 0x2c7   : > { %1964 = vpow2.f32 %v826_v46 }
 0x2ca   : > { %v935_v47 = vpop.xlane.xlu0 %934 }
 0x2cb   : > { %v936_v48 = vsub.f32 %v927_v29, %v935_v47 }
 0x2cd   : > { %v937_v49 = vmul.f32 1.442695, %v936_v48 }
 0x2cf   : > { %1966 = vpow2.f32 %v937_v49 }
 0x2d2   : > { %v1045_v50 = vpop.xlane.xlu0 %1044 }
 0x2d3   : > { %v1046_v51 = vsub.f32 %v1037_v34, %v1045_v50  ;;  %v1956_v34 = vld [vmem:[%s2172_s13 + $0x8] sm:$0xff]   ;;  %s2437_s13 = sld [smem:[#allocation3_spill]] }
 0x2d4   : > { %v1965_v52 = vpop.eup %1964  ;;  %1871 = vmatpush3.bf16.msra.mxu1 %v1956_v34 }
 0x2d5   : > { %v1047_v53 = vmul.f32 1.442695, %v1046_v51  ;;  %v828_v54 = vsel %vm775_vm3, %v1965_v52, 0.0  ;;  %1872 = vmatprep.subr.bf16.mxu1 %v2026_v2  ;;  %v1757_v51 = vld [vmem:[%s2431_s24] ss:$0 sm:$0xff] }
 0x2d6   : > { %829 = vadd.xlane.f32.xlu0 %v828_v54 }
 0x2d7   : > { %1968 = vpow2.f32 %v1047_v53 }
 0x2d8   : > { %1873 = vmatpush3.bf16.msra.mxu1 %v1957_v35 }
 0x2d9   : > { %1886 = vmatprep.subr.bf16.mxu1 %v2026_v2  ;;  %p1775_p8 = scmp.ne.s32.totalorder %s2437_s13, 1 }
 0x2da   : > { %v1155_v59 = vpop.xlane.xlu1 %1154 }
 0x2db   : > { %v1156_v60 = vsub.f32 %v1147_v39, %v1155_v59 }
 0x2dc   : > { %v1967_v55 = vpop.eup %1966 }
 0x2dd   : > { %v939_v56 = vsel %vm775_vm3, %v1967_v55, 0.0  ;;  %v1157_v61 = vmul.f32 1.442695, %v1156_v60 }
 0x2de   : > { %940 = vadd.xlane.f32.xlu1 %v939_v56 }
 0x2df   : > { %1970 = vpow2.f32 %v1157_v61 }
 0x2e4   : > { %v1969_v57 = vpop.eup %1968 }
 0x2e5   : > { %v1049_v58 = vsel %vm775_vm3, %v1969_v57, 0.0 }
 0x2e6   : > { %1050 = vadd.xlane.f32.xlu0 %v1049_v58 }
 0x2ec   : > { %v1971_v62 = vpop.eup %1970 }
 0x2ed   : > { %v1159_v63 = vsel %vm775_vm3, %v1971_v62, 0.0 }
 0x2ef   : > { %945 = vrot.lane.b32.xlu1 %v2239_v10, %s2035_s16  ;;  %s2434_s16 = sld [smem:[#allocation13_spill]] }
 0x2fc   : > { %834 = vrot.lane.b32.xlu0 %v2239_v10, %s2036_s30  ;;  %s2435_s30 = scalar_lea.vmem %s2434_s16, %s2156_s25 }
 0x300   : > { %1165 = vrot.lane.b32.xlu0 %v2239_v10, %s2037_s21 }
 0x313   : > { %1160 = vadd.xlane.f32.xlu1 %v1159_v63 }
 0x324   : > { %1055 = vrot.lane.b32.xlu1 %v2239_v10, %s2038_s14 }
 0x35f   : > { %v830_v0 = vpop.xlane.xlu0 %829 }
 0x360   : > { %1972 = vrcp.f32 %v830_v0  ;;  %v1958_v0 = vld [vmem:[%s2189_s23 + $0x8] sm:$0xff]  }
 0x367   : > { %v941_v1 = vpop.xlane.xlu1 %940 }
 0x368   : > { %1974 = vrcp.f32 %v941_v1  ;;  %v1959_v1 = vld [vmem:[%s2189_s23] sm:$0xff]   ;;  %s2439_s23 = sld [smem:[#allocation16_spill]] (!%p1775_p8) }
 0x36b   : > { %v946_v9 = vpop.permute.xlu1 %945 }
 0x36c   : > { %v951_v13 = vsel %vm839_vm4, %v946_v9, 0  ;;  %v1761_v9 = vld [vmem:[%s2432_s29] ss:$0 sm:$0xff] }
 0x36d   : > { %v1973_v3 = vpop.eup %1972 }
 0x36e   : > { %v832_v6 = vmul.f32 %v1973_v3, %v1965_v52  ;;  %v1961_v3 = vld [vmem:[%s2203_s0 + $0x10] sm:$0xff]  }
 0x36f   : > { %v1051_v5 = vpop.xlane.xlu0 %1050 }
 0x370   : > { %v833_v11 = vpack.c.bf16 %v832_v6, %v832_v6  ;;  %1976 = vrcp.f32 %v1051_v5 }
 0x373   : > { %v835_v7 = vpop.permute.xlu0 %834 }
 0x374   : > { %v841_v8 = vsel %vm839_vm4, %v835_v7, 0 }
 0x375   : > { %1829 = vmatpush3.bf16.msra.mxu0 %v841_v8  ;;  %v1975_v12 = vpop.eup %1974 }
 0x376   : > { %1840 = vmatprep.subr.bf16.mxu0 %v2026_v2  ;;  %v943_v10 = vmul.f32 %v1975_v12, %v1967_v55  ;;  %v1762_v12 = vld [vmem:[%s2433_s27] ss:$0 sm:$0xff] }
 0x377   : > { %v1166_v20 = vpop.permute.xlu0 %1165 }
 0x378   : > { %1831 = vmatmul.mubr.msk.bf16.vlgmr.msra.gmra.mxu0 %vm775_vm3, %v833_v11  ;;  %v944_v14 = vpack.c.bf16 %v943_v10, %v943_v10  ;;  %v1171_v22 = vsel %vm839_vm4, %v1166_v20, 0 }
 0x379   : > { %1841 = vmatpush3.bf16.msra.mxu0 %v951_v13  ;;  %1842 = vmatprep.mubr.msk.bf16.mxu0 %vm2027_vm1, %v2026_v2 }
 0x37a   : > { %1852 = vmatprep.subr.bf16.mxu0 %v2026_v2 }
 0x37d   : > { %v1977_v15 = vpop.eup %1976 }
 0x37e   : > { %v1053_v17 = vmul.f32 %v1977_v15, %v1969_v57  ;;  %v1962_v15 = vld [vmem:[%s2203_s0 + $0x8] sm:$0xff]  }
 0x380   : > { %1843 = vmatmul.mubr.msk.bf16.vlgmr.msra.gmra.mxu0 %vm775_vm3, %v944_v14  ;;  %v1054_v21 = vpack.c.bf16 %v1053_v17, %v1053_v17  ;;  %v1763_v17 = vld [vmem:[%s2435_s30] ss:$0 sm:$0xff] }
 0x381   : > { %1854 = vmatprep.mubr.msk.bf16.mxu0 %vm2027_vm1, %v2026_v2 }
 0x39c   : > { %v1161_v16 = vpop.xlane.xlu1 %1160 }
 0x39d   : > { %1978 = vrcp.f32 %v1161_v16  ;;  %v1963_v16 = vld [vmem:[%s2203_s0] sm:$0xff]  }
 0x3a0   : > { %v1056_v18 = vpop.permute.xlu1 %1055 }
 0x3a1   : > { %v1061_v19 = vsel %vm839_vm4, %v1056_v18, 0 }
 0x3a2   : > { %1853 = vmatpush3.bf16.msra.mxu0 %v1061_v19 }
 0x3a3   : > { %1864 = vmatprep.subr.bf16.mxu0 %v2026_v2 }
 0x3a5   : > { %1855 = vmatmul.mubr.msk.bf16.vlgmr.msra.gmra.mxu0 %vm775_vm3, %v1054_v21 }
 0x3a6   : > { %1865 = vmatpush3.bf16.msra.mxu0 %v1171_v22  ;;  %1866 = vmatprep.mubr.msk.bf16.mxu0 %vm2027_vm1, %v2026_v2 }
 0x3a7   : > { %1878 = vmatprep.subr.bf16.mxu0 %v2026_v2 }
 0x3aa   : > { %v1979_v23 = vpop.eup %1978 }
 0x3ab   : > { %v1163_v24 = vmul.f32 %v1979_v23, %v1971_v62 }
 0x3ad   : > { %v1164_v25 = vpack.c.bf16 %v1163_v24, %v1163_v24 }
 0x3af   : > { %1867 = vmatmul.mubr.msk.bf16.vlgmr.msra.gmra.mxu0 %vm775_vm3, %v1164_v25 }
 0x3b0   : > { %1882 = vmatprep.mubr.msk.bf16.mxu0 %vm2027_vm1, %v2026_v2  ;;  %1879 = vmatpush3.bf16.msra.mxu0 %v1958_v0 }
 0x3b1   : > { %1880 = vmatprep.subr.bf16.mxu0 %v2026_v2 }
 0x3b4   : > { %1881 = vmatpush3.bf16.msra.mxu0 %v1959_v1 }
 0x438   : > { %v877_v26 = vpop.f32.mrf.mxu0 }
 0x43a   : > { %v1832_v27 = vpop.f32.mrf.mxu0 }
 0x43c   : > { %v880_v28 = vpop.f32.mrf.mxu0 }
 0x43e   : > { %v1833_v29 = vpop.f32.mrf.mxu0 }
 0x440   : > { %v987_v30 = vpop.f32.mrf.mxu0 }
 0x441   : > { %1214 = vrot.lane.b32.xlu1 %v987_v30, %s2039_s22 }
 0x442   : > { %v1844_v31 = vpop.f32.mrf.mxu0 }
 0x444   : > { %v990_v32 = vpop.f32.mrf.mxu0 }
 0x446   : > { %v1845_v33 = vpop.f32.mrf.mxu0 }
 0x465   : > { %v1097_v36 = vpop.f32.mrf.mxu0 }
 0x466   : > { %1218 = vrot.lane.b32.xlu0 %v1097_v36, %s2040_s18 }
 0x467   : > { %v1856_v37 = vpop.f32.mrf.mxu0 }
 0x469   : > { %v1100_v38 = vpop.f32.mrf.mxu0 }
 0x46b   : > { %v1857_v39 = vpop.f32.mrf.mxu0 }
 0x46f   : > { %v1207_v40 = vpop.f32.mrf.mxu0 }
 0x470   : > { %1222 = vrot.lane.b32.xlu1 %v1207_v40, %s2041_s3 }
 0x471   : > { %v1868_v41 = vpop.f32.mrf.mxu0 }
 0x472   : > { %v1773_v41 = vld [vmem:[%s686_s1] ss:$0 sm:$0xff]  ;;  %s2438_s1 = sld [smem:[#allocation15_spill]] (!%p1775_p8) }
 0x473   : > { %v1210_v42 = vpop.f32.mrf.mxu0 }
 0x475   : > { %v1869_v43 = vpop.f32.mrf.mxu0 }
 0x476   : > { %v1774_v43 = vld [vmem:[%s689_s7] ss:$0 sm:$0xff] }
 0x4b3   : > { %v1215_v44 = vpop.permute.xlu1 %1214 }
 0x4b4   : > { %v1225_v46 = vsel %vm775_vm3, %v877_v26, %v1215_v44 }
 0x4d8   : > { %v1219_v45 = vpop.permute.xlu0 %1218 }
 0x4d9   : > { %v1227_v47 = vsel %vm1226_vm5, %v1225_v46, %v1219_v45 }
 0x4e2   : > { %v1223_v48 = vpop.permute.xlu1 %1222 }
 0x4e3   : > { %v1229_v49 = vsel %vm1228_vm6, %v1227_v47, %v1223_v48 }
 0x4e4   : > { %v1230_v50 = vpack.c.bf16 %v1229_v49, %v1229_v49 }
 0x4e6   : > { %1875 = vmatmul.mubr.msk.bf16.vlgmr.msra.gmra.mxu1 %vm727_vm2, %v1230_v50 }
 0x4e7   : > { %1894 = vmatprep.mubr.msk.bf16.mxu1 %vm2027_vm1, %v2026_v2 }
 0x5a6   : > { %v1291_v52 = vpop.f32.mrf.mxu1 }
 0x5a7   : > { %v1292_v53 = vadd.f32 %v1757_v51, %v1291_v52 }
 0x5a8   : > { %v1876_v54 = vpop.f32.mrf.mxu1 }
 0x5a9   : > { %v1297_v55 = vadd.f32 %v1292_v53, %v2223_v4  ;;  %v1960_v4 = vld [vmem:[%s2203_s0 + $0x18] sm:$0xff]  }
 0x5aa   : > { %v1294_v56 = vpop.f32.mrf.mxu1  ;;  %1887 = vmatpush3.bf16.msra.mxu1 %v1960_v4 }
 0x5ab   : > { %v1300_v57 = vsel %vm727_vm2, %v1297_v55, 0.0  ;;  %1888 = vmatprep.subr.bf16.mxu1 %v2026_v2 }
 0x5ac   : > { %1301 = vadd.xlane.f32.xlu0 %v1300_v57  ;;  %v1877_v58 = vpop.f32.mrf.mxu1 }
 0x5ae   : > { %1889 = vmatpush3.bf16.msra.mxu1 %v1961_v3 }
 0x5af   : > { %1890 = vmatprep.subr.bf16.mxu1 %v2026_v2 }
 0x5b2   : > { %1891 = vmatpush3.bf16.msra.mxu1 %v1962_v15 }
 0x5b3   : > { %1892 = vmatprep.subr.bf16.mxu1 %v2026_v2  ;;  %v1767_v2 = vld [vmem:[%s683_s15] ss:$0 sm:$0xff] }
 0x5b6   : > { %1893 = vmatpush3.bf16.msra.mxu1 %v1963_v16 }
 0x635   : > { %v1302_v59 = vpop.xlane.xlu0 %1301 }
 0x636   : > { %v1304_v60 = vmul.f32 0.03125, %v1302_v59 }
 0x638   : > { %v1305_v61 = vsub.f32 %v1297_v55, %v1304_v60 }
 0x63a   : > { %v1306_v62 = vmul.f32 %v1305_v61, %v1305_v61 }
 0x63c   : > { %v1307_v63 = vsel %vm727_vm2, %v1306_v62, 0.0 }
 0x63d   : > { %1308 = vadd.xlane.f32.xlu1 %v1307_v63 }
 0x6c6   : > { %v1309_v5 = vpop.xlane.xlu1 %1308 }
 0x6c7   : > { %v1310_v6 = vmul.f32 0.03125, %v1309_v5 }
 0x6c9   : > { %v1311_v7 = vadd.f32 1e-05, %v1310_v6 }
 0x6cb   : > { %1980 = vrsqrt.f32 %v1311_v7 }
 0x6d8   : > { %v1981_v8 = vpop.eup %1980 }
 0x6d9   : > { %v1313_v11 = vmul.f32 %v1981_v8, %v1305_v61 }
 0x6db   : > { %v1320_v13 = vmul.f32 %v1761_v9, %v1313_v11 }
 0x6dd   : > { %v1327_v10 = vadd.f32 %v1762_v12, %v1320_v13 }
 0x6df   : > { %v1328_v14 = vpack.c.bf16 %v1327_v10, %v1327_v10 }
 0x6e1   : > { %1883 = vmatmul.mubr.msk.bf16.vlgmr.msra.gmra.mxu0 %vm727_vm2, %v1328_v14 }
 0x7a1   : > { %v1389_v18 = vpop.f32.mrf.mxu0 }
 0x7a2   : > { %v1390_v19 = vadd.f32 %v1763_v17, %v1389_v18 }
 0x7a3   : > { %v1884_v20 = vpop.f32.mrf.mxu0 }
 0x7a4   : > { %v1395_v21 = vmax.f32 %v1390_v19, 0.0 }
 0x7a5   : > { %v1392_v22 = vpop.f32.mrf.mxu0 }
 0x7a6   : > { %v1396_v23 = vpack.c.bf16 %v1395_v21, %v1395_v21 }
 0x7a7   : > { %v1885_v24 = vpop.f32.mrf.mxu0 }
 0x7a8   : > { %1895 = vmatmul.mubr.msk.bf16.vlgmr.msra.gmra.mxu1 %vm1436_vm7, %v1396_v23 }
 0x868   : > { %v1474_v25 = vpop.f32.mrf.mxu1 }
 0x869   : > { %v1475_v26 = vadd.f32 %v1767_v2, %v1474_v25 }
 0x86a   : > { %v1896_v27 = vpop.f32.mrf.mxu1 }
 0x86b   : > { %v1480_v28 = vadd.f32 %v1475_v26, %v1327_v10 }
 0x86c   : > { %v1477_v29 = vpop.f32.mrf.mxu1 }
 0x86d   : > { %v1483_v30 = vsel %vm727_vm2, %v1480_v28, 0.0 }
 0x86e   : > { %1484 = vadd.xlane.f32.xlu0 %v1483_v30  ;;  %v1897_v31 = vpop.f32.mrf.mxu1 }
 0x8f7   : > { %v1485_v32 = vpop.xlane.xlu0 %1484 }
 0x8f8   : > { %v1486_v33 = vmul.f32 0.03125, %v1485_v32 }
 0x8fa   : > { %v1487_v34 = vsub.f32 %v1480_v28, %v1486_v33 }
 0x8fc   : > { %v1488_v35 = vmul.f32 %v1487_v34, %v1487_v34 }
 0x8fe   : > { %v1489_v36 = vsel %vm727_vm2, %v1488_v35, 0.0 }
 0x8ff   : > { %1490 = vadd.xlane.f32.xlu0 %v1489_v36 }
 0x988   : > { %v1491_v37 = vpop.xlane.xlu0 %1490 }
 0x989   : > { %v1492_v38 = vmul.f32 0.03125, %v1491_v37 }
 0x98b   : > { %v1493_v39 = vadd.f32 1e-05, %v1492_v38 }
 0x98d   : > { %1982 = vrsqrt.f32 %v1493_v39 }
 0x99a   : > { %v1983_v40 = vpop.eup %1982 }
 0x99b   : > { %v1495_v42 = vmul.f32 %v1983_v40, %v1487_v34 }
 0x99d   : > { %v1502_v44 = vmul.f32 %v1773_v41, %v1495_v42  ;;  %1514 = sbr.rel (%p1775_p8) target bundleno = 2775 (0xad7), region = 88 }
 0x99f   : > { %v1509_v45 = vadd.f32 %v1774_v43, %v1502_v44 }
 0x9a1   : > { %1510 = vst.msk [vmem:[#allocation2] sm:$0xff] %vm727_vm2, %v1509_v45 }
 0x9a2   : > { %v1517_v46 = vsel %vm727_vm2, %v1509_v45, 0.0  ;;  %v1776_v56 = vld [vmem:[%s2438_s1] ss:$0 sm:$0xff] }
 0x9a3   : > { %1518 = vadd.xlane.f32.xlu0 %v1517_v46  ;;  %v1777_v58 = vld [vmem:[%s2439_s23] ss:$0 sm:$0xff] }
 0xa2c   : > { %v1519_v47 = vpop.xlane.xlu0 %1518 }
 0xa2d   : > { %v1520_v48 = vmul.f32 0.03125, %v1519_v47 }
 0xa2f   : > { %v1521_v49 = vsub.f32 %v1509_v45, %v1520_v48 }
 0xa31   : > { %v1522_v50 = vmul.f32 %v1521_v49, %v1521_v49 }
 0xa33   : > { %v1523_v51 = vsel %vm727_vm2, %v1522_v50, 0.0 }
 0xa34   : > { %1524 = vadd.xlane.f32.xlu0 %v1523_v51 }
 0xabd   : > { %v1525_v52 = vpop.xlane.xlu0 %1524 }
 0xabe   : > { %v1526_v53 = vmul.f32 0.03125, %v1525_v52 }
 0xac0   : > { %v1527_v54 = vadd.f32 1e-05, %v1526_v53 }
 0xac2   : > { %1984 = vrsqrt.f32 %v1527_v54 }
 0xacf   : > { %v1985_v55 = vpop.eup %1984 }
 0xad0   : > { %v1529_v57 = vmul.f32 %v1985_v55, %v1521_v49 }
 0xad2   : > { %v1536_v59 = vmul.f32 %v1776_v56, %v1529_v57 }
 0xad4   : > { %v1543_v60 = vadd.f32 %v1777_v58, %v1536_v59 }
 0xad6   : > { %1544 = vst.msk [vmem:[%s2216_s8] sm:$0xff] %vm727_vm2, %v1543_v60 }
 0xad7 PF: > { %s2440_s26 = sld [smem:[#allocation6_spill]] }
 0xad8   : > { %s2441_s18 = sld [smem:[#allocation4_spill]] }
 0xad9   : > { %s2442_s19 = sld [smem:[#allocation5_spill]] }
 0xada   : > { %s2443_s20 = sld [smem:[#allocation7_spill]] }
 0xadb   : > { %s2444_s21 = sld [smem:[#allocation8_spill]] }
 0xadd   : > { %s25_s22 = sadd.s32 1, %s2440_s26  }
 0xade   : > { %p22_p9 = scmp.ge.s32.totalorder %s25_s22, 6  }
 0xae0   :  { %24 = sbr.rel (!%p22_p9) target bundleno = 10 (0xa), region = 154 }

// kernel: base_lgm_forward.3
= control target key start
LH: loop header
LB: loop body
LE: loop exit
PB: predicated region body
PF: predicated region fallthrough
CT: control target
= control target key end

     0   :  { %s3694_s30 = smov 0   ;;  %s4164_s0 = inlined_call_operand.vmem [shape: f32[2,8,32], index: 0, kind: input, shape index: {}]   ;;  %s4165_s1 = inlined_call_operand.vmem [shape: f32[2,8,32], index: 1, kind: input, shape index: {}]   ;;  %s4166_s2 = inlined_call_operand.vmem [shape: bf16[2,32,96], index: 2, kind: input, shape index: {}]   ;;  %s4167_s3 = inlined_call_operand.vmem [shape: f32[2,1,96], index: 3, kind: input, shape index: {}]   ;;  %s4168_s4 = inlined_call_operand.vmem [shape: bf16[2,32,32], index: 4, kind: input, shape index: {}]   ;;  %s4169_s5 = inlined_call_operand.vmem [shape: f32[2,1,32], index: 5, kind: input, shape index: {}]   ;;  %s4170_s6 = inlined_call_operand.vmem [shape: f32[2,1,32], index: 6, kind: input, shape index: {}]   ;;  %s4171_s7 = inlined_call_operand.vmem [shape: f32[2,1,32], index: 7, kind: input, shape index: {}]   ;;  %s4172_s8 = inlined_call_operand.vmem [shape: bf16[2,32,32], index: 8, kind: input, shape index: {}]   ;;  %s4173_s9 = inlined_call_operand.vmem [shape: f32[2,1,32], index: 9, kind: input, shape index: {}]   ;;  %s4174_s10 = inlined_call_operand.vmem [shape: bf16[2,32,64], index: 10, kind: input, shape index: {}]   ;;  %s4175_s11 = inlined_call_operand.vmem [shape: f32[2,1,64], index: 11, kind: input, shape index: {}]   ;;  %s4176_s12 = inlined_call_operand.vmem [shape: bf16[2,32,32], index: 12, kind: input, shape index: {}]   ;;  %s4177_s13 = inlined_call_operand.vmem [shape: f32[2,1,32], index: 13, kind: input, shape index: {}]   ;;  %s4178_s14 = inlined_call_operand.vmem [shape: f32[2,1,32], index: 14, kind: input, shape index: {}]   ;;  %s4179_s15 = inlined_call_operand.vmem [shape: f32[2,1,32], index: 15, kind: input, shape index: {}]   ;;  %s4180_s16 = inlined_call_operand.vmem [shape: bf16[2,32,64], index: 16, kind: input, shape index: {}]   ;;  %s4181_s17 = inlined_call_operand.vmem [shape: f32[2,1,64], index: 17, kind: input, shape index: {}]   ;;  %s4182_s18 = inlined_call_operand.vmem [shape: bf16[2,64,32], index: 18, kind: input, shape index: {}]   ;;  %s4183_s19 = inlined_call_operand.vmem [shape: f32[2,1,32], index: 19, kind: input, shape index: {}]   ;;  %s4184_s20 = inlined_call_operand.vmem [shape: f32[2,1,32], index: 20, kind: input, shape index: {}]   ;;  %s4185_s21 = inlined_call_operand.vmem [shape: f32[2,1,32], index: 21, kind: input, shape index: {}]   ;;  %s4186_s22 = inlined_call_operand.vmem [shape: f32[1,32], index: 22, kind: input, shape index: {}]   ;;  %s4187_s23 = inlined_call_operand.vmem [shape: f32[1,32], index: 23, kind: input, shape index: {}]   ;;  %s4188_s24 = inlined_call_operand.vmem [shape: bf16[32,128], index: 24, kind: input, shape index: {}]   ;;  %s4189_s25 = inlined_call_operand.vmem [shape: f32[1,128], index: 25, kind: input, shape index: {}]   ;;  %s4190_s26 = inlined_call_operand.vmem [shape: f32[8,8], index: 26, kind: input, shape index: {}]   ;;  %s4191_s27 = inlined_call_operand.vmem [shape: f32[2,8,128], index: 27, kind: output, shape index: {}]  }
   0x1   :  { %4200 = sst [smem:[#allocation12_spill]] %s4164_s0 }
   0x2   :  { %4201 = sst [smem:[#allocation13_spill]] %s4165_s1 }
   0x3   :  { %4202 = sst [smem:[#allocation14_spill]] %s4166_s2 }
   0x4   :  { %4203 = sst [smem:[#allocation15_spill]] %s4167_s3 }
   0x5   :  { %4204 = sst [smem:[#allocation16_spill]] %s4168_s4  ;;  %s3690_s4 = smov 0  }
   0x6   :  { %4205 = sst [smem:[#allocation17_spill]] %s4169_s5 }
   0x7   :  { %4206 = sst [smem:[#allocation18_spill]] %s4170_s6 }
   0x8   :  { %4207 = sst [smem:[#allocation19_spill]] %s4171_s7  ;;  %s3688_s7 = smov 0  }
   0x9   :  { %4208 = sst [smem:[#allocation20_spill]] %s4172_s8  ;;  %s3692_s8 = smov 0  }
   0xa   :  { %4209 = sst [smem:[#allocation21_spill]] %s4173_s9  ;;  %s3696_s9 = smov 0  }
   0xb   :  { %4210 = sst [smem:[#allocation22_spill]] %s4174_s10 }
   0xc   :  { %4211 = sst [smem:[#allocation23_spill]] %s4175_s11 }
   0xd   :  { %4212 = sst [smem:[#allocation24_spill]] %s4176_s12 }
   0xe   :  { %4213 = sst [smem:[#allocation25_spill]] %s4180_s16 }
   0xf   :  { %4214 = sst [smem:[#allocation26_spill]] %s4181_s17 }
  0x10   :  { %4215 = sst [smem:[#allocation27_spill]] %s4185_s21 }
  0x11   :  { %4216 = sst [smem:[#allocation28_spill]] %s4186_s22 }
  0x12   :  { %4217 = sst [smem:[#allocation29_spill]] %s4187_s23 }
  0x13   :  { %4218 = sst [smem:[#allocation30_spill]] %s4188_s24 }
  0x14   :  { %4219 = sst [smem:[#allocation31_spill]] %s4189_s25 }
  0x15   :  { %4220 = sst [smem:[#allocation32_spill]] %s4190_s26 }
  0x16   :  { %4221 = sst [smem:[#allocation33_spill]] %s4191_s27 }
  0x17 LB: > { %4222 = sst [smem:[#allocation3_spill]] %s3512_s7  ;;  %s46_s5 = sadd.s32 1, %s3520_s8  ;;  %s3528_s9 = sphi %s3696_s9, %s37_s9   ;;  %s3524_s30 = sphi %s3694_s30, %s4285_s30   ;;  %s3520_s8 = sphi %s3692_s8, %s4284_s8   ;;  %s3516_s4 = sphi %s3690_s4, %s4283_s4   ;;  %s3512_s7 = sphi %s3688_s7, %s4282_s7  }
  0x18   : > { %4223 = sst [smem:[#allocation4_spill]] %s3520_s8  ;;  %s49_s28 = sadd.s32 1, %s3524_s30 }
  0x19   : > { %4224 = sst [smem:[#allocation5_spill]] %s3524_s30  ;;  %p47_p0 = scmp.ge.s32.totalorder %s46_s5, 2 }
  0x1a   : > { %4225 = sst [smem:[#allocation6_spill]] %s3528_s9  ;;  %p3061_p1 = scmp.ge.s32.totalorder %s3528_s9, 1 }
  0x1b   : > { %p931_p2 = scmp.lt.s32.totalorder %s3528_s9, 5  ;;  %s4287_s5 = smov (%p47_p0, %s46_s5), 0 }
  0x1c   : > { %4226 = sst [smem:[#allocation7_spill]] %s4287_s5  ;;  %s4289_s28 = smov (!%p47_p0, %s49_s28), %s3524_s30 }
  0x1d   : > { %p932_p3 = pnand %p3061_p1, %p931_p2  ;;  %p51_p4 = scmp.ge.s32.totalorder %s4289_s28, 2 }
  0x1f   : > { %s4291_s28 = smov (%p51_p4, %s4289_s28), 0  ;;  %935 = sbr.rel (%p932_p3) target bundleno = 4963 (0x1363), region = 128 }
  0x20   : > { %4227 = sst [smem:[#allocation8_spill]] %s4291_s28 }
  0x24   : > { %p1079_p5 = scmp.lt.s32.totalorder %s3516_s4, 1  ;;  %p1087_p6 = scmp.lt.s32.totalorder %s3512_s7, 1 }
  0x25   : > { %s4228_s26 = sld [smem:[#allocation32_spill]] }
  0x26   : > { %s4293_s4 = smov (!%p1079_p5, %s3516_s4), 1  ;;  %s4229_s2 = sld [smem:[#allocation12_spill]] }
  0x27   : > { %s3727_s29 = scalar_select %p1087_p6, %s3512_s7, 1 }
  0x28   : > { %s3729_s1 = sshll.u32 %s4293_s4, 3  ;;  %s4232_s22 = sld [smem:[#allocation14_spill]] }
  0x29   : > { %s3141_s5 = sshll.u32 %s3727_s29, 4  ;;  %s4239_s6 = sld [smem:[#allocation20_spill]] }
  0x2a   : > { %s4242_s27 = sld [smem:[#allocation22_spill]]  ;;  %s3147_s23 = sshll.u32 %s3727_s29, 5 }
  0x2b   : > { %v3724_v0 = vld [vmem:[%s4228_s26] sm:$0xff]  ;;  %s4244_s12 = sld [smem:[#allocation24_spill]]  ;;  %s1157_s26 = scalar_lea.vmem %s4184_s20, %s3727_s29 }
  0x2c   : > { %s1082_s3 = scalar_lea.vmem %s4229_s2, %s3729_s1  ;;  %s4234_s2 = sld [smem:[#allocation16_spill]] }
  0x2d   : > { %s4245_s16 = sld [smem:[#allocation25_spill]] }
  0x2e   : > { %s3747_s24 = scalar_lea.vmem %s4232_s22, %s3141_s5  ;;  %s4249_s17 = sld [smem:[#allocation3_spill]] }
  0x2f   : > { %4233 = sst [smem:[#allocation9_spill]] %s3747_s24  ;;  %s3769_s11 = scalar_lea.vmem %s4239_s6, %s3141_s5 }
  0x30   : > { %4240 = sst [smem:[#allocation11_spill]] %s3769_s11  ;;  %s3778_s8 = scalar_lea.vmem %s4242_s27, %s3141_s5 }
  0x31   : > { %s3787_s21 = scalar_lea.vmem %s4244_s12, %s3141_s5  ;;  %s3814_s11 = scalar_lea.vmem %s4182_s18, %s3147_s23 }
  0x32   : > { %s3752_s7 = scalar_lea.vmem %s4234_s2, %s3141_s5 }
  0x33   : > { %4235 = sst [smem:[#allocation10_spill]] %s3752_s7  ;;  %s3804_s30 = scalar_lea.vmem %s4245_s16, %s3141_s5 }
  0x34   : > { %s1154_s7 = scalar_lea.vmem %s4183_s19, %s3727_s29  ;;  %p3079_p7 = scmp.ne.s32.totalorder %s4249_s17, 0 }
  0x36   : > { %1170 = sbr.rel (%p3079_p7) target bundleno = 61 (0x3d), region = 132 }
  0x3b   : > { %v1171_v1 = vld [vmem:[%s1082_s3] sm:$0xff]  ;;  %vm1172_vm0 = vcmask 261120  }
  0x3c   : > { %1173 = vst.msk [vmem:[#allocation2] sm:$0xff] %vm1172_vm0, %v1171_v1 }
  0x3d PF: > { %s4250_s23 = sld [smem:[#allocation9_spill]]  ;;  %v3530_v3 = vmov 0.0   ;;  %vm3531_vm1 = vmmov 0   ;;  %vm1201_vm2 = vcmask 261120   ;;  %s3532_s4 = smov 120   ;;  %vm1249_vm3 = vcmask 64512  }
  0x3e   : > { %3206 = vmatprep.subr.bf16.mxu1 %v3530_v3  ;;  %3220 = vmatprep.subr.bf16.mxu0 %v3530_v3  ;;  %s4251_s10 = sld [smem:[#allocation15_spill]]  ;;  %s3533_s24 = smov 96   ;;  %vm1313_vm4 = vcmask 1043456   ;;  %vm1700_vm5 = vcmask 130048   ;;  %vm1702_vm6 = vcmask 195584   ;;  %vm2595_vm7 = vcmask 523264  }
  0x3f   : > { %3210 = vmatprep.mubr.msk.bf16.mxu1 %vm3531_vm1, %v3530_v3  ;;  %3222 = vmatprep.mubr.msk.bf16.mxu0 %vm3531_vm1, %v3530_v3  ;;  %s3534_s6 = smov 80   ;;  %s3535_s2 = smov 88  }
  0x40   : > { %s3536_s0 = smov 72   ;;  %s3537_s28 = smov 112  }
  0x41   : > { %s3538_s5 = smov 104   ;;  %s3539_s9 = smov 56  }
  0x42   : > { %s3540_s22 = smov 64   ;;  %s3541_s25 = smov 40  }
  0x43   : > { %v3428_v2 = vld [vmem:[%s4250_s23 + $0x8] sm:$0xff]   ;;  %v3429_v4 = vld [vmem:[%s4250_s23] sm:$0xff]   ;;  %s3542_s23 = smov 48   ;;  %s4253_s17 = sld [smem:[#allocation10_spill]] }
  0x44   : > { %3207 = vmatpush3.bf16.msra.mxu1 %v3428_v2  ;;  %v3839_v5 = vld [vmem:[#allocation2] sm:$0xff]  ;;  %s4252_s27 = scalar_lea.vmem %s4251_s10, %s3727_s29  ;;  %s3543_s3 = smov 8  }
  0x45   : > { %3208 = vmatprep.subr.bf16.mxu1 %v3530_v3  ;;  %v1177_v6 = vpack.c.bf16 %v3839_v5, %v3839_v5  ;;  %v3080_v7 = vld [vmem:[%s4252_s27] ss:$0 sm:$0xff]  ;;  %s3544_s10 = smov 16   ;;  %s3545_s27 = smov 24  }
  0x46   : > { %s4272_s16 = sld [smem:[#allocation27_spill]] }
  0x48   : > { %3209 = vmatpush3.bf16.msra.mxu1 %v3429_v4 }
  0x49   : > { %3214 = vmatprep.subr.bf16.mxu1 %v3530_v3 }
  0x4b   : > { %3211 = vmatmul.mubr.msk.bf16.vlgmr.msra.gmra.mxu1 %vm1201_vm2, %v1177_v6 }
  0x4c   : > { %3216 = vmatprep.mubr.msk.bf16.mxu1 %vm3531_vm1, %v3530_v3 }
 0x10b   : > { %v1239_v8 = vpop.f32.mrf.mxu1 }
 0x10c   : > { %v1240_v9 = vadd.f32 %v3080_v7, %v1239_v8 }
 0x10d   : > { %v3212_v10 = vpop.f32.mrf.mxu1 }
 0x10e   : > { %v3855_v11 = vpack.c.bf16 %v1240_v9, %v1240_v9 }
 0x10f   : > { %v1242_v12 = vpop.f32.mrf.mxu1 }
 0x110   : > { %1357 = vrot.lane.b32.xlu1 %v3855_v11, %s3532_s4  ;;  %1247 = vrot.lane.b32.xlu0 %v3855_v11, %s3533_s24 }
 0x111   : > { %v3213_v13 = vpop.f32.mrf.mxu1 }
 0x114   : > { %1469 = vrot.lane.b32.xlu1 %v3855_v11, %s3534_s6  ;;  %1359 = vrot.lane.b32.xlu0 %v3855_v11, %s3535_s2 }
 0x118   : > { %1579 = vrot.lane.b32.xlu1 %v3855_v11, %s3536_s0  ;;  %1467 = vrot.lane.b32.xlu0 %v3855_v11, %s3537_s28 }
 0x11c   : > { %1577 = vrot.lane.b32.xlu0 %v3855_v11, %s3538_s5 }
 0x182   : > { %v1248_v14 = vpop.permute.xlu0 %1247  ;;  %v1358_v17 = vpop.permute.xlu1 %1357 }
 0x183   : > { %v1254_v15 = vsel %vm1249_vm3, %v1248_v14, 0 }
 0x184   : > { %3215 = vmatpush3.bf16.xpose.msra.mxu1 %v1254_v15 }
 0x185   : > { %3226 = vmatprep.subr.bf16.mxu1 %v3530_v3 }
 0x186   : > { %v1360_v16 = vpop.permute.xlu0 %1359  ;;  %v1470_v19 = vpop.permute.xlu1 %1469 }
 0x187   : > { %v1365_v18 = vsel %vm1249_vm3, %v1360_v16, 0  ;;  %v1475_v20 = vsel %vm1249_vm3, %v1470_v19, 0 }
 0x18a   : > { %v1580_v21 = vpop.permute.xlu1 %1579  ;;  %v1468_v22 = vpop.permute.xlu0 %1467 }
 0x18b   : > { %3217 = vmatmul.mubr.msk.bf16.vlgmr.msra.gmra.mxu1 %vm1249_vm3, %v3855_v11  ;;  %v1585_v23 = vsel %vm1249_vm3, %v1580_v21, 0 }
 0x18c   : > { %3227 = vmatpush3.bf16.xpose.msra.mxu1 %v1365_v18  ;;  %3228 = vmatprep.mubr.msk.bf16.mxu1 %vm3531_vm1, %v3530_v3 }
 0x18d   : > { %3238 = vmatprep.subr.bf16.mxu1 %v3530_v3 }
 0x18e   : > { %v1578_v24 = vpop.permute.xlu0 %1577 }
 0x193   : > { %3229 = vmatmul.mubr.msk.bf16.vlgmr.msra.gmra.mxu1 %vm1249_vm3, %v1358_v17 }
 0x194   : > { %3239 = vmatpush3.bf16.xpose.msra.mxu1 %v1475_v20  ;;  %3240 = vmatprep.mubr.msk.bf16.mxu1 %vm3531_vm1, %v3530_v3 }
 0x195   : > { %3250 = vmatprep.subr.bf16.mxu1 %v3530_v3 }
 0x19b   : > { %3241 = vmatmul.mubr.msk.bf16.vlgmr.msra.gmra.mxu1 %vm1249_vm3, %v1468_v22 }
 0x19c   : > { %3251 = vmatpush3.bf16.xpose.msra.mxu1 %v1585_v23  ;;  %3252 = vmatprep.mubr.msk.bf16.mxu1 %vm3531_vm1, %v3530_v3 }
 0x19d   : > { %3262 = vmatprep.subr.bf16.mxu1 %v3530_v3 }
 0x1a3   : > { %3253 = vmatmul.mubr.msk.bf16.vlgmr.msra.gmra.mxu1 %vm1249_vm3, %v1578_v24 }
 0x1a4   : > { %3266 = vmatprep.mubr.msk.bf16.mxu1 %vm3531_vm1, %v3530_v3 }
 0x24b   : > { %v1290_v25 = vpop.f32.mrf.mxu1 }
 0x24c   : > { %v1291_v26 = vadd.f32 %v1290_v25, %v3724_v0 }
 0x24d   : > { %v3218_v27 = vpop.f32.mrf.mxu1 }
 0x24e   : > { %v1296_v28 = vsel %vm1249_vm3, %v1291_v26, -inf }
 0x24f   : > { %1297 = vmax.xlane.f32.xlu1 %v1296_v28  ;;  %v1293_v29 = vpop.f32.mrf.mxu1 }
 0x251   : > { %v3219_v30 = vpop.f32.mrf.mxu1 }
 0x253   : > { %v1401_v31 = vpop.f32.mrf.mxu1 }
 0x254   : > { %v1402_v32 = vadd.f32 %v1401_v31, %v3724_v0 }
 0x255   : > { %v3230_v33 = vpop.f32.mrf.mxu1 }
 0x256   : > { %v1407_v34 = vsel %vm1249_vm3, %v1402_v32, -inf }
 0x257   : > { %1408 = vmax.xlane.f32.xlu0 %v1407_v34  ;;  %v1404_v35 = vpop.f32.mrf.mxu1 }
 0x259   : > { %v3231_v36 = vpop.f32.mrf.mxu1 }
 0x25b   : > { %v1511_v37 = vpop.f32.mrf.mxu1 }
 0x25c   : > { %v1512_v38 = vadd.f32 %v1511_v37, %v3724_v0 }
 0x25d   : > { %v3242_v39 = vpop.f32.mrf.mxu1 }
 0x25e   : > { %v1517_v40 = vsel %vm1249_vm3, %v1512_v38, -inf  ;;  %v3430_v39 = vld [vmem:[%s4253_s17 + $0x8] sm:$0xff]  }
 0x25f   : > { %1518 = vmax.xlane.f32.xlu0 %v1517_v40  ;;  %v1514_v41 = vpop.f32.mrf.mxu1  ;;  %3263 = vmatpush3.bf16.msra.mxu1 %v3430_v39  ;;  %v3431_v40 = vld [vmem:[%s4253_s17] sm:$0xff]   ;;  %s4256_s17 = sld [smem:[#allocation11_spill]] }
 0x260   : > { %3264 = vmatprep.subr.bf16.mxu1 %v3530_v3 }
 0x261   : > { %v3243_v42 = vpop.f32.mrf.mxu1 }
 0x263   : > { %v1621_v43 = vpop.f32.mrf.mxu1  ;;  %3265 = vmatpush3.bf16.msra.mxu1 %v3431_v40 }
 0x264   : > { %v1622_v44 = vadd.f32 %v1621_v43, %v3724_v0  ;;  %3278 = vmatprep.subr.bf16.mxu1 %v3530_v3 }
 0x265   : > { %v3254_v45 = vpop.f32.mrf.mxu1 }
 0x266   : > { %v1627_v46 = vsel %vm1249_vm3, %v1622_v44, -inf }
 0x267   : > { %1628 = vmax.xlane.f32.xlu1 %v1627_v46  ;;  %v1624_v47 = vpop.f32.mrf.mxu1 }
 0x269   : > { %v3255_v48 = vpop.f32.mrf.mxu1 }
 0x2d8   : > { %v1298_v49 = vpop.xlane.xlu1 %1297 }
 0x2d9   : > { %v1299_v50 = vsub.f32 %v1291_v26, %v1298_v49 }
 0x2db   : > { %v1300_v51 = vmul.f32 1.442695, %v1299_v50 }
 0x2dd   : > { %3444 = vpow2.f32 %v1300_v51 }
 0x2e0   : > { %v1409_v52 = vpop.xlane.xlu0 %1408 }
 0x2e1   : > { %v1410_v53 = vsub.f32 %v1402_v32, %v1409_v52 }
 0x2e3   : > { %v1411_v54 = vmul.f32 1.442695, %v1410_v53 }
 0x2e5   : > { %3446 = vpow2.f32 %v1411_v54 }
 0x2e8   : > { %v1519_v55 = vpop.xlane.xlu0 %1518 }
 0x2e9   : > { %v1520_v56 = vsub.f32 %v1512_v38, %v1519_v55 }
 0x2ea   : > { %v3445_v57 = vpop.eup %3444 }
 0x2eb   : > { %v1521_v58 = vmul.f32 1.442695, %v1520_v56  ;;  %v1302_v59 = vsel %vm1249_vm3, %v3445_v57, 0.0 }
 0x2ec   : > { %1303 = vadd.xlane.f32.xlu0 %v1302_v59 }
 0x2ed   : > { %3448 = vpow2.f32 %v1521_v58 }
 0x2f0   : > { %v1629_v0 = vpop.xlane.xlu1 %1628 }
 0x2f1   : > { %v1630_v1 = vsub.f32 %v1622_v44, %v1629_v0 }
 0x2f2   : > { %v3447_v60 = vpop.eup %3446 }
 0x2f3   : > { %v1413_v61 = vsel %vm1249_vm3, %v3447_v60, 0.0  ;;  %v1631_v2 = vmul.f32 1.442695, %v1630_v1 }
 0x2f4   : > { %1414 = vadd.xlane.f32.xlu1 %v1413_v61 }
 0x2f5   : > { %3450 = vpow2.f32 %v1631_v2 }
 0x2fa   : > { %v3449_v62 = vpop.eup %3448 }
 0x2fb   : > { %v1523_v63 = vsel %vm1249_vm3, %v3449_v62, 0.0 }
 0x2fc   : > { %1524 = vadd.xlane.f32.xlu0 %v1523_v63 }
 0x302   : > { %v3451_v4 = vpop.eup %3450 }
 0x303   : > { %v1633_v6 = vsel %vm1249_vm3, %v3451_v4, 0.0 }
 0x305   : > { %1419 = vrot.lane.b32.xlu1 %v3855_v11, %s3539_s9 }
 0x312   : > { %1308 = vrot.lane.b32.xlu0 %v3855_v11, %s3540_s22  ;;  %s4259_s22 = sld [smem:[#allocation18_spill]] }
 0x316   : > { %1639 = vrot.lane.b32.xlu0 %v3855_v11, %s3541_s25  ;;  %s4254_s25 = sld [smem:[#allocation17_spill]] }
 0x329   : > { %1634 = vadd.xlane.f32.xlu1 %v1633_v6 }
 0x33a   : > { %1529 = vrot.lane.b32.xlu1 %v3855_v11, %s3542_s23  ;;  %s4255_s23 = scalar_lea.vmem %s4254_s25, %s3727_s29  ;;  %s4257_s25 = sld [smem:[#allocation13_spill]] }
 0x33b   : > { %v3092_v56 = vld [vmem:[%s4255_s23] ss:$0 sm:$0xff] }
 0x340   : > { %s4258_s23 = scalar_lea.vmem %s4257_s25, %s3729_s1  ;;  %s4260_s25 = scalar_lea.vmem %s4259_s22, %s3727_s29 }
 0x341   : > { %s4263_s22 = sld [smem:[#allocation23_spill]] }
 0x375   : > { %v1304_v7 = vpop.xlane.xlu0 %1303 }
 0x376   : > { %3452 = vrcp.f32 %v1304_v7  ;;  %v3432_v7 = vld [vmem:[%s3778_s8 + $0x8] sm:$0xff]  }
 0x37d   : > { %v1415_v8 = vpop.xlane.xlu1 %1414 }
 0x37e   : > { %3454 = vrcp.f32 %v1415_v8  ;;  %v1175_v8 = vld [vmem:[%s4258_s23] sm:$0xff]  ;;  %s4265_s23 = sld [smem:[#allocation21_spill]] }
 0x381   : > { %v1420_v15 = vpop.permute.xlu1 %1419 }
 0x382   : > { %v1425_v18 = vsel %vm1313_vm4, %v1420_v15, 0 }
 0x383   : > { %v3453_v9 = vpop.eup %3452 }
 0x384   : > { %v1306_v12 = vmul.f32 %v3453_v9, %v3445_v57  ;;  %v1176_v9 = vpack.c.bf16 %v1175_v8, %v1175_v8 }
 0x385   : > { %v1525_v10 = vpop.xlane.xlu0 %1524 }
 0x386   : > { %v1307_v16 = vpack.c.bf16 %v1306_v12, %v1306_v12  ;;  %3456 = vrcp.f32 %v1525_v10  ;;  %v3434_v10 = vld [vmem:[%s4256_s17 + $0x8] sm:$0xff]   ;;  %v3435_v12 = vld [vmem:[%s4256_s17] sm:$0xff]   ;;  %s4261_s17 = sld [smem:[#allocation19_spill]] }
 0x389   : > { %v1309_v13 = vpop.permute.xlu0 %1308 }
 0x38a   : > { %v1315_v14 = vsel %vm1313_vm4, %v1309_v13, 0 }
 0x38b   : > { %3221 = vmatpush3.bf16.msra.mxu0 %v1315_v14  ;;  %v3455_v17 = vpop.eup %3454 }
 0x38c   : > { %3232 = vmatprep.subr.bf16.mxu0 %v3530_v3  ;;  %v1417_v11 = vmul.f32 %v3455_v17, %v3447_v60  ;;  %v3096_v17 = vld [vmem:[%s4260_s25] ss:$0 sm:$0xff]  ;;  %s4262_s12 = scalar_lea.vmem %s4261_s17, %s3727_s29  ;;  %s4264_s25 = scalar_lea.vmem %s4263_s22, %s3727_s29 }
 0x38d   : > { %v1640_v25 = vpop.permute.xlu0 %1639  ;;  %s4266_s17 = scalar_lea.vmem %s4265_s23, %s3727_s29  ;;  %s4273_s23 = scalar_lea.vmem %s4272_s16, %s3727_s29 }
 0x38e   : > { %3223 = vmatmul.mubr.msk.bf16.vlgmr.msra.gmra.mxu0 %vm1249_vm3, %v1307_v16  ;;  %v1418_v19 = vpack.c.bf16 %v1417_v11, %v1417_v11  ;;  %v1645_v27 = vsel %vm1313_vm4, %v1640_v25, 0  ;;  %v3097_v11 = vld [vmem:[%s4262_s12] ss:$0 sm:$0xff] }
 0x38f   : > { %3233 = vmatpush3.bf16.msra.mxu0 %v1425_v18  ;;  %3234 = vmatprep.mubr.msk.bf16.mxu0 %vm3531_vm1, %v3530_v3 }
 0x390   : > { %3244 = vmatprep.subr.bf16.mxu0 %v3530_v3 }
 0x393   : > { %v3457_v20 = vpop.eup %3456 }
 0x394   : > { %v1527_v22 = vmul.f32 %v3457_v20, %v3449_v62 }
 0x396   : > { %3235 = vmatmul.mubr.msk.bf16.vlgmr.msra.gmra.mxu0 %vm1249_vm3, %v1418_v19  ;;  %v1528_v26 = vpack.c.bf16 %v1527_v22, %v1527_v22  ;;  %v3102_v22 = vld [vmem:[%s4264_s25] ss:$0 sm:$0xff] }
 0x397   : > { %3246 = vmatprep.mubr.msk.bf16.mxu0 %vm3531_vm1, %v3530_v3 }
 0x3b2   : > { %v1635_v21 = vpop.xlane.xlu1 %1634 }
 0x3b3   : > { %3458 = vrcp.f32 %v1635_v21 }
 0x3b6   : > { %v1530_v23 = vpop.permute.xlu1 %1529 }
 0x3b7   : > { %v1535_v24 = vsel %vm1313_vm4, %v1530_v23, 0 }
 0x3b8   : > { %3245 = vmatpush3.bf16.msra.mxu0 %v1535_v24 }
 0x3b9   : > { %3256 = vmatprep.subr.bf16.mxu0 %v3530_v3 }
 0x3bb   : > { %3247 = vmatmul.mubr.msk.bf16.vlgmr.msra.gmra.mxu0 %vm1249_vm3, %v1528_v26 }
 0x3bc   : > { %3257 = vmatpush3.bf16.msra.mxu0 %v1645_v27  ;;  %3258 = vmatprep.mubr.msk.bf16.mxu0 %vm3531_vm1, %v3530_v3 }
 0x3bd   : > { %3270 = vmatprep.subr.bf16.mxu0 %v3530_v3 }
 0x3c0   : > { %v3459_v28 = vpop.eup %3458 }
 0x3c1   : > { %v1637_v29 = vmul.f32 %v3459_v28, %v3451_v4 }
 0x3c3   : > { %v1638_v30 = vpack.c.bf16 %v1637_v29, %v1637_v29 }
 0x3c5   : > { %3259 = vmatmul.mubr.msk.bf16.vlgmr.msra.gmra.mxu0 %vm1249_vm3, %v1638_v30  ;;  %v3098_v30 = vld [vmem:[%s4266_s17] ss:$0 sm:$0xff]  ;;  %s4274_s17 = sld [smem:[#allocation3_spill]] }
 0x3c6   : > { %3274 = vmatprep.mubr.msk.bf16.mxu0 %vm3531_vm1, %v3530_v3  ;;  %3271 = vmatpush3.bf16.msra.mxu0 %v3434_v10 }
 0x3c7   : > { %3272 = vmatprep.subr.bf16.mxu0 %v3530_v3 }
 0x3ca   : > { %3273 = vmatpush3.bf16.msra.mxu0 %v3435_v12 }
 0x3cb   : > { %3286 = vmatprep.subr.bf16.mxu0 %v3530_v3  ;;  %p3132_p8 = scmp.ne.s32.totalorder %s4274_s17, 1 }
 0x3cc   : > { %s4279_s22 = sld [smem:[#allocation33_spill]] (!%p3132_p8) }
 0x44e   : > { %v1351_v31 = vpop.f32.mrf.mxu0 }
 0x450   : > { %v3224_v32 = vpop.f32.mrf.mxu0 }
 0x452   : > { %v1354_v33 = vpop.f32.mrf.mxu0 }
 0x454   : > { %v3225_v34 = vpop.f32.mrf.mxu0 }
 0x456   : > { %v1461_v35 = vpop.f32.mrf.mxu0 }
 0x457   : > { %1688 = vrot.lane.b32.xlu1 %v1461_v35, %s3543_s3 }
 0x458   : > { %v3236_v36 = vpop.f32.mrf.mxu0 }
 0x45a   : > { %v1464_v37 = vpop.f32.mrf.mxu0 }
 0x45c   : > { %v3237_v38 = vpop.f32.mrf.mxu0 }
 0x47b   : > { %v1571_v41 = vpop.f32.mrf.mxu0 }
 0x47c   : > { %1692 = vrot.lane.b32.xlu0 %v1571_v41, %s3544_s10 }
 0x47d   : > { %v3248_v42 = vpop.f32.mrf.mxu0 }
 0x47f   : > { %v1574_v43 = vpop.f32.mrf.mxu0 }
 0x481   : > { %v3249_v44 = vpop.f32.mrf.mxu0 }
 0x485   : > { %v1681_v45 = vpop.f32.mrf.mxu0 }
 0x486   : > { %1696 = vrot.lane.b32.xlu1 %v1681_v45, %s3545_s27 }
 0x487   : > { %v3260_v46 = vpop.f32.mrf.mxu0 }
 0x489   : > { %v1684_v47 = vpop.f32.mrf.mxu0 }
 0x48b   : > { %v3261_v48 = vpop.f32.mrf.mxu0 }
 0x4c9   : > { %v1689_v49 = vpop.permute.xlu1 %1688 }
 0x4ca   : > { %v1699_v51 = vsel %vm1249_vm3, %v1351_v31, %v1689_v49 }
 0x4ee   : > { %v1693_v50 = vpop.permute.xlu0 %1692 }
 0x4ef   : > { %v1701_v52 = vsel %vm1700_vm5, %v1699_v51, %v1693_v50 }
 0x4f8   : > { %v1697_v53 = vpop.permute.xlu1 %1696 }
 0x4f9   : > { %v1703_v54 = vsel %vm1702_vm6, %v1701_v52, %v1697_v53 }
 0x4fa   : > { %v1704_v55 = vpack.c.bf16 %v1703_v54, %v1703_v54 }
 0x4fc   : > { %3267 = vmatmul.mubr.msk.bf16.vlgmr.msra.gmra.mxu1 %vm1201_vm2, %v1704_v55 }
 0x4fd   : > { %3282 = vmatprep.mubr.msk.bf16.mxu1 %vm3531_vm1, %v3530_v3  ;;  %3279 = vmatpush3.bf16.msra.mxu1 %v3432_v7 }
 0x4fe   : > { %3280 = vmatprep.subr.bf16.mxu1 %v3530_v3 }
 0x5bc   : > { %v1765_v57 = vpop.f32.mrf.mxu1 }
 0x5bd   : > { %v1766_v58 = vadd.f32 %v3092_v56, %v1765_v57 }
 0x5be   : > { %v3268_v59 = vpop.f32.mrf.mxu1 }
 0x5bf   : > { %v1771_v60 = vadd.f32 %v1766_v58, %v3839_v5  ;;  %v3433_v5 = vld [vmem:[%s3778_s8] sm:$0xff]  }
 0x5c0   : > { %v1768_v61 = vpop.f32.mrf.mxu1  ;;  %3281 = vmatpush3.bf16.msra.mxu1 %v3433_v5 }
 0x5c1   : > { %v1774_v62 = vsel %vm1201_vm2, %v1771_v60, 0.0  ;;  %3292 = vmatprep.subr.bf16.mxu1 %v3530_v3 }
 0x5c2   : > { %1775 = vadd.xlane.f32.xlu0 %v1774_v62  ;;  %v3269_v63 = vpop.f32.mrf.mxu1 }
 0x5c3   : > { %3283 = vmatmul.mubr.msk.bf16.vlgmr.msra.gmra.mxu1 %vm1201_vm2, %v1176_v9 }
 0x5c4   : > { %3294 = vmatprep.mubr.msk.bf16.mxu1 %vm3531_vm1, %v3530_v3 }
 0x64b   : > { %v1776_v0 = vpop.xlane.xlu0 %1775 }
 0x64c   : > { %v1778_v1 = vmul.f32 0.03125, %v1776_v0 }
 0x64e   : > { %v1779_v2 = vsub.f32 %v1771_v60, %v1778_v1 }
 0x650   : > { %v1780_v4 = vmul.f32 %v1779_v2, %v1779_v2 }
 0x652   : > { %v1781_v6 = vsel %vm1201_vm2, %v1780_v4, 0.0 }
 0x653   : > { %1782 = vadd.xlane.f32.xlu1 %v1781_v6 }
 0x683   : > { %v1929_v23 = vpop.f32.mrf.mxu1 }
 0x684   : > { %v1930_v24 = vadd.f32 %v3102_v22, %v1929_v23 }
 0x685   : > { %v3284_v25 = vpop.f32.mrf.mxu1 }
 0x686   : > { %v3987_v26 = vpack.c.bf16 %v1930_v24, %v1930_v24 }
 0x687   : > { %v1932_v27 = vpop.f32.mrf.mxu1 }
 0x688   : > { %2047 = vrot.lane.b32.xlu0 %v3987_v26, %s3532_s4  ;;  %v1941_v28 = vsel %vm1249_vm3, %v3987_v26, 0 }
 0x689   : > { %v3285_v29 = vpop.f32.mrf.mxu1 }
 0x68c   : > { %2157 = vrot.lane.b32.xlu0 %v3987_v26, %s3537_s28 }
 0x690   : > { %2267 = vrot.lane.b32.xlu0 %v3987_v26, %s3538_s5 }
 0x6dc   : > { %v1783_v13 = vpop.xlane.xlu1 %1782 }
 0x6dd   : > { %v1784_v14 = vmul.f32 0.03125, %v1783_v13 }
 0x6df   : > { %v1785_v15 = vadd.f32 1e-05, %v1784_v14 }
 0x6e1   : > { %3460 = vrsqrt.f32 %v1785_v15 }
 0x6ee   : > { %v3461_v16 = vpop.eup %3460 }
 0x6ef   : > { %v1787_v18 = vmul.f32 %v3461_v16, %v1779_v2 }
 0x6f1   : > { %v1794_v19 = vmul.f32 %v3096_v17, %v1787_v18 }
 0x6f3   : > { %v3975_v20 = vadd.f32 %v3097_v11, %v1794_v19 }
 0x6f5   : > { %v1802_v21 = vpack.c.bf16 %v3975_v20, %v3975_v20 }
 0x6f7   : > { %3275 = vmatmul.mubr.msk.bf16.vlgmr.msra.gmra.mxu0 %vm1201_vm2, %v1802_v21 }
 0x6f8   : > { %3288 = vmatprep.mubr.msk.bf16.mxu0 %vm3531_vm1, %v3530_v3  ;;  %3287 = vmatpush3.bf16.xpose.msra.mxu0 %v1941_v28 }
 0x6f9   : > { %3298 = vmatprep.subr.bf16.mxu0 %v3530_v3 }
 0x6fa   : > { %v2048_v34 = vpop.permute.xlu0 %2047 }
 0x6fb   : > { %v2053_v36 = vsel %vm1249_vm3, %v2048_v34, 0 }
 0x6fe   : > { %v2158_v39 = vpop.permute.xlu0 %2157 }
 0x6ff   : > { %v2163_v41 = vsel %vm1249_vm3, %v2158_v39, 0 }
 0x702   : > { %v2268_v42 = vpop.permute.xlu0 %2267 }
 0x703   : > { %v2273_v44 = vsel %vm1249_vm3, %v2268_v42, 0 }
 0x7b7   : > { %v1863_v31 = vpop.f32.mrf.mxu0 }
 0x7b8   : > { %v1864_v32 = vadd.f32 %v3098_v30, %v1863_v31 }
 0x7b9   : > { %v3276_v33 = vpop.f32.mrf.mxu0 }
 0x7ba   : > { %v1935_v35 = vpack.c.bf16 %v1864_v32, %v1864_v32 }
 0x7bb   : > { %v1866_v37 = vpop.f32.mrf.mxu0 }
 0x7bc   : > { %2045 = vrot.lane.b32.xlu1 %v1935_v35, %s3532_s4  ;;  %3289 = vmatmul.mubr.msk.bf16.vlgmr.msra.gmra.mxu0 %vm1249_vm3, %v1935_v35 }
 0x7bd   : > { %v3277_v38 = vpop.f32.mrf.mxu0  ;;  %3299 = vmatpush3.bf16.xpose.msra.mxu0 %v2053_v36  ;;  %3300 = vmatprep.mubr.msk.bf16.mxu0 %vm3531_vm1, %v3530_v3 }
 0x7be   : > { %3310 = vmatprep.subr.bf16.mxu0 %v3530_v3 }
 0x7c0   : > { %2155 = vrot.lane.b32.xlu1 %v1935_v35, %s3537_s28 }
 0x7c4   : > { %2265 = vrot.lane.b32.xlu1 %v1935_v35, %s3538_s5  ;;  %s4269_s5 = scalar_lea.vmem %s4179_s15, %s3727_s29 }
 0x82e   : > { %v2046_v40 = vpop.permute.xlu1 %2045 }
 0x82f   : > { %3301 = vmatmul.mubr.msk.bf16.vlgmr.msra.gmra.mxu0 %vm1249_vm3, %v2046_v40 }
 0x830   : > { %3311 = vmatpush3.bf16.xpose.msra.mxu0 %v2163_v41  ;;  %3312 = vmatprep.mubr.msk.bf16.mxu0 %vm3531_vm1, %v3530_v3 }
 0x831   : > { %3322 = vmatprep.subr.bf16.mxu0 %v3530_v3 }
 0x832   : > { %v2156_v43 = vpop.permute.xlu1 %2155 }
 0x836   : > { %v2266_v45 = vpop.permute.xlu1 %2265 }
 0x837   : > { %3313 = vmatmul.mubr.msk.bf16.vlgmr.msra.gmra.mxu0 %vm1249_vm3, %v2156_v43 }
 0x838   : > { %3323 = vmatpush3.bf16.xpose.msra.mxu0 %v2273_v44  ;;  %3324 = vmatprep.mubr.msk.bf16.mxu0 %vm3531_vm1, %v3530_v3 }
 0x839   : > { %3334 = vmatprep.subr.bf16.mxu0 %v3530_v3 }
 0x83f   : > { %3325 = vmatmul.mubr.msk.bf16.vlgmr.msra.gmra.mxu0 %vm1249_vm3, %v2266_v45 }
 0x840   : > { %3338 = vmatprep.mubr.msk.bf16.mxu0 %vm3531_vm1, %v3530_v3 }
 0x87c   : > { %v1977_v46 = vpop.f32.mrf.mxu0 }
 0x87d   : > { %v1983_v47 = vsel %vm1249_vm3, %v1977_v46, -inf }
 0x87e   : > { %1984 = vmax.xlane.f32.xlu0 %v1983_v47  ;;  %v3290_v48 = vpop.f32.mrf.mxu0 }
 0x880   : > { %v1980_v49 = vpop.f32.mrf.mxu0 }
 0x882   : > { %v3291_v50 = vpop.f32.mrf.mxu0 }
 0x8ef   : > { %v2089_v51 = vpop.f32.mrf.mxu0 }
 0x8f0   : > { %v2095_v52 = vsel %vm1249_vm3, %v2089_v51, -inf }
 0x8f1   : > { %2096 = vmax.xlane.f32.xlu1 %v2095_v52  ;;  %v3302_v53 = vpop.f32.mrf.mxu0  ;;  %v3436_v52 = vld [vmem:[%s3787_s21 + $0x8] sm:$0xff]  }
 0x8f2   : > { %3335 = vmatpush3.bf16.msra.mxu0 %v3436_v52 }
 0x8f3   : > { %v2092_v54 = vpop.f32.mrf.mxu0  ;;  %3336 = vmatprep.subr.bf16.mxu0 %v3530_v3 }
 0x8f5   : > { %v3303_v55 = vpop.f32.mrf.mxu0 }
 0x8f6   : > { %v3437_v55 = vld [vmem:[%s3787_s21] sm:$0xff]   ;;  %s4275_s21 = sld [smem:[#allocation30_spill]] (!%p3132_p8) }
 0x8f7   : > { %v2199_v56 = vpop.f32.mrf.mxu0  ;;  %3337 = vmatpush3.bf16.msra.mxu0 %v3437_v55 }
 0x8f8   : > { %v2205_v57 = vsel %vm1249_vm3, %v2199_v56, -inf  ;;  %3350 = vmatprep.subr.bf16.mxu0 %v3530_v3 }
 0x8f9   : > { %2206 = vmax.xlane.f32.xlu0 %v2205_v57  ;;  %v3314_v58 = vpop.f32.mrf.mxu0 }
 0x8fb   : > { %v2202_v59 = vpop.f32.mrf.mxu0 }
 0x8fd   : > { %v3315_v60 = vpop.f32.mrf.mxu0 }
 0x8ff   : > { %v2309_v61 = vpop.f32.mrf.mxu0 }
 0x900   : > { %v2315_v62 = vsel %vm1249_vm3, %v2309_v61, -inf }
 0x901   : > { %2316 = vmax.xlane.f32.xlu0 %v2315_v62  ;;  %v3326_v63 = vpop.f32.mrf.mxu0 }
 0x903   : > { %v2312_v0 = vpop.f32.mrf.mxu0 }
 0x905   : > { %v3327_v1 = vpop.f32.mrf.mxu0 }
 0x907   : > { %v1985_v2 = vpop.xlane.xlu0 %1984 }
 0x908   : > { %v1986_v4 = vsub.f32 %v1977_v46, %v1985_v2 }
 0x90a   : > { %v1987_v6 = vmul.f32 1.442695, %v1986_v4 }
 0x90c   : > { %3462 = vpow2.f32 %v1987_v6 }
 0x919   : > { %v3463_v7 = vpop.eup %3462 }
 0x91a   : > { %v1989_v5 = vsel %vm1249_vm3, %v3463_v7, 0.0 }
 0x91b   : > { %1990 = vadd.xlane.f32.xlu1 %v1989_v5 }
 0x92c   : > { %1996 = vrot.lane.b32.xlu1 %v3987_v26, %s3533_s24  ;;  %s4267_s24 = scalar_lea.vmem %s4177_s13, %s3727_s29 }
 0x97a   : > { %v2097_v8 = vpop.xlane.xlu1 %2096 }
 0x97b   : > { %v2098_v9 = vsub.f32 %v2089_v51, %v2097_v8 }
 0x97d   : > { %v2099_v10 = vmul.f32 1.442695, %v2098_v9 }
 0x97f   : > { %3464 = vpow2.f32 %v2099_v10  ;;  %v3114_v10 = vld [vmem:[%s4267_s24] ss:$0 sm:$0xff] }
 0x982   : > { %v2207_v12 = vpop.xlane.xlu0 %2206 }
 0x983   : > { %v2208_v13 = vsub.f32 %v2199_v56, %v2207_v12 }
 0x985   : > { %v2209_v14 = vmul.f32 1.442695, %v2208_v13 }
 0x987   : > { %3466 = vpow2.f32 %v2209_v14 }
 0x98a   : > { %v2317_v15 = vpop.xlane.xlu0 %2316 }
 0x98b   : > { %v2318_v16 = vsub.f32 %v2309_v61, %v2317_v15 }
 0x98c   : > { %v3465_v17 = vpop.eup %3464 }
 0x98d   : > { %v2319_v18 = vmul.f32 1.442695, %v2318_v16  ;;  %v2101_v11 = vsel %vm1249_vm3, %v3465_v17, 0.0 }
 0x98e   : > { %2102 = vadd.xlane.f32.xlu0 %v2101_v11 }
 0x98f   : > { %3468 = vpow2.f32 %v2319_v18 }
 0x994   : > { %v3467_v19 = vpop.eup %3466 }
 0x995   : > { %v2211_v21 = vsel %vm1249_vm3, %v3467_v19, 0.0 }
 0x996   : > { %2212 = vadd.xlane.f32.xlu1 %v2211_v21 }
 0x99c   : > { %v3469_v22 = vpop.eup %3468 }
 0x99d   : > { %v2321_v23 = vsel %vm1249_vm3, %v3469_v22, 0.0 }
 0x99e   : > { %2322 = vadd.xlane.f32.xlu0 %v2321_v23 }
 0x9a4   : > { %v1991_v24 = vpop.xlane.xlu1 %1990 }
 0x9a5   : > { %3470 = vrcp.f32 %v1991_v24  ;;  %v3438_v24 = vld [vmem:[%s3804_s30 + $0x8] sm:$0xff]  }
 0x9a7   : > { %2217 = vrot.lane.b32.xlu1 %v3987_v26, %s3534_s6 }
 0x9a8   : > { %v1997_v25 = vpop.permute.xlu1 %1996 }
 0x9a9   : > { %v2002_v27 = vsel %vm1313_vm4, %v1997_v25, 0  ;;  %v3439_v25 = vld [vmem:[%s3804_s30] sm:$0xff]  }
 0x9aa   : > { %3293 = vmatpush3.bf16.msra.mxu1 %v2002_v27  ;;  %v3441_v27 = vld [vmem:[%s3814_s11 + $0x10] sm:$0xff]  }
 0x9ab   : > { %2327 = vrot.lane.b32.xlu1 %v3987_v26, %s3536_s0  ;;  %3304 = vmatprep.subr.bf16.mxu1 %v3530_v3 }
 0x9b2   : > { %v3471_v28 = vpop.eup %3470 }
 0x9b3   : > { %v1993_v29 = vmul.f32 %v3471_v28, %v3463_v7 }
 0x9b4   : > { %2107 = vrot.lane.b32.xlu0 %v3987_v26, %s3535_s2  ;;  %s4268_s2 = scalar_lea.vmem %s4178_s14, %s3727_s29 }
 0x9b5   : > { %v1994_v30 = vpack.c.bf16 %v1993_v29, %v1993_v29 }
 0x9b7   : > { %3295 = vmatmul.mubr.msk.bf16.vlgmr.msra.gmra.mxu1 %vm1249_vm3, %v1994_v30 }
 0x9b8   : > { %3306 = vmatprep.mubr.msk.bf16.mxu1 %vm3531_vm1, %v3530_v3 }
 0xa17   : > { %v2103_v31 = vpop.xlane.xlu0 %2102 }
 0xa18   : > { %3472 = vrcp.f32 %v2103_v31 }
 0xa1f   : > { %v2213_v32 = vpop.xlane.xlu1 %2212 }
 0xa20   : > { %3474 = vrcp.f32 %v2213_v32  ;;  %v3118_v32 = vld [vmem:[%s4268_s2] ss:$0 sm:$0xff]  ;;  %s4276_s2 = sld [smem:[#allocation28_spill]] (!%p3132_p8) }
 0xa23   : > { %v2218_v38 = vpop.permute.xlu1 %2217 }
 0xa24   : > { %v2223_v40 = vsel %vm1313_vm4, %v2218_v38, 0  ;;  %v3442_v38 = vld [vmem:[%s3814_s11 + $0x8] sm:$0xff]  }
 0xa25   : > { %v3473_v33 = vpop.eup %3472 }
 0xa26   : > { %v2105_v35 = vmul.f32 %v3473_v33, %v3465_v17 }
 0xa27   : > { %v2323_v34 = vpop.xlane.xlu0 %2322  ;;  %v2328_v42 = vpop.permute.xlu1 %2327 }
 0xa28   : > { %3476 = vrcp.f32 %v2323_v34  ;;  %v2106_v26 = vpack.c.bf16 %v2105_v35, %v2105_v35  ;;  %v2333_v45 = vsel %vm1313_vm4, %v2328_v42, 0  ;;  %v3119_v34 = vld [vmem:[%s4269_s5] ss:$0 sm:$0xff]  ;;  %s4277_s5 = sld [smem:[#allocation29_spill]] (!%p3132_p8) }
 0xa2b   : > { %v2108_v36 = vpop.permute.xlu0 %2107 }
 0xa2c   : > { %v2113_v37 = vsel %vm1313_vm4, %v2108_v36, 0 }
 0xa2d   : > { %3305 = vmatpush3.bf16.msra.mxu1 %v2113_v37  ;;  %v3475_v39 = vpop.eup %3474 }
 0xa2e   : > { %3316 = vmatprep.subr.bf16.mxu1 %v3530_v3  ;;  %v2215_v41 = vmul.f32 %v3475_v39, %v3467_v19 }
 0xa30   : > { %3307 = vmatmul.mubr.msk.bf16.vlgmr.msra.gmra.mxu1 %vm1249_vm3, %v2106_v26  ;;  %v2216_v43 = vpack.c.bf16 %v2215_v41, %v2215_v41  ;;  %v3443_v26 = vld [vmem:[%s3814_s11] sm:$0xff]  }
 0xa31   : > { %3317 = vmatpush3.bf16.msra.mxu1 %v2223_v40  ;;  %3318 = vmatprep.mubr.msk.bf16.mxu1 %vm3531_vm1, %v3530_v3 }
 0xa32   : > { %3328 = vmatprep.subr.bf16.mxu1 %v3530_v3 }
 0xa35   : > { %v3477_v44 = vpop.eup %3476 }
 0xa36   : > { %v2325_v46 = vmul.f32 %v3477_v44, %v3469_v22 }
 0xa38   : > { %3319 = vmatmul.mubr.msk.bf16.vlgmr.msra.gmra.mxu1 %vm1249_vm3, %v2216_v43  ;;  %v2326_v47 = vpack.c.bf16 %v2325_v46, %v2325_v46 }
 0xa39   : > { %3329 = vmatpush3.bf16.msra.mxu1 %v2333_v45  ;;  %3330 = vmatprep.mubr.msk.bf16.mxu1 %vm3531_vm1, %v3530_v3 }
 0xa3a   : > { %3342 = vmatprep.subr.bf16.mxu1 %v3530_v3 }
 0xa40   : > { %3331 = vmatmul.mubr.msk.bf16.vlgmr.msra.gmra.mxu1 %vm1249_vm3, %v2326_v47 }
 0xa41   : > { %3346 = vmatprep.mubr.msk.bf16.mxu1 %vm3531_vm1, %v3530_v3  ;;  %3343 = vmatpush3.bf16.msra.mxu1 %v3438_v24 }
 0xa42   : > { %3344 = vmatprep.subr.bf16.mxu1 %v3530_v3 }
 0xa45   : > { %3345 = vmatpush3.bf16.msra.mxu1 %v3439_v25 }
 0xa77   : > { %v2038_v48 = vpop.f32.mrf.mxu1 }
 0xa79   : > { %v3296_v49 = vpop.f32.mrf.mxu1 }
 0xa7b   : > { %v2041_v50 = vpop.f32.mrf.mxu1 }
 0xa7d   : > { %v3297_v51 = vpop.f32.mrf.mxu1 }
 0xaf0   : > { %v2149_v53 = vpop.f32.mrf.mxu1 }
 0xaf1   : > { %2376 = vrot.lane.b32.xlu0 %v2149_v53, %s3543_s3 }
 0xaf2   : > { %v3308_v54 = vpop.f32.mrf.mxu1 }
 0xaf4   : > { %v2152_v56 = vpop.f32.mrf.mxu1 }
 0xaf6   : > { %v3309_v57 = vpop.f32.mrf.mxu1 }
 0xaf8   : > { %v2259_v58 = vpop.f32.mrf.mxu1 }
 0xaf9   : > { %2380 = vrot.lane.b32.xlu1 %v2259_v58, %s3544_s10 }
 0xafa   : > { %v3320_v59 = vpop.f32.mrf.mxu1 }
 0xafc   : > { %v2262_v60 = vpop.f32.mrf.mxu1 }
 0xafe   : > { %v3321_v61 = vpop.f32.mrf.mxu1 }
 0xb00   : > { %v2369_v62 = vpop.f32.mrf.mxu1 }
 0xb01   : > { %2384 = vrot.lane.b32.xlu0 %v2369_v62, %s3545_s27  ;;  %s4270_s27 = sld [smem:[#allocation26_spill]] }
 0xb02   : > { %v3332_v63 = vpop.f32.mrf.mxu1 }
 0xb03   : > { %v3130_v63 = vld [vmem:[%s1157_s26] ss:$0 sm:$0xff] }
 0xb04   : > { %v2372_v0 = vpop.f32.mrf.mxu1 }
 0xb06   : > { %v3333_v1 = vpop.f32.mrf.mxu1 }
 0xb07   : > { %s4271_s8 = scalar_lea.vmem %s4270_s27, %s3727_s29  ;;  %v3131_v1 = vld [vmem:[%s4273_s23] ss:$0 sm:$0xff]  ;;  %s4278_s27 = sld [smem:[#allocation31_spill]] (!%p3132_p8) }
 0xb08   : > { %v3120_v39 = vld [vmem:[%s4271_s8] ss:$0 sm:$0xff] }
 0xb63   : > { %v2377_v2 = vpop.permute.xlu0 %2376 }
 0xb64   : > { %v2387_v6 = vsel %vm1249_vm3, %v2038_v48, %v2377_v2 }
 0xb6b   : > { %v2381_v4 = vpop.permute.xlu1 %2380 }
 0xb6c   : > { %v2388_v7 = vsel %vm1700_vm5, %v2387_v6, %v2381_v4 }
 0xb73   : > { %v2385_v5 = vpop.permute.xlu0 %2384 }
 0xb74   : > { %v2389_v8 = vsel %vm1702_vm6, %v2388_v7, %v2385_v5 }
 0xb75   : > { %v2390_v9 = vpack.c.bf16 %v2389_v8, %v2389_v8 }
 0xb77   : > { %3339 = vmatmul.mubr.msk.bf16.vlgmr.msra.gmra.mxu0 %vm1201_vm2, %v2390_v9 }
 0xb78   : > { %3358 = vmatprep.mubr.msk.bf16.mxu0 %vm3531_vm1, %v3530_v3 }
 0xc37   : > { %v2451_v12 = vpop.f32.mrf.mxu0 }
 0xc38   : > { %v2452_v13 = vadd.f32 %v3114_v10, %v2451_v12 }
 0xc39   : > { %v3340_v14 = vpop.f32.mrf.mxu0 }
 0xc3a   : > { %v2457_v15 = vadd.f32 %v2452_v13, %v3975_v20  ;;  %v3440_v20 = vld [vmem:[%s3814_s11 + $0x18] sm:$0xff]   ;;  %s4280_s11 = scalar_lea.vmem (!%p3132_p8), %s4279_s22, %s3729_s1 }
 0xc3b   : > { %v2454_v16 = vpop.f32.mrf.mxu0  ;;  %3351 = vmatpush3.bf16.msra.mxu0 %v3440_v20 }
 0xc3c   : > { %v2460_v17 = vsel %vm1201_vm2, %v2457_v15, 0.0  ;;  %3352 = vmatprep.subr.bf16.mxu0 %v3530_v3 }
 0xc3d   : > { %2461 = vadd.xlane.f32.xlu1 %v2460_v17  ;;  %v3341_v18 = vpop.f32.mrf.mxu0 }
 0xc3f   : > { %3353 = vmatpush3.bf16.msra.mxu0 %v3441_v27 }
 0xc40   : > { %3354 = vmatprep.subr.bf16.mxu0 %v3530_v3 }
 0xc43   : > { %3355 = vmatpush3.bf16.msra.mxu0 %v3442_v38 }
 0xc44   : > { %3356 = vmatprep.subr.bf16.mxu0 %v3530_v3  ;;  %v3124_v3 = vld [vmem:[%s1154_s7] ss:$0 sm:$0xff] }
 0xc47   : > { %3357 = vmatpush3.bf16.msra.mxu0 %v3443_v26 }
 0xcc6   : > { %v2462_v11 = vpop.xlane.xlu1 %2461 }
 0xcc7   : > { %v2463_v19 = vmul.f32 0.03125, %v2462_v11 }
 0xcc9   : > { %v2464_v21 = vsub.f32 %v2457_v15, %v2463_v19 }
 0xccb   : > { %v2465_v22 = vmul.f32 %v2464_v21, %v2464_v21 }
 0xccd   : > { %v2466_v23 = vsel %vm1201_vm2, %v2465_v22, 0.0 }
 0xcce   : > { %2467 = vadd.xlane.f32.xlu0 %v2466_v23 }
 0xd57   : > { %v2468_v28 = vpop.xlane.xlu0 %2467 }
 0xd58   : > { %v2469_v29 = vmul.f32 0.03125, %v2468_v28 }
 0xd5a   : > { %v2470_v30 = vadd.f32 1e-05, %v2469_v29 }
 0xd5c   : > { %3478 = vrsqrt.f32 %v2470_v30 }
 0xd69   : > { %v3479_v31 = vpop.eup %3478 }
 0xd6a   : > { %v2472_v33 = vmul.f32 %v3479_v31, %v2464_v21 }
 0xd6c   : > { %v2479_v35 = vmul.f32 %v3118_v32, %v2472_v33 }
 0xd6e   : > { %v2486_v36 = vadd.f32 %v3119_v34, %v2479_v35 }
 0xd70   : > { %v2487_v37 = vpack.c.bf16 %v2486_v36, %v2486_v36 }
 0xd72   : > { %3347 = vmatmul.mubr.msk.bf16.vlgmr.msra.gmra.mxu1 %vm1201_vm2, %v2487_v37 }
 0xe32   : > { %v2548_v40 = vpop.f32.mrf.mxu1 }
 0xe33   : > { %v2549_v41 = vadd.f32 %v3120_v39, %v2548_v40 }
 0xe34   : > { %v3348_v42 = vpop.f32.mrf.mxu1 }
 0xe35   : > { %v2554_v43 = vmax.f32 %v2549_v41, 0.0 }
 0xe36   : > { %v2551_v44 = vpop.f32.mrf.mxu1 }
 0xe37   : > { %v2555_v45 = vpack.c.bf16 %v2554_v43, %v2554_v43 }
 0xe38   : > { %v3349_v46 = vpop.f32.mrf.mxu1 }
 0xe39   : > { %3359 = vmatmul.mubr.msk.bf16.vlgmr.msra.gmra.mxu0 %vm2595_vm7, %v2555_v45 }
 0xef9   : > { %v2633_v47 = vpop.f32.mrf.mxu0 }
 0xefa   : > { %v2634_v48 = vadd.f32 %v3124_v3, %v2633_v47 }
 0xefb   : > { %v3360_v49 = vpop.f32.mrf.mxu0 }
 0xefc   : > { %v2639_v50 = vadd.f32 %v2634_v48, %v2486_v36 }
 0xefd   : > { %v2636_v51 = vpop.f32.mrf.mxu0 }
 0xefe   : > { %v2642_v52 = vsel %vm1201_vm2, %v2639_v50, 0.0 }
 0xeff   : > { %2643 = vadd.xlane.f32.xlu0 %v2642_v52  ;;  %v3361_v53 = vpop.f32.mrf.mxu0 }
 0xf88   : > { %v2644_v54 = vpop.xlane.xlu0 %2643 }
 0xf89   : > { %v2645_v55 = vmul.f32 0.03125, %v2644_v54 }
 0xf8b   : > { %v2646_v56 = vsub.f32 %v2639_v50, %v2645_v55 }
 0xf8d   : > { %v2647_v57 = vmul.f32 %v2646_v56, %v2646_v56 }
 0xf8f   : > { %v2648_v58 = vsel %vm1201_vm2, %v2647_v57, 0.0 }
 0xf90   : > { %2649 = vadd.xlane.f32.xlu1 %v2648_v58 }
0x1019   : > { %v2650_v59 = vpop.xlane.xlu1 %2649 }
0x101a   : > { %v2651_v60 = vmul.f32 0.03125, %v2650_v59 }
0x101c   : > { %v2652_v61 = vadd.f32 1e-05, %v2651_v60 }
0x101e   : > { %3480 = vrsqrt.f32 %v2652_v61 }
0x102b   : > { %v3481_v62 = vpop.eup %3480 }
0x102c   : > { %v2654_v0 = vmul.f32 %v3481_v62, %v2646_v56 }
0x102e   : > { %v2661_v2 = vmul.f32 %v3130_v63, %v2654_v0  ;;  %2673 = sbr.rel (%p3132_p8) target bundleno = 4963 (0x1363), region = 136 }
0x1030   : > { %v2668_v4 = vadd.f32 %v3131_v1, %v2661_v2 }
0x1032   : > { %2669 = vst.msk [vmem:[#allocation2] sm:$0xff] %vm1201_vm2, %v2668_v4 }
0x1033   : > { %v2676_v6 = vsel %vm1201_vm2, %v2668_v4, 0.0  ;;  %v3482_v12 = vld [vmem:[%s4275_s21 + $0x8] sm:$0xff]   ;;  %v3546_v13 = vmov 0.0   ;;  %vm3547_vm8 = vmmov 0   ;;  %v3483_v14 = vld [vmem:[%s4275_s21] sm:$0xff]  }
0x1034   : > { %2677 = vadd.xlane.f32.xlu0 %v2676_v6  ;;  %3362 = vmatprep.subr.bf16.mxu0 %v3546_v13  ;;  %v3133_v11 = vld [vmem:[%s4276_s2] ss:$0 sm:$0xff] }
0x1035   : > { %3366 = vmatprep.mubr.msk.bf16.mxu0 %vm3547_vm8, %v3546_v13  ;;  %3363 = vmatpush3.bf16.msra.mxu0 %v3482_v12  ;;  %v3134_v21 = vld [vmem:[%s4277_s5] ss:$0 sm:$0xff] }
0x1036   : > { %3364 = vmatprep.subr.bf16.mxu0 %v3546_v13  ;;  %v3135_v25 = vld [vmem:[%s4278_s27] ss:$0 sm:$0xff] }
0x1039   : > { %3365 = vmatpush3.bf16.msra.mxu0 %v3483_v14 }
0x10bd   : > { %v2678_v7 = vpop.xlane.xlu0 %2677 }
0x10be   : > { %v2679_v5 = vmul.f32 0.03125, %v2678_v7 }
0x10c0   : > { %v2680_v8 = vsub.f32 %v2668_v4, %v2679_v5 }
0x10c2   : > { %v2681_v9 = vmul.f32 %v2680_v8, %v2680_v8 }
0x10c4   : > { %v2682_v10 = vsel %vm1201_vm2, %v2681_v9, 0.0 }
0x10c5   : > { %2683 = vadd.xlane.f32.xlu0 %v2682_v10 }
0x114e   : > { %v2684_v15 = vpop.xlane.xlu0 %2683 }
0x114f   : > { %v2685_v16 = vmul.f32 0.03125, %v2684_v15 }
0x1151   : > { %v2686_v17 = vadd.f32 1e-05, %v2685_v16 }
0x1153   : > { %3484 = vrsqrt.f32 %v2686_v17 }
0x1160   : > { %v3485_v18 = vpop.eup %3484 }
0x1161   : > { %v2688_v19 = vmul.f32 %v3485_v18, %v2680_v8 }
0x1163   : > { %v2695_v22 = vmul.f32 %v3133_v11, %v2688_v19 }
0x1165   : > { %v2702_v23 = vadd.f32 %v3134_v21, %v2695_v22 }
0x1167   : > { %v2703_v24 = vpack.c.bf16 %v2702_v23, %v2702_v23 }
0x1169   : > { %3367 = vmatmul.mubr.msk.bf16.vlgmr.msra.gmra.mxu0 %vm1201_vm2, %v2703_v24 }
0x1229   : > { %v2764_v20 = vpop.f32.mrf.mxu0 }
0x122a   : > { %v2765_v27 = vadd.f32 %v3135_v25, %v2764_v20 }
0x122b   : > { %v3368_v28 = vpop.f32.mrf.mxu0 }
0x122c   : > { %2770 = vmax.xlane.f32.xlu1 %v2765_v27 }
0x122d   : > { %v2767_v29 = vpop.f32.mrf.mxu0 }
0x122f   : > { %v3369_v30 = vpop.f32.mrf.mxu0 }
0x12b5   : > { %v2771_v31 = vpop.xlane.xlu1 %2770 }
0x12b6   : > { %v2772_v32 = vsub.f32 %v2765_v27, %v2771_v31 }
0x12b8   : > { %v2773_v33 = vmul.f32 1.442695, %v2772_v32 }
0x12ba   : > { %3486 = vpow2.f32 %v2773_v33 }
0x12c7   : > { %v3487_v34 = vpop.eup %3486 }
0x12c8   : > { %2775 = vadd.xlane.f32.xlu1 %v3487_v34 }
0x1351   : > { %v2776_v35 = vpop.xlane.xlu1 %2775 }
0x1352   : > { %3488 = vrcp.f32 %v2776_v35 }
0x135f   : > { %v3489_v36 = vpop.eup %3488 }
0x1360   : > { %v2778_v37 = vmul.f32 %v3489_v36, %v3487_v34 }
0x1362   : > { %2779 = vst [vmem:[%s4280_s11] sm:$0xff] %v2778_v37 }
0x1363 PF: > { %s4281_s7 = sld [smem:[#allocation6_spill]] }
0x1364   : > { %s4283_s4 = sld [smem:[#allocation5_spill]] }
0x1365   : > { %s4284_s8 = sld [smem:[#allocation7_spill]] }
0x1366   : > { %s4285_s30 = sld [smem:[#allocation8_spill]] }
0x1369   : > { %s37_s9 = sadd.s32 1, %s4281_s7   ;;  %s4282_s7 = sld [smem:[#allocation4_spill]] }
0x136a   : > { %p34_p9 = scmp.ge.s32.totalorder %s37_s9, 6  }
0x136c   :  { %36 = sbr.rel (!%p34_p9) target bundleno = 23 (0x17), region = 229 }

</bundles_post_ra>
